<compile_context>
chip_gen: v5e
topology: v5e:2x2
jax: 0.10.0
libtpu: 0.0.40
codegen_flags: <defaults>
</compile_context>

<pallas_src>
import functools

import jax
import jax.numpy as jnp
import numpy as np
from jax.experimental import pallas as pl
from jax.experimental.pallas import tpu as pltpu

_EPS = 1e-5


def _pick_row_tile(m):
    for t in (2048, 1024, 512, 256, 128, 64, 32, 16, 8):
        if m % t == 0:
            return t
    return m


def _choose_h_tile(h, w, row_budget):
    """Largest divisor of h whose row tile fits the budget; prefer >= 2 tiles."""
    divs = [d for d in range(h, 0, -1) if h % d == 0]
    fit = [d for d in divs if d * w <= row_budget]
    if not fit:
        return 1
    th = fit[0]
    if th == h and h > 1:
        smaller = [d for d in fit if d < h and d * w >= 64]
        if smaller:
            th = smaller[0]
    return th


def _vmem_limit_bytes():
    # ~52 MiB on v7x (64 MiB physical per TensorCore), capped at 100 MiB on v5e/v6e
    # (128 MiB physical); conservative fallback if the query is unavailable.
    try:
        cap = int(pltpu.get_tpu_info().vmem_capacity_bytes)
    except Exception:
        return 44 * 1024 * 1024
    return int(max(32 * 1024 * 1024,
                   min(cap - 12 * 1024 * 1024, 100 * 1024 * 1024)))


# --------------------------------------------------------------------------- #
# Conv stage kernel: [BN(prev)+ReLU ->] kh*kw shifted-row taps -> BN partials
# --------------------------------------------------------------------------- #
def _conv_stage_kernel(*refs, kh, kw, w, pad, th, out_rows, wout, h, fuse, fuse_k):
    # Ref order: x, w, [scale, shift,] out, stats, [acc (if not fuse_k)], [act (if fuse)]
    n_in = 4 if fuse else 2
    x_ref, w_ref = refs[0], refs[1]
    if fuse:
        scale_ref, shift_ref = refs[2], refs[3]
    out_ref, stats_ref = refs[n_in], refs[n_in + 1]
    pos = n_in + 2
    acc_ref = None
    if not fuse_k:
        acc_ref = refs[pos]
        pos += 1
    act_ref = refs[pos] if fuse else None

    in_len, cin = x_ref.shape
    cout = w_ref.shape[-1]
    L = out_rows * w
    out_len = out_ref.shape[0]

    if fuse:
        # BN(prev) + ReLU on the input slab; rows that correspond to this conv's
        # zero padding (outside the real image) are forced back to zero.
        t = pl.program_id(1)
        g0 = (t * th - pad) * w                       # global flat row of slab elem 0
        gidx = g0 + jax.lax.broadcasted_iota(jnp.int32, (in_len, 1), 0)
        valid = (gidx >= 0) & (gidx < h * w)
        a = jnp.maximum(x_ref[...].astype(jnp.float32) * scale_ref[...]
                        + shift_ref[...], 0.0)
        act_ref[...] = jnp.where(valid, a, 0.0).astype(act_ref.dtype)
        src = act_ref
    else:
        src = x_ref

    # Conv as kh*kw shifted-row taps on the flattened (rows, channels) slab.
    if fuse_k:
        # Lane-aligned channels: single MXU matmul with K = kh*kw*cin (im2col concat).
        taps = [src[i * w + j:i * w + j + L, :]
                for i in range(kh) for j in range(kw)]
        y = jnp.dot(jnp.concatenate(taps, axis=1),
                    w_ref[...].reshape(kh * kw * cin, cout),
                    preferred_element_type=jnp.float32)
    else:
        for i in range(kh):
            for j in range(kw):
                off = i * w + j
                p = jnp.dot(src[off:off + L, :], w_ref[i * kw + j],
                            preferred_element_type=jnp.float32)
                if i == 0 and j == 0:
                    acc_ref[...] = p
                else:
                    acc_ref[...] += p
        y = acc_ref[...]

    y_bf = y.astype(out_ref.dtype)

    # BN partial statistics over "owned" elements only, computed from the
    # bf16-rounded values the next stage actually reads:
    #   * valid output columns (full-width flattening leaves kw-1 garbage cols/row)
    #   * for overlapping conv_1 slabs, only the central th rows (halo / padding
    #     rows are owned by a neighbouring tile or are padding).
    coli = jax.lax.broadcasted_iota(jnp.int32, (out_rows, w, 1), 1)
    smask = coli < wout
    if out_rows != th:
        rowi = jax.lax.broadcasted_iota(jnp.int32, (out_rows, w, 1), 0)
        smask = smask & (rowi >= pad) & (rowi < pad + th)
    ys = jnp.where(smask, y_bf.astype(jnp.float32).reshape(out_rows, w, cout), 0.0)
    ssum = jnp.sum(ys, axis=(0, 1), keepdims=True).reshape(1, cout)
    ssq = jnp.sum(ys * ys, axis=(0, 1), keepdims=True).reshape(1, cout)
    stats_ref[...] = jnp.concatenate([ssum, ssq], axis=0)

    if out_len > L:
        out_ref[0:L, :] = y_bf
        # small flat tail so the next stage's last-row width taps stay in bounds
        out_ref[L:out_len, :] = jnp.zeros((out_len - L, cout), out_ref.dtype)
    else:
        out_ref[...] = y_bf


def _conv_stage(x_slabs, w_taps, *, kh, kw, w, pad, th, out_rows, wout, h,
                scale=None, shift=None, extra_tail=0, compiler_params=None):
    n, n_ht, in_len, cin = x_slabs.shape
    cout = w_taps.shape[-1]
    L = out_rows * w
    out_len = L + extra_tail
    assert in_len >= (kh - 1) * w + (kw - 1) + L
    fuse = scale is not None
    fuse_k = (cin % 128 == 0)   # lane-aligned channels -> single K = kh*kw*cin matmul

    kern = functools.partial(_conv_stage_kernel, kh=kh, kw=kw, w=w, pad=pad, th=th,
                             out_rows=out_rows, wout=wout, h=h, fuse=fuse,
                             fuse_k=fuse_k)

    in_specs = [pl.BlockSpec((None, None, in_len, cin), lambda b, t: (b, t, 0, 0)),
                pl.BlockSpec((kh * kw, cin, cout), lambda b, t: (0, 0, 0))]
    args = [x_slabs, w_taps]
    if fuse:
        in_specs += [pl.BlockSpec((1, cin), lambda b, t: (0, 0)),
                     pl.BlockSpec((1, cin), lambda b, t: (0, 0))]
        args += [scale, shift]

    scratch = []
    if not fuse_k:
        scratch.append(pltpu.VMEM((L, cout), jnp.float32))
    if fuse:
        scratch.append(pltpu.VMEM((in_len, cin), jnp.bfloat16))

    return pl.pallas_call(
        kern,
        grid=(n, n_ht),
        in_specs=in_specs,
        out_specs=(pl.BlockSpec((None, None, out_len, cout), lambda b, t: (b, t, 0, 0)),
                   pl.BlockSpec((None, None, 2, cout), lambda b, t: (b, t, 0, 0))),
        out_shape=(jax.ShapeDtypeStruct((n, n_ht, out_len, cout), jnp.bfloat16),
                   jax.ShapeDtypeStruct((n, n_ht, 2, cout), jnp.float32)),
        scratch_shapes=scratch,
        compiler_params=compiler_params,
    )(*args)


# --------------------------------------------------------------------------- #
# Epilogue: BatchNorm (precomputed scale/shift) + ReLU, bf16 output
# --------------------------------------------------------------------------- #
def _bn_relu_kernel(y_ref, scale_ref, shift_ref, o_ref):
    y = y_ref[...].astype(jnp.float32)
    o_ref[...] = jnp.maximum(y * scale_ref[...] + shift_ref[...], 0.0).astype(o_ref.dtype)


def _bn_relu_call(y_rows, scale, shift, compiler_params):
    m, c = y_rows.shape
    tm = _pick_row_tile(m)
    return pl.pallas_call(
        _bn_relu_kernel,
        grid=(m // tm,),
        in_specs=[pl.BlockSpec((tm, c), lambda i: (i, 0)),
                  pl.BlockSpec((1, c), lambda i: (0, 0)),
                  pl.BlockSpec((1, c), lambda i: (0, 0))],
        out_specs=pl.BlockSpec((tm, c), lambda i: (i, 0)),
        out_shape=jax.ShapeDtypeStruct((m, c), jnp.bfloat16),
        compiler_params=compiler_params,
    )(y_rows, scale, shift)


# --------------------------------------------------------------------------- #
# Tiny JAX glue: fold global BN statistics into a per-channel scale/shift
# --------------------------------------------------------------------------- #
def _bn_affine(stats, gamma, beta, count):
    s = jnp.sum(stats[:, :, 0, :], axis=(0, 1))
    ss = jnp.sum(stats[:, :, 1, :], axis=(0, 1))
    mean = s / count
    var = jnp.maximum(ss / count - mean * mean, 0.0)   # biased variance (training)
    rstd = jax.lax.rsqrt(var + _EPS)
    scale = gamma * rstd
    shift = beta - mean * scale
    c = scale.shape[0]
    return (scale.reshape(1, c).astype(jnp.float32),
            shift.reshape(1, c).astype(jnp.float32))


# --------------------------------------------------------------------------- #
# Forward pass of _DownUnet2DBlock.  Input NCHW, output NCHW.
# --------------------------------------------------------------------------- #
def down_unet_2d_block(x_nchw, params, kernel_size=3):
    (w1, b1, g1, be1, w2, b2, g2, be2) = params
    del b1, b2   # conv bias is exactly cancelled by training-mode BN mean subtraction

    kh, kw = kernel_size, 3
    assert kh % 2 == 1, "kernel_size must be odd"
    pad = kh // 2
    n, cin, h, w = x_nchw.shape
    wout1 = w - (kw - 1)
    wout2 = wout1 - (kw - 1)
    c1 = w1.shape[-1]
    c2 = w2.shape[-1]

    vlim = _vmem_limit_bytes()
    cp2 = pltpu.CompilerParams(dimension_semantics=("parallel", "parallel"),
                               vmem_limit_bytes=vlim)
    cp1 = pltpu.CompilerParams(dimension_semantics=("parallel",),
                               vmem_limit_bytes=vlim)

    # H-tile size so (double-buffered input/output slabs + scratch + matmul operand)
    # stays well inside the per-generation VMEM budget.
    bpr = (2 * 2 * max(cin, c1)            # input slab, double-buffered bf16
           + 2 * max(cin, c1)              # activated-slab scratch (stage 2) bf16
           + 2 * 2 * max(c1, c2)           # output slab, double-buffered bf16
           + 2 * kh * kw * max(cin, c1)    # tap / im2col matmul operand bf16
           + 4 * max(c1, c2))              # f32 accumulator
    row_budget = max(2 * w, (vlim // 3) // max(bpr, 1))
    th = _choose_h_tile(h, w, min(row_budget, 8192))
    n_ht = h // th

    # NHWC bf16, H zero-padded by 2*pad (conv1's own padding plus the halo rows each
    # tile computes for conv2), flattened, with a (kw-1)-element flat tail so the
    # last row's width taps stay in bounds.
    x = jnp.transpose(x_nchw, (0, 2, 3, 1)).astype(jnp.bfloat16)
    xp = jnp.pad(x, ((0, 0), (2 * pad, 2 * pad), (0, 0), (0, 0)))
    xf = jnp.pad(xp.reshape(n, (h + 4 * pad) * w, cin), ((0, 0), (0, kw - 1), (0, 0)))
    in_len1 = (th + 4 * pad) * w + (kw - 1)
    x_slabs = jnp.stack(
        [xf[:, t * th * w: t * th * w + in_len1, :] for t in range(n_ht)], axis=1)

    # Conv taps: (kh*kw, cin, cout) bf16, matching the (i, j) tap-loop order.
    w1t = w1.reshape(kh * kw, cin, c1).astype(jnp.bfloat16)
    w2t = w2.reshape(kh * kw, c1, c2).astype(jnp.bfloat16)

    # Stage 1: conv_1 on overlapping slabs (th + 2*pad output rows per tile, so the
    # next stage needs no halo gather) + BN1 partial statistics.
    conv1_slabs, st1 = _conv_stage(
        x_slabs, w1t, kh=kh, kw=kw, w=w, pad=pad, th=th, out_rows=th + 2 * pad,
        wout=wout1, h=h, extra_tail=kw - 1, compiler_params=cp2)
    scale1, shift1 = _bn_affine(st1, g1, be1, float(n * h * wout1))

    # Stage 2: fused BN1 + ReLU (with conv_2's zero padding re-applied via the row
    # mask) -> conv_2 -> BN2 partial statistics.  The first activation never
    # round-trips HBM as a separate tensor.
    conv2_tiles, st2 = _conv_stage(
        conv1_slabs, w2t, kh=kh, kw=kw, w=w, pad=pad, th=th, out_rows=th,
        wout=wout2, h=h, scale=scale1, shift=shift1, extra_tail=0,
        compiler_params=cp2)
    scale2, shift2 = _bn_affine(st2, g2, be2, float(n * h * wout2))

    # Stage 3: BN2 + ReLU epilogue over row tiles (bf16 output).
    out_flat = _bn_relu_call(conv2_tiles.reshape(n * h * w, c2), scale2, shift2, cp1)
    out = out_flat.reshape(n, h, w, c2)[:, :, :wout2, :]
    return jnp.transpose(out, (0, 3, 1, 2)).astype(jnp.float32)


# --------------------------------------------------------------------------- #
# Deterministic parameter initialization (shapes from the module __init__)
# --------------------------------------------------------------------------- #
def init_params(key, initial_filters, end_filters, kernel_size=3, in_middle_filters=None):
    mid = end_filters if in_middle_filters is None else in_middle_filters
    k1, k2, k3, k4 = jax.random.split(key, 4)

    fan1 = initial_filters * kernel_size * 3
    lim1 = 1.0 / np.sqrt(fan1)
    w1 = jax.random.uniform(k1, (kernel_size, 3, initial_filters, mid), jnp.float32, -lim1, lim1)
    b1 = jax.random.uniform(k2, (mid,), jnp.float32, -lim1, lim1)

    fan2 = mid * kernel_size * 3
    lim2 = 1.0 / np.sqrt(fan2)
    w2 = jax.random.uniform(k3, (kernel_size, 3, mid, end_filters), jnp.float32, -lim2, lim2)
    b2 = jax.random.uniform(k4, (end_filters,), jnp.float32, -lim2, lim2)

    g1, be1 = jnp.ones((mid,), jnp.float32), jnp.zeros((mid,), jnp.float32)
    g2, be2 = jnp.ones((end_filters,), jnp.float32), jnp.zeros((end_filters,), jnp.float32)
    return (w1, b1, g1, be1, w2, b2, g2, be2)


# --------------------------------------------------------------------------- #
# Pure-JAX f32 reference (with bias; correctness check only)
# --------------------------------------------------------------------------- #
def _reference(x_nchw, params, kernel_size=3):
    (w1, b1, g1, be1, w2, b2, g2, be2) = params
    pad_h = kernel_size // 2

    def conv(x, w, b):
        y = jax.lax.conv_general_dilated(
            x, w, window_strides=(1, 1),
            padding=((pad_h, pad_h), (0, 0)),
            dimension_numbers=("NHWC", "HWIO", "NHWC"))
        return y + b

    def bn_relu(y, g, be):
        mean = jnp.mean(y, axis=(0, 1, 2), keepdims=True)
        var = jnp.mean((y - mean) ** 2, axis=(0, 1, 2), keepdims=True)
        return jnp.maximum((y - mean) * jax.lax.rsqrt(var + _EPS) * g + be, 0.0)

    x = jnp.transpose(x_nchw, (0, 2, 3, 1)).astype(jnp.float32)
    hact = bn_relu(conv(x, w1, b1), g1, be1)
    hact = bn_relu(conv(hact, w2, b2), g2, be2)
    return jnp.transpose(hact, (0, 3, 1, 2))


if __name__ == "__main__":
    key = jax.random.PRNGKey(0)
    kx, kp = jax.random.split(key)

    # small shapes: batch=2, in_channels=4, spatial 16x16, mid=end filters=8
    N, CIN, H, W = 2, 4, 16, 16
    CMID, CEND, KSIZE = 8, 8, 3

    x = jax.random.normal(kx, (N, CIN, H, W), jnp.float32)
    params = init_params(kp, CIN, CEND, kernel_size=KSIZE, in_middle_filters=CMID)

    fwd = jax.jit(functools.partial(down_unet_2d_block, kernel_size=KSIZE))
    out = jax.block_until_ready(fwd(x, params))

    assert out.shape == (N, CEND, H, W - 4), out.shape

    # bf16 MXU operands / bf16 staging -> loose tolerance vs the f32 reference.
    ref = _reference(x, params, kernel_size=KSIZE)
    np.testing.assert_allclose(np.asarray(out), np.asarray(ref), rtol=5e-2, atol=1e-1)

    print("KERNEL_OK")
</pallas_src>

<mosaic_0001>
module attributes {stable_mosaic.version = 11 : i64} {
  func.func @_conv_stage_kernel(%arg0: i32, %arg1: i32, %arg2: memref<1x1x194x4xbf16, #tpu.memory_space<vmem>>, %arg3: memref<9x4x8xbf16, #tpu.memory_space<vmem>>, %arg4: memref<1x1x162x8xbf16, #tpu.memory_space<vmem>>, %arg5: memref<1x1x2x8xf32, #tpu.memory_space<vmem>>, %arg6: memref<160x8xf32, #tpu.memory_space<vmem>>) attributes {dimension_semantics = [#tpu.dimension_semantics<parallel>, #tpu.dimension_semantics<parallel>], iteration_bounds = array<i64: 2, 2>, scalar_prefetch = 0 : i64, scratch_operands = 1 : i64, tpu.core_type = #tpu.core_type<tc>, window_params = [{transform_indices = @transform_0, window_bounds = array<i64: 1, 1, 194, 4>}, {pipeline_mode = #tpu.pipeline_mode<synchronous>, transform_indices = @transform_1, window_bounds = array<i64: 9, 4, 8>}, {transform_indices = @transform_2, window_bounds = array<i64: 1, 1, 162, 8>}, {transform_indices = @transform_3, window_bounds = array<i64: 1, 1, 2, 8>}]} {
    %c0 = arith.constant 0 : index
    %c0_0 = arith.constant 0 : index
    %c0_1 = arith.constant 0 : index
    %c0_2 = arith.constant 0 : index
    %0 = vector.load %arg2[%c0, %c0_0, %c0_1, %c0_2] : memref<1x1x194x4xbf16, #tpu.memory_space<vmem>>, vector<1x1x160x4xbf16>
    %1 = vector.shape_cast %0 : vector<1x1x160x4xbf16> to vector<160x4xbf16>
    %c0_3 = arith.constant 0 : index
    %c0_4 = arith.constant 0 : index
    %c0_5 = arith.constant 0 : index
    %2 = vector.load %arg3[%c0_3, %c0_4, %c0_5] : memref<9x4x8xbf16, #tpu.memory_space<vmem>>, vector<1x4x8xbf16>
    %3 = vector.shape_cast %2 : vector<1x4x8xbf16> to vector<4x8xbf16>
    %cst = arith.constant dense<0.000000e+00> : vector<160x8xf32>
    %4 = tpu.matmul %1, %3, %cst {dimension_numbers = #tpu.dot_dimension_numbers<[1], [0], [0], [1], [0, 0, 1, 1], [], []>} : vector<160x4xbf16>, vector<4x8xbf16>, vector<160x8xf32> -> vector<160x8xf32>
    %c0_6 = arith.constant 0 : index
    %c0_7 = arith.constant 0 : index
    %5 = vector.load %arg6[%c0_6, %c0_7] : memref<160x8xf32, #tpu.memory_space<vmem>>, vector<160x8xf32>
    tpu.vector_store %arg6[%c0_6, %c0_7], %4 {strides = array<i32>} : memref<160x8xf32, #tpu.memory_space<vmem>>, vector<160x8xf32>,
    %c0_8 = arith.constant 0 : index
    %c0_9 = arith.constant 0 : index
    %c1 = arith.constant 1 : index
    %c0_10 = arith.constant 0 : index
    %6 = vector.load %arg2[%c0_8, %c0_9, %c1, %c0_10] : memref<1x1x194x4xbf16, #tpu.memory_space<vmem>>, vector<1x1x160x4xbf16>
    %7 = vector.shape_cast %6 : vector<1x1x160x4xbf16> to vector<160x4xbf16>
    %c1_11 = arith.constant 1 : index
    %c0_12 = arith.constant 0 : index
    %c0_13 = arith.constant 0 : index
    %8 = vector.load %arg3[%c1_11, %c0_12, %c0_13] : memref<9x4x8xbf16, #tpu.memory_space<vmem>>, vector<1x4x8xbf16>
    %9 = vector.shape_cast %8 : vector<1x4x8xbf16> to vector<4x8xbf16>
    %cst_14 = arith.constant dense<0.000000e+00> : vector<160x8xf32>
    %10 = tpu.matmul %7, %9, %cst_14 {dimension_numbers = #tpu.dot_dimension_numbers<[1], [0], [0], [1], [0, 0, 1, 1], [], []>} : vector<160x4xbf16>, vector<4x8xbf16>, vector<160x8xf32> -> vector<160x8xf32>
    %c0_15 = arith.constant 0 : index
    %c0_16 = arith.constant 0 : index
    %11 = vector.load %arg6[%c0_15, %c0_16] : memref<160x8xf32, #tpu.memory_space<vmem>>, vector<160x8xf32>
    %12 = arith.addf %11, %10 : vector<160x8xf32>
    %c0_17 = arith.constant 0 : index
    %c0_18 = arith.constant 0 : index
    %13 = vector.load %arg6[%c0_17, %c0_18] : memref<160x8xf32, #tpu.memory_space<vmem>>, vector<160x8xf32>
    tpu.vector_store %arg6[%c0_17, %c0_18], %12 {strides = array<i32>} : memref<160x8xf32, #tpu.memory_space<vmem>>, vector<160x8xf32>,
    %c0_19 = arith.constant 0 : index
    %c0_20 = arith.constant 0 : index
    %c2 = arith.constant 2 : index
    %c0_21 = arith.constant 0 : index
    %14 = vector.load %arg2[%c0_19, %c0_20, %c2, %c0_21] : memref<1x1x194x4xbf16, #tpu.memory_space<vmem>>, vector<1x1x160x4xbf16>
    %15 = vector.shape_cast %14 : vector<1x1x160x4xbf16> to vector<160x4xbf16>
    %c2_22 = arith.constant 2 : index
    %c0_23 = arith.constant 0 : index
    %c0_24 = arith.constant 0 : index
    %16 = vector.load %arg3[%c2_22, %c0_23, %c0_24] : memref<9x4x8xbf16, #tpu.memory_space<vmem>>, vector<1x4x8xbf16>
    %17 = vector.shape_cast %16 : vector<1x4x8xbf16> to vector<4x8xbf16>
    %cst_25 = arith.constant dense<0.000000e+00> : vector<160x8xf32>
    %18 = tpu.matmul %15, %17, %cst_25 {dimension_numbers = #tpu.dot_dimension_numbers<[1], [0], [0], [1], [0, 0, 1, 1], [], []>} : vector<160x4xbf16>, vector<4x8xbf16>, vector<160x8xf32> -> vector<160x8xf32>
    %c0_26 = arith.constant 0 : index
    %c0_27 = arith.constant 0 : index
    %19 = vector.load %arg6[%c0_26, %c0_27] : memref<160x8xf32, #tpu.memory_space<vmem>>, vector<160x8xf32>
    %20 = arith.addf %19, %18 : vector<160x8xf32>
    %c0_28 = arith.constant 0 : index
    %c0_29 = arith.constant 0 : index
    %21 = vector.load %arg6[%c0_28, %c0_29] : memref<160x8xf32, #tpu.memory_space<vmem>>, vector<160x8xf32>
    tpu.vector_store %arg6[%c0_28, %c0_29], %20 {strides = array<i32>} : memref<160x8xf32, #tpu.memory_space<vmem>>, vector<160x8xf32>,
    %c0_30 = arith.constant 0 : index
    %c0_31 = arith.constant 0 : index
    %c16 = arith.constant 16 : index
    %c0_32 = arith.constant 0 : index
    %22 = vector.load %arg2[%c0_30, %c0_31, %c16, %c0_32] : memref<1x1x194x4xbf16, #tpu.memory_space<vmem>>, vector<1x1x160x4xbf16>
    %23 = vector.shape_cast %22 : vector<1x1x160x4xbf16> to vector<160x4xbf16>
    %c3 = arith.constant 3 : index
    %c0_33 = arith.constant 0 : index
    %c0_34 = arith.constant 0 : index
    %24 = vector.load %arg3[%c3, %c0_33, %c0_34] : memref<9x4x8xbf16, #tpu.memory_space<vmem>>, vector<1x4x8xbf16>
    %25 = vector.shape_cast %24 : vector<1x4x8xbf16> to vector<4x8xbf16>
    %cst_35 = arith.constant dense<0.000000e+00> : vector<160x8xf32>
    %26 = tpu.matmul %23, %25, %cst_35 {dimension_numbers = #tpu.dot_dimension_numbers<[1], [0], [0], [1], [0, 0, 1, 1], [], []>} : vector<160x4xbf16>, vector<4x8xbf16>, vector<160x8xf32> -> vector<160x8xf32>
    %c0_36 = arith.constant 0 : index
    %c0_37 = arith.constant 0 : index
    %27 = vector.load %arg6[%c0_36, %c0_37] : memref<160x8xf32, #tpu.memory_space<vmem>>, vector<160x8xf32>
    %28 = arith.addf %27, %26 : vector<160x8xf32>
    %c0_38 = arith.constant 0 : index
    %c0_39 = arith.constant 0 : index
    %29 = vector.load %arg6[%c0_38, %c0_39] : memref<160x8xf32, #tpu.memory_space<vmem>>, vector<160x8xf32>
    tpu.vector_store %arg6[%c0_38, %c0_39], %28 {strides = array<i32>} : memref<160x8xf32, #tpu.memory_space<vmem>>, vector<160x8xf32>,
    %c0_40 = arith.constant 0 : index
    %c0_41 = arith.constant 0 : index
    %c17 = arith.constant 17 : index
    %c0_42 = arith.constant 0 : index
    %30 = vector.load %arg2[%c0_40, %c0_41, %c17, %c0_42] : memref<1x1x194x4xbf16, #tpu.memory_space<vmem>>, vector<1x1x160x4xbf16>
    %31 = vector.shape_cast %30 : vector<1x1x160x4xbf16> to vector<160x4xbf16>
    %c4 = arith.constant 4 : index
    %c0_43 = arith.constant 0 : index
    %c0_44 = arith.constant 0 : index
    %32 = vector.load %arg3[%c4, %c0_43, %c0_44] : memref<9x4x8xbf16, #tpu.memory_space<vmem>>, vector<1x4x8xbf16>
    %33 = vector.shape_cast %32 : vector<1x4x8xbf16> to vector<4x8xbf16>
    %cst_45 = arith.constant dense<0.000000e+00> : vector<160x8xf32>
    %34 = tpu.matmul %31, %33, %cst_45 {dimension_numbers = #tpu.dot_dimension_numbers<[1], [0], [0], [1], [0, 0, 1, 1], [], []>} : vector<160x4xbf16>, vector<4x8xbf16>, vector<160x8xf32> -> vector<160x8xf32>
    %c0_46 = arith.constant 0 : index
    %c0_47 = arith.constant 0 : index
    %35 = vector.load %arg6[%c0_46, %c0_47] : memref<160x8xf32, #tpu.memory_space<vmem>>, vector<160x8xf32>
    %36 = arith.addf %35, %34 : vector<160x8xf32>
    %c0_48 = arith.constant 0 : index
    %c0_49 = arith.constant 0 : index
    %37 = vector.load %arg6[%c0_48, %c0_49] : memref<160x8xf32, #tpu.memory_space<vmem>>, vector<160x8xf32>
    tpu.vector_store %arg6[%c0_48, %c0_49], %36 {strides = array<i32>} : memref<160x8xf32, #tpu.memory_space<vmem>>, vector<160x8xf32>,
    %c0_50 = arith.constant 0 : index
    %c0_51 = arith.constant 0 : index
    %c18 = arith.constant 18 : index
    %c0_52 = arith.constant 0 : index
    %38 = vector.load %arg2[%c0_50, %c0_51, %c18, %c0_52] : memref<1x1x194x4xbf16, #tpu.memory_space<vmem>>, vector<1x1x160x4xbf16>
    %39 = vector.shape_cast %38 : vector<1x1x160x4xbf16> to vector<160x4xbf16>
    %c5 = arith.constant 5 : index
    %c0_53 = arith.constant 0 : index
    %c0_54 = arith.constant 0 : index
    %40 = vector.load %arg3[%c5, %c0_53, %c0_54] : memref<9x4x8xbf16, #tpu.memory_space<vmem>>, vector<1x4x8xbf16>
    %41 = vector.shape_cast %40 : vector<1x4x8xbf16> to vector<4x8xbf16>
    %cst_55 = arith.constant dense<0.000000e+00> : vector<160x8xf32>
    %42 = tpu.matmul %39, %41, %cst_55 {dimension_numbers = #tpu.dot_dimension_numbers<[1], [0], [0], [1], [0, 0, 1, 1], [], []>} : vector<160x4xbf16>, vector<4x8xbf16>, vector<160x8xf32> -> vector<160x8xf32>
    %c0_56 = arith.constant 0 : index
    %c0_57 = arith.constant 0 : index
    %43 = vector.load %arg6[%c0_56, %c0_57] : memref<160x8xf32, #tpu.memory_space<vmem>>, vector<160x8xf32>
    %44 = arith.addf %43, %42 : vector<160x8xf32>
    %c0_58 = arith.constant 0 : index
    %c0_59 = arith.constant 0 : index
    %45 = vector.load %arg6[%c0_58, %c0_59] : memref<160x8xf32, #tpu.memory_space<vmem>>, vector<160x8xf32>
    tpu.vector_store %arg6[%c0_58, %c0_59], %44 {strides = array<i32>} : memref<160x8xf32, #tpu.memory_space<vmem>>, vector<160x8xf32>,
    %c0_60 = arith.constant 0 : index
    %c0_61 = arith.constant 0 : index
    %c32 = arith.constant 32 : index
    %c0_62 = arith.constant 0 : index
    %46 = vector.load %arg2[%c0_60, %c0_61, %c32, %c0_62] : memref<1x1x194x4xbf16, #tpu.memory_space<vmem>>, vector<1x1x160x4xbf16>
    %47 = vector.shape_cast %46 : vector<1x1x160x4xbf16> to vector<160x4xbf16>
    %c6 = arith.constant 6 : index
    %c0_63 = arith.constant 0 : index
    %c0_64 = arith.constant 0 : index
    %48 = vector.load %arg3[%c6, %c0_63, %c0_64] : memref<9x4x8xbf16, #tpu.memory_space<vmem>>, vector<1x4x8xbf16>
    %49 = vector.shape_cast %48 : vector<1x4x8xbf16> to vector<4x8xbf16>
    %cst_65 = arith.constant dense<0.000000e+00> : vector<160x8xf32>
    %50 = tpu.matmul %47, %49, %cst_65 {dimension_numbers = #tpu.dot_dimension_numbers<[1], [0], [0], [1], [0, 0, 1, 1], [], []>} : vector<160x4xbf16>, vector<4x8xbf16>, vector<160x8xf32> -> vector<160x8xf32>
    %c0_66 = arith.constant 0 : index
    %c0_67 = arith.constant 0 : index
    %51 = vector.load %arg6[%c0_66, %c0_67] : memref<160x8xf32, #tpu.memory_space<vmem>>, vector<160x8xf32>
    %52 = arith.addf %51, %50 : vector<160x8xf32>
    %c0_68 = arith.constant 0 : index
    %c0_69 = arith.constant 0 : index
    %53 = vector.load %arg6[%c0_68, %c0_69] : memref<160x8xf32, #tpu.memory_space<vmem>>, vector<160x8xf32>
    tpu.vector_store %arg6[%c0_68, %c0_69], %52 {strides = array<i32>} : memref<160x8xf32, #tpu.memory_space<vmem>>, vector<160x8xf32>,
    %c0_70 = arith.constant 0 : index
    %c0_71 = arith.constant 0 : index
    %c33 = arith.constant 33 : index
    %c0_72 = arith.constant 0 : index
    %54 = vector.load %arg2[%c0_70, %c0_71, %c33, %c0_72] : memref<1x1x194x4xbf16, #tpu.memory_space<vmem>>, vector<1x1x160x4xbf16>
    %55 = vector.shape_cast %54 : vector<1x1x160x4xbf16> to vector<160x4xbf16>
    %c7 = arith.constant 7 : index
    %c0_73 = arith.constant 0 : index
    %c0_74 = arith.constant 0 : index
    %56 = vector.load %arg3[%c7, %c0_73, %c0_74] : memref<9x4x8xbf16, #tpu.memory_space<vmem>>, vector<1x4x8xbf16>
    %57 = vector.shape_cast %56 : vector<1x4x8xbf16> to vector<4x8xbf16>
    %cst_75 = arith.constant dense<0.000000e+00> : vector<160x8xf32>
    %58 = tpu.matmul %55, %57, %cst_75 {dimension_numbers = #tpu.dot_dimension_numbers<[1], [0], [0], [1], [0, 0, 1, 1], [], []>} : vector<160x4xbf16>, vector<4x8xbf16>, vector<160x8xf32> -> vector<160x8xf32>
    %c0_76 = arith.constant 0 : index
    %c0_77 = arith.constant 0 : index
    %59 = vector.load %arg6[%c0_76, %c0_77] : memref<160x8xf32, #tpu.memory_space<vmem>>, vector<160x8xf32>
    %60 = arith.addf %59, %58 : vector<160x8xf32>
    %c0_78 = arith.constant 0 : index
    %c0_79 = arith.constant 0 : index
    %61 = vector.load %arg6[%c0_78, %c0_79] : memref<160x8xf32, #tpu.memory_space<vmem>>, vector<160x8xf32>
    tpu.vector_store %arg6[%c0_78, %c0_79], %60 {strides = array<i32>} : memref<160x8xf32, #tpu.memory_space<vmem>>, vector<160x8xf32>,
    %c0_80 = arith.constant 0 : index
    %c0_81 = arith.constant 0 : index
    %c34 = arith.constant 34 : index
    %c0_82 = arith.constant 0 : index
    %62 = vector.load %arg2[%c0_80, %c0_81, %c34, %c0_82] : memref<1x1x194x4xbf16, #tpu.memory_space<vmem>>, vector<1x1x160x4xbf16>
    %63 = vector.shape_cast %62 : vector<1x1x160x4xbf16> to vector<160x4xbf16>
    %c8 = arith.constant 8 : index
    %c0_83 = arith.constant 0 : index
    %c0_84 = arith.constant 0 : index
    %64 = vector.load %arg3[%c8, %c0_83, %c0_84] : memref<9x4x8xbf16, #tpu.memory_space<vmem>>, vector<1x4x8xbf16>
    %65 = vector.shape_cast %64 : vector<1x4x8xbf16> to vector<4x8xbf16>
    %cst_85 = arith.constant dense<0.000000e+00> : vector<160x8xf32>
    %66 = tpu.matmul %63, %65, %cst_85 {dimension_numbers = #tpu.dot_dimension_numbers<[1], [0], [0], [1], [0, 0, 1, 1], [], []>} : vector<160x4xbf16>, vector<4x8xbf16>, vector<160x8xf32> -> vector<160x8xf32>
    %c0_86 = arith.constant 0 : index
    %c0_87 = arith.constant 0 : index
    %67 = vector.load %arg6[%c0_86, %c0_87] : memref<160x8xf32, #tpu.memory_space<vmem>>, vector<160x8xf32>
    %68 = arith.addf %67, %66 : vector<160x8xf32>
    %c0_88 = arith.constant 0 : index
    %c0_89 = arith.constant 0 : index
    %69 = vector.load %arg6[%c0_88, %c0_89] : memref<160x8xf32, #tpu.memory_space<vmem>>, vector<160x8xf32>
    tpu.vector_store %arg6[%c0_88, %c0_89], %68 {strides = array<i32>} : memref<160x8xf32, #tpu.memory_space<vmem>>, vector<160x8xf32>,
    %c0_90 = arith.constant 0 : index
    %c0_91 = arith.constant 0 : index
    %70 = vector.load %arg6[%c0_90, %c0_91] : memref<160x8xf32, #tpu.memory_space<vmem>>, vector<160x8xf32>
    %71 = arith.truncf %70 : vector<160x8xf32> to vector<160x8xbf16>
    %72 = tpu.iota {dimensions = array<i32: 1>} : vector<10x16x1xi32>
    %c14_i32 = arith.constant 14 : i32
    %73 = vector.broadcast %c14_i32 : i32 to vector<10x16x1xi32>
    %74 = arith.cmpi slt, %72, %73 : vector<10x16x1xi32>
    %75 = tpu.iota {dimensions = array<i32: 0>} : vector<10x16x1xi32>
    %c1_i32 = arith.constant 1 : i32
    %76 = vector.broadcast %c1_i32 : i32 to vector<10x16x1xi32>
    %77 = arith.cmpi sge, %75, %76 : vector<10x16x1xi32>
    %78 = arith.andi %74, %77 : vector<10x16x1xi1>
    %c9_i32 = arith.constant 9 : i32
    %79 = vector.broadcast %c9_i32 : i32 to vector<10x16x1xi32>
    %80 = arith.cmpi slt, %75, %79 : vector<10x16x1xi32>
    %81 = arith.andi %78, %80 : vector<10x16x1xi1>
    %82 = arith.extf %71 : vector<160x8xbf16> to vector<160x8xf32>
    %83 = vector.shape_cast %82 : vector<160x8xf32> to vector<10x16x8xf32>
    %cst_92 = arith.constant 0.000000e+00 : f32
    %84 = vector.shape_cast %81 : vector<10x16x1xi1> to vector<10x16x1xi1>
    %85 = vector.broadcast %84 : vector<10x16x1xi1> to vector<10x16x8xi1>
    %86 = vector.broadcast %cst_92 : f32 to vector<10x16x8xf32>
    %87 = arith.select %85, %83, %86 : vector<10x16x8xi1>, vector<10x16x8xf32>
    %cst_93 = arith.constant dense<0.000000e+00> : vector<8xf32>
    %88 = vector.multi_reduction <add>, %87, %cst_93 [0, 1] : vector<10x16x8xf32> to vector<8xf32>
    %89 = vector.shape_cast %88 : vector<8xf32> to vector<1x1x8xf32>
    %90 = vector.shape_cast %89 : vector<1x1x8xf32> to vector<1x8xf32>
    %91 = arith.mulf %87, %87 : vector<10x16x8xf32>
    %cst_94 = arith.constant dense<0.000000e+00> : vector<8xf32>
    %92 = vector.multi_reduction <add>, %91, %cst_94 [0, 1] : vector<10x16x8xf32> to vector<8xf32>
    %93 = vector.shape_cast %92 : vector<8xf32> to vector<1x1x8xf32>
    %94 = vector.shape_cast %93 : vector<1x1x8xf32> to vector<1x8xf32>
    %95 = tpu.concatenate %90, %94 in 0 : vector<1x8xf32>, vector<1x8xf32> -> vector<2x8xf32>
    %c0_95 = arith.constant 0 : index
    %c0_96 = arith.constant 0 : index
    %c0_97 = arith.constant 0 : index
    %c0_98 = arith.constant 0 : index
    %96 = vector.load %arg5[%c0_95, %c0_96, %c0_97, %c0_98] : memref<1x1x2x8xf32, #tpu.memory_space<vmem>>, vector<1x1x2x8xf32>
    %97 = vector.shape_cast %96 : vector<1x1x2x8xf32> to vector<2x8xf32>
    %98 = vector.shape_cast %95 : vector<2x8xf32> to vector<1x1x2x8xf32>
    tpu.vector_store %arg5[%c0_95, %c0_96, %c0_97, %c0_98], %98 {strides = array<i32>} : memref<1x1x2x8xf32, #tpu.memory_space<vmem>>, vector<1x1x2x8xf32>,
    %c0_99 = arith.constant 0 : index
    %c0_100 = arith.constant 0 : index
    %c0_101 = arith.constant 0 : index
    %c0_102 = arith.constant 0 : index
    %99 = vector.load %arg4[%c0_99, %c0_100, %c0_101, %c0_102] : memref<1x1x162x8xbf16, #tpu.memory_space<vmem>>, vector<1x1x160x8xbf16>
    %100 = vector.shape_cast %99 : vector<1x1x160x8xbf16> to vector<160x8xbf16>
    %101 = vector.shape_cast %71 : vector<160x8xbf16> to vector<1x1x160x8xbf16>
    tpu.vector_store %arg4[%c0_99, %c0_100, %c0_101, %c0_102], %101 {strides = array<i32>} : memref<1x1x162x8xbf16, #tpu.memory_space<vmem>>, vector<1x1x160x8xbf16>,
    %cst_103 = arith.constant 0.000000e+00 : bf16
    %102 = vector.broadcast %cst_103 : bf16 to vector<2x8xbf16>
    %c0_104 = arith.constant 0 : index
    %c0_105 = arith.constant 0 : index
    %c160 = arith.constant 160 : index
    %c0_106 = arith.constant 0 : index
    %103 = vector.load %arg4[%c0_104, %c0_105, %c160, %c0_106] : memref<1x1x162x8xbf16, #tpu.memory_space<vmem>>, vector<1x1x2x8xbf16>
    %104 = vector.shape_cast %103 : vector<1x1x2x8xbf16> to vector<2x8xbf16>
    %105 = vector.shape_cast %102 : vector<2x8xbf16> to vector<1x1x2x8xbf16>
    tpu.vector_store %arg4[%c0_104, %c0_105, %c160, %c0_106], %105 {strides = array<i32>} : memref<1x1x162x8xbf16, #tpu.memory_space<vmem>>, vector<1x1x2x8xbf16>,
    return
  }
  func.func @transform_0(%arg0: i32, %arg1: i32) -> (i32, i32, i32, i32) {
    %c0_i32 = arith.constant 0 : i32
    %c0_i32_0 = arith.constant 0 : i32
    %c0_i32_1 = arith.constant 0 : i32
    return %arg0, %arg1, %c0_i32, %c0_i32_0 : i32, i32, i32, i32
  }
  func.func @transform_1(%arg0: i32, %arg1: i32) -> (i32, i32, i32) {
    %c0_i32 = arith.constant 0 : i32
    %c0_i32_0 = arith.constant 0 : i32
    %c0_i32_1 = arith.constant 0 : i32
    %c0_i32_2 = arith.constant 0 : i32
    return %c0_i32, %c0_i32_0, %c0_i32_1 : i32, i32, i32
  }
  func.func @transform_2(%arg0: i32, %arg1: i32) -> (i32, i32, i32, i32) {
    %c0_i32 = arith.constant 0 : i32
    %c0_i32_0 = arith.constant 0 : i32
    %c0_i32_1 = arith.constant 0 : i32
    return %arg0, %arg1, %c0_i32, %c0_i32_0 : i32, i32, i32, i32
  }
  func.func @transform_3(%arg0: i32, %arg1: i32) -> (i32, i32, i32, i32) {
    %c0_i32 = arith.constant 0 : i32
    %c0_i32_0 = arith.constant 0 : i32
    %c0_i32_1 = arith.constant 0 : i32
    return %arg0, %arg1, %c0_i32, %c0_i32_0 : i32, i32, i32, i32
  }
}

module attributes {stable_mosaic.version = 11 : i64} {
  func.func @_conv_stage_kernel(%arg0: i32, %arg1: i32, %arg2: memref<1x1x162x8xbf16, #tpu.memory_space<vmem>>, %arg3: memref<9x8x8xbf16, #tpu.memory_space<vmem>>, %arg4: memref<1x8xf32, #tpu.memory_space<vmem>>, %arg5: memref<1x8xf32, #tpu.memory_space<vmem>>, %arg6: memref<1x1x128x8xbf16, #tpu.memory_space<vmem>>, %arg7: memref<1x1x2x8xf32, #tpu.memory_space<vmem>>, %arg8: memref<128x8xf32, #tpu.memory_space<vmem>>, %arg9: memref<162x8xbf16, #tpu.memory_space<vmem>>) attributes {dimension_semantics = [#tpu.dimension_semantics<parallel>, #tpu.dimension_semantics<parallel>], iteration_bounds = array<i64: 2, 2>, scalar_prefetch = 0 : i64, scratch_operands = 2 : i64, tpu.core_type = #tpu.core_type<tc>, window_params = [{transform_indices = @transform_0, window_bounds = array<i64: 1, 1, 162, 8>}, {pipeline_mode = #tpu.pipeline_mode<synchronous>, transform_indices = @transform_1, window_bounds = array<i64: 9, 8, 8>}, {pipeline_mode = #tpu.pipeline_mode<synchronous>, transform_indices = @transform_2, window_bounds = array<i64: 1, 8>}, {pipeline_mode = #tpu.pipeline_mode<synchronous>, transform_indices = @transform_3, window_bounds = array<i64: 1, 8>}, {transform_indices = @transform_4, window_bounds = array<i64: 1, 1, 128, 8>}, {transform_indices = @transform_5, window_bounds = array<i64: 1, 1, 2, 8>}]} {
    %c8_i32 = arith.constant 8 : i32
    %0 = arith.muli %arg1, %c8_i32 : i32
    %c1_i32 = arith.constant 1 : i32
    %1 = arith.subi %0, %c1_i32 : i32
    %c16_i32 = arith.constant 16 : i32
    %2 = arith.muli %1, %c16_i32 : i32
    %3 = tpu.iota {dimensions = array<i32: 0>} : vector<162x1xi32>
    %4 = vector.broadcast %2 : i32 to vector<162x1xi32>
    %5 = arith.addi %4, %3 : vector<162x1xi32>
    %c0_i32 = arith.constant 0 : i32
    %6 = vector.broadcast %c0_i32 : i32 to vector<162x1xi32>
    %7 = arith.cmpi sge, %5, %6 : vector<162x1xi32>
    %c256_i32 = arith.constant 256 : i32
    %8 = vector.broadcast %c256_i32 : i32 to vector<162x1xi32>
    %9 = arith.cmpi slt, %5, %8 : vector<162x1xi32>
    %10 = arith.andi %7, %9 : vector<162x1xi1>
    %c0 = arith.constant 0 : index
    %c0_0 = arith.constant 0 : index
    %c0_1 = arith.constant 0 : index
    %c0_2 = arith.constant 0 : index
    %11 = vector.load %arg2[%c0, %c0_0, %c0_1, %c0_2] : memref<1x1x162x8xbf16, #tpu.memory_space<vmem>>, vector<1x1x162x8xbf16>
    %12 = vector.shape_cast %11 : vector<1x1x162x8xbf16> to vector<162x8xbf16>
    %13 = arith.extf %12 : vector<162x8xbf16> to vector<162x8xf32>
    %c0_3 = arith.constant 0 : index
    %c0_4 = arith.constant 0 : index
    %14 = vector.load %arg4[%c0_3, %c0_4] : memref<1x8xf32, #tpu.memory_space<vmem>>, vector<1x8xf32>
    %15 = vector.broadcast %14 : vector<1x8xf32> to vector<162x8xf32>
    %16 = arith.mulf %13, %15 : vector<162x8xf32>
    %c0_5 = arith.constant 0 : index
    %c0_6 = arith.constant 0 : index
    %17 = vector.load %arg5[%c0_5, %c0_6] : memref<1x8xf32, #tpu.memory_space<vmem>>, vector<1x8xf32>
    %18 = vector.broadcast %17 : vector<1x8xf32> to vector<162x8xf32>
    %19 = arith.addf %16, %18 : vector<162x8xf32>
    %cst = arith.constant 0.000000e+00 : f32
    %20 = vector.broadcast %cst : f32 to vector<162x8xf32>
    %21 = arith.maximumf %19, %20 : vector<162x8xf32>
    %cst_7 = arith.constant 0.000000e+00 : f32
    %22 = vector.shape_cast %10 : vector<162x1xi1> to vector<162x1xi1>
    %23 = vector.broadcast %22 : vector<162x1xi1> to vector<162x8xi1>
    %24 = vector.broadcast %cst_7 : f32 to vector<162x8xf32>
    %25 = arith.select %23, %21, %24 : vector<162x8xi1>, vector<162x8xf32>
    %26 = arith.truncf %25 : vector<162x8xf32> to vector<162x8xbf16>
    %c0_8 = arith.constant 0 : index
    %c0_9 = arith.constant 0 : index
    %27 = vector.load %arg9[%c0_8, %c0_9] : memref<162x8xbf16, #tpu.memory_space<vmem>>, vector<162x8xbf16>
    tpu.vector_store %arg9[%c0_8, %c0_9], %26 {strides = array<i32>} : memref<162x8xbf16, #tpu.memory_space<vmem>>, vector<162x8xbf16>,
    %c0_10 = arith.constant 0 : index
    %c0_11 = arith.constant 0 : index
    %28 = vector.load %arg9[%c0_10, %c0_11] : memref<162x8xbf16, #tpu.memory_space<vmem>>, vector<128x8xbf16>
    %c0_12 = arith.constant 0 : index
    %c0_13 = arith.constant 0 : index
    %c0_14 = arith.constant 0 : index
    %29 = vector.load %arg3[%c0_12, %c0_13, %c0_14] : memref<9x8x8xbf16, #tpu.memory_space<vmem>>, vector<1x8x8xbf16>
    %30 = vector.shape_cast %29 : vector<1x8x8xbf16> to vector<8x8xbf16>
    %cst_15 = arith.constant dense<0.000000e+00> : vector<128x8xf32>
    %31 = tpu.matmul %28, %30, %cst_15 {dimension_numbers = #tpu.dot_dimension_numbers<[1], [0], [0], [1], [0, 0, 1, 1], [], []>} : vector<128x8xbf16>, vector<8x8xbf16>, vector<128x8xf32> -> vector<128x8xf32>
    %c0_16 = arith.constant 0 : index
    %c0_17 = arith.constant 0 : index
    %32 = vector.load %arg8[%c0_16, %c0_17] : memref<128x8xf32, #tpu.memory_space<vmem>>, vector<128x8xf32>
    tpu.vector_store %arg8[%c0_16, %c0_17], %31 {strides = array<i32>} : memref<128x8xf32, #tpu.memory_space<vmem>>, vector<128x8xf32>,
    %c1 = arith.constant 1 : index
    %c0_18 = arith.constant 0 : index
    %33 = vector.load %arg9[%c1, %c0_18] : memref<162x8xbf16, #tpu.memory_space<vmem>>, vector<128x8xbf16>
    %c1_19 = arith.constant 1 : index
    %c0_20 = arith.constant 0 : index
    %c0_21 = arith.constant 0 : index
    %34 = vector.load %arg3[%c1_19, %c0_20, %c0_21] : memref<9x8x8xbf16, #tpu.memory_space<vmem>>, vector<1x8x8xbf16>
    %35 = vector.shape_cast %34 : vector<1x8x8xbf16> to vector<8x8xbf16>
    %cst_22 = arith.constant dense<0.000000e+00> : vector<128x8xf32>
    %36 = tpu.matmul %33, %35, %cst_22 {dimension_numbers = #tpu.dot_dimension_numbers<[1], [0], [0], [1], [0, 0, 1, 1], [], []>} : vector<128x8xbf16>, vector<8x8xbf16>, vector<128x8xf32> -> vector<128x8xf32>
    %c0_23 = arith.constant 0 : index
    %c0_24 = arith.constant 0 : index
    %37 = vector.load %arg8[%c0_23, %c0_24] : memref<128x8xf32, #tpu.memory_space<vmem>>, vector<128x8xf32>
    %38 = arith.addf %37, %36 : vector<128x8xf32>
    %c0_25 = arith.constant 0 : index
    %c0_26 = arith.constant 0 : index
    %39 = vector.load %arg8[%c0_25, %c0_26] : memref<128x8xf32, #tpu.memory_space<vmem>>, vector<128x8xf32>
    tpu.vector_store %arg8[%c0_25, %c0_26], %38 {strides = array<i32>} : memref<128x8xf32, #tpu.memory_space<vmem>>, vector<128x8xf32>,
    %c2 = arith.constant 2 : index
    %c0_27 = arith.constant 0 : index
    %40 = vector.load %arg9[%c2, %c0_27] : memref<162x8xbf16, #tpu.memory_space<vmem>>, vector<128x8xbf16>
    %c2_28 = arith.constant 2 : index
    %c0_29 = arith.constant 0 : index
    %c0_30 = arith.constant 0 : index
    %41 = vector.load %arg3[%c2_28, %c0_29, %c0_30] : memref<9x8x8xbf16, #tpu.memory_space<vmem>>, vector<1x8x8xbf16>
    %42 = vector.shape_cast %41 : vector<1x8x8xbf16> to vector<8x8xbf16>
    %cst_31 = arith.constant dense<0.000000e+00> : vector<128x8xf32>
    %43 = tpu.matmul %40, %42, %cst_31 {dimension_numbers = #tpu.dot_dimension_numbers<[1], [0], [0], [1], [0, 0, 1, 1], [], []>} : vector<128x8xbf16>, vector<8x8xbf16>, vector<128x8xf32> -> vector<128x8xf32>
    %c0_32 = arith.constant 0 : index
    %c0_33 = arith.constant 0 : index
    %44 = vector.load %arg8[%c0_32, %c0_33] : memref<128x8xf32, #tpu.memory_space<vmem>>, vector<128x8xf32>
    %45 = arith.addf %44, %43 : vector<128x8xf32>
    %c0_34 = arith.constant 0 : index
    %c0_35 = arith.constant 0 : index
    %46 = vector.load %arg8[%c0_34, %c0_35] : memref<128x8xf32, #tpu.memory_space<vmem>>, vector<128x8xf32>
    tpu.vector_store %arg8[%c0_34, %c0_35], %45 {strides = array<i32>} : memref<128x8xf32, #tpu.memory_space<vmem>>, vector<128x8xf32>,
    %c16 = arith.constant 16 : index
    %c0_36 = arith.constant 0 : index
    %47 = vector.load %arg9[%c16, %c0_36] : memref<162x8xbf16, #tpu.memory_space<vmem>>, vector<128x8xbf16>
    %c3 = arith.constant 3 : index
    %c0_37 = arith.constant 0 : index
    %c0_38 = arith.constant 0 : index
    %48 = vector.load %arg3[%c3, %c0_37, %c0_38] : memref<9x8x8xbf16, #tpu.memory_space<vmem>>, vector<1x8x8xbf16>
    %49 = vector.shape_cast %48 : vector<1x8x8xbf16> to vector<8x8xbf16>
    %cst_39 = arith.constant dense<0.000000e+00> : vector<128x8xf32>
    %50 = tpu.matmul %47, %49, %cst_39 {dimension_numbers = #tpu.dot_dimension_numbers<[1], [0], [0], [1], [0, 0, 1, 1], [], []>} : vector<128x8xbf16>, vector<8x8xbf16>, vector<128x8xf32> -> vector<128x8xf32>
    %c0_40 = arith.constant 0 : index
    %c0_41 = arith.constant 0 : index
    %51 = vector.load %arg8[%c0_40, %c0_41] : memref<128x8xf32, #tpu.memory_space<vmem>>, vector<128x8xf32>
    %52 = arith.addf %51, %50 : vector<128x8xf32>
    %c0_42 = arith.constant 0 : index
    %c0_43 = arith.constant 0 : index
    %53 = vector.load %arg8[%c0_42, %c0_43] : memref<128x8xf32, #tpu.memory_space<vmem>>, vector<128x8xf32>
    tpu.vector_store %arg8[%c0_42, %c0_43], %52 {strides = array<i32>} : memref<128x8xf32, #tpu.memory_space<vmem>>, vector<128x8xf32>,
    %c17 = arith.constant 17 : index
    %c0_44 = arith.constant 0 : index
    %54 = vector.load %arg9[%c17, %c0_44] : memref<162x8xbf16, #tpu.memory_space<vmem>>, vector<128x8xbf16>
    %c4 = arith.constant 4 : index
    %c0_45 = arith.constant 0 : index
    %c0_46 = arith.constant 0 : index
    %55 = vector.load %arg3[%c4, %c0_45, %c0_46] : memref<9x8x8xbf16, #tpu.memory_space<vmem>>, vector<1x8x8xbf16>
    %56 = vector.shape_cast %55 : vector<1x8x8xbf16> to vector<8x8xbf16>
    %cst_47 = arith.constant dense<0.000000e+00> : vector<128x8xf32>
    %57 = tpu.matmul %54, %56, %cst_47 {dimension_numbers = #tpu.dot_dimension_numbers<[1], [0], [0], [1], [0, 0, 1, 1], [], []>} : vector<128x8xbf16>, vector<8x8xbf16>, vector<128x8xf32> -> vector<128x8xf32>
    %c0_48 = arith.constant 0 : index
    %c0_49 = arith.constant 0 : index
    %58 = vector.load %arg8[%c0_48, %c0_49] : memref<128x8xf32, #tpu.memory_space<vmem>>, vector<128x8xf32>
    %59 = arith.addf %58, %57 : vector<128x8xf32>
    %c0_50 = arith.constant 0 : index
    %c0_51 = arith.constant 0 : index
    %60 = vector.load %arg8[%c0_50, %c0_51] : memref<128x8xf32, #tpu.memory_space<vmem>>, vector<128x8xf32>
    tpu.vector_store %arg8[%c0_50, %c0_51], %59 {strides = array<i32>} : memref<128x8xf32, #tpu.memory_space<vmem>>, vector<128x8xf32>,
    %c18 = arith.constant 18 : index
    %c0_52 = arith.constant 0 : index
    %61 = vector.load %arg9[%c18, %c0_52] : memref<162x8xbf16, #tpu.memory_space<vmem>>, vector<128x8xbf16>
    %c5 = arith.constant 5 : index
    %c0_53 = arith.constant 0 : index
    %c0_54 = arith.constant 0 : index
    %62 = vector.load %arg3[%c5, %c0_53, %c0_54] : memref<9x8x8xbf16, #tpu.memory_space<vmem>>, vector<1x8x8xbf16>
    %63 = vector.shape_cast %62 : vector<1x8x8xbf16> to vector<8x8xbf16>
    %cst_55 = arith.constant dense<0.000000e+00> : vector<128x8xf32>
    %64 = tpu.matmul %61, %63, %cst_55 {dimension_numbers = #tpu.dot_dimension_numbers<[1], [0], [0], [1], [0, 0, 1, 1], [], []>} : vector<128x8xbf16>, vector<8x8xbf16>, vector<128x8xf32> -> vector<128x8xf32>
    %c0_56 = arith.constant 0 : index
    %c0_57 = arith.constant 0 : index
    %65 = vector.load %arg8[%c0_56, %c0_57] : memref<128x8xf32, #tpu.memory_space<vmem>>, vector<128x8xf32>
    %66 = arith.addf %65, %64 : vector<128x8xf32>
    %c0_58 = arith.constant 0 : index
    %c0_59 = arith.constant 0 : index
    %67 = vector.load %arg8[%c0_58, %c0_59] : memref<128x8xf32, #tpu.memory_space<vmem>>, vector<128x8xf32>
    tpu.vector_store %arg8[%c0_58, %c0_59], %66 {strides = array<i32>} : memref<128x8xf32, #tpu.memory_space<vmem>>, vector<128x8xf32>,
    %c32 = arith.constant 32 : index
    %c0_60 = arith.constant 0 : index
    %68 = vector.load %arg9[%c32, %c0_60] : memref<162x8xbf16, #tpu.memory_space<vmem>>, vector<128x8xbf16>
    %c6 = arith.constant 6 : index
    %c0_61 = arith.constant 0 : index
    %c0_62 = arith.constant 0 : index
    %69 = vector.load %arg3[%c6, %c0_61, %c0_62] : memref<9x8x8xbf16, #tpu.memory_space<vmem>>, vector<1x8x8xbf16>
    %70 = vector.shape_cast %69 : vector<1x8x8xbf16> to vector<8x8xbf16>
    %cst_63 = arith.constant dense<0.000000e+00> : vector<128x8xf32>
    %71 = tpu.matmul %68, %70, %cst_63 {dimension_numbers = #tpu.dot_dimension_numbers<[1], [0], [0], [1], [0, 0, 1, 1], [], []>} : vector<128x8xbf16>, vector<8x8xbf16>, vector<128x8xf32> -> vector<128x8xf32>
    %c0_64 = arith.constant 0 : index
    %c0_65 = arith.constant 0 : index
    %72 = vector.load %arg8[%c0_64, %c0_65] : memref<128x8xf32, #tpu.memory_space<vmem>>, vector<128x8xf32>
    %73 = arith.addf %72, %71 : vector<128x8xf32>
    %c0_66 = arith.constant 0 : index
    %c0_67 = arith.constant 0 : index
    %74 = vector.load %arg8[%c0_66, %c0_67] : memref<128x8xf32, #tpu.memory_space<vmem>>, vector<128x8xf32>
    tpu.vector_store %arg8[%c0_66, %c0_67], %73 {strides = array<i32>} : memref<128x8xf32, #tpu.memory_space<vmem>>, vector<128x8xf32>,
    %c33 = arith.constant 33 : index
    %c0_68 = arith.constant 0 : index
    %75 = vector.load %arg9[%c33, %c0_68] : memref<162x8xbf16, #tpu.memory_space<vmem>>, vector<128x8xbf16>
    %c7 = arith.constant 7 : index
    %c0_69 = arith.constant 0 : index
    %c0_70 = arith.constant 0 : index
    %76 = vector.load %arg3[%c7, %c0_69, %c0_70] : memref<9x8x8xbf16, #tpu.memory_space<vmem>>, vector<1x8x8xbf16>
    %77 = vector.shape_cast %76 : vector<1x8x8xbf16> to vector<8x8xbf16>
    %cst_71 = arith.constant dense<0.000000e+00> : vector<128x8xf32>
    %78 = tpu.matmul %75, %77, %cst_71 {dimension_numbers = #tpu.dot_dimension_numbers<[1], [0], [0], [1], [0, 0, 1, 1], [], []>} : vector<128x8xbf16>, vector<8x8xbf16>, vector<128x8xf32> -> vector<128x8xf32>
    %c0_72 = arith.constant 0 : index
    %c0_73 = arith.constant 0 : index
    %79 = vector.load %arg8[%c0_72, %c0_73] : memref<128x8xf32, #tpu.memory_space<vmem>>, vector<128x8xf32>
    %80 = arith.addf %79, %78 : vector<128x8xf32>
    %c0_74 = arith.constant 0 : index
    %c0_75 = arith.constant 0 : index
    %81 = vector.load %arg8[%c0_74, %c0_75] : memref<128x8xf32, #tpu.memory_space<vmem>>, vector<128x8xf32>
    tpu.vector_store %arg8[%c0_74, %c0_75], %80 {strides = array<i32>} : memref<128x8xf32, #tpu.memory_space<vmem>>, vector<128x8xf32>,
    %c34 = arith.constant 34 : index
    %c0_76 = arith.constant 0 : index
    %82 = vector.load %arg9[%c34, %c0_76] : memref<162x8xbf16, #tpu.memory_space<vmem>>, vector<128x8xbf16>
    %c8 = arith.constant 8 : index
    %c0_77 = arith.constant 0 : index
    %c0_78 = arith.constant 0 : index
    %83 = vector.load %arg3[%c8, %c0_77, %c0_78] : memref<9x8x8xbf16, #tpu.memory_space<vmem>>, vector<1x8x8xbf16>
    %84 = vector.shape_cast %83 : vector<1x8x8xbf16> to vector<8x8xbf16>
    %cst_79 = arith.constant dense<0.000000e+00> : vector<128x8xf32>
    %85 = tpu.matmul %82, %84, %cst_79 {dimension_numbers = #tpu.dot_dimension_numbers<[1], [0], [0], [1], [0, 0, 1, 1], [], []>} : vector<128x8xbf16>, vector<8x8xbf16>, vector<128x8xf32> -> vector<128x8xf32>
    %c0_80 = arith.constant 0 : index
    %c0_81 = arith.constant 0 : index
    %86 = vector.load %arg8[%c0_80, %c0_81] : memref<128x8xf32, #tpu.memory_space<vmem>>, vector<128x8xf32>
    %87 = arith.addf %86, %85 : vector<128x8xf32>
    %c0_82 = arith.constant 0 : index
    %c0_83 = arith.constant 0 : index
    %88 = vector.load %arg8[%c0_82, %c0_83] : memref<128x8xf32, #tpu.memory_space<vmem>>, vector<128x8xf32>
    tpu.vector_store %arg8[%c0_82, %c0_83], %87 {strides = array<i32>} : memref<128x8xf32, #tpu.memory_space<vmem>>, vector<128x8xf32>,
    %c0_84 = arith.constant 0 : index
    %c0_85 = arith.constant 0 : index
    %89 = vector.load %arg8[%c0_84, %c0_85] : memref<128x8xf32, #tpu.memory_space<vmem>>, vector<128x8xf32>
    %90 = arith.truncf %89 : vector<128x8xf32> to vector<128x8xbf16>
    %91 = tpu.iota {dimensions = array<i32: 1>} : vector<8x16x1xi32>
    %c12_i32 = arith.constant 12 : i32
    %92 = vector.broadcast %c12_i32 : i32 to vector<8x16x1xi32>
    %93 = arith.cmpi slt, %91, %92 : vector<8x16x1xi32>
    %94 = arith.extf %90 : vector<128x8xbf16> to vector<128x8xf32>
    %95 = vector.shape_cast %94 : vector<128x8xf32> to vector<8x16x8xf32>
    %cst_86 = arith.constant 0.000000e+00 : f32
    %96 = vector.shape_cast %93 : vector<8x16x1xi1> to vector<8x16x1xi1>
    %97 = vector.broadcast %96 : vector<8x16x1xi1> to vector<8x16x8xi1>
    %98 = vector.broadcast %cst_86 : f32 to vector<8x16x8xf32>
    %99 = arith.select %97, %95, %98 : vector<8x16x8xi1>, vector<8x16x8xf32>
    %cst_87 = arith.constant dense<0.000000e+00> : vector<8xf32>
    %100 = vector.multi_reduction <add>, %99, %cst_87 [0, 1] : vector<8x16x8xf32> to vector<8xf32>
    %101 = vector.shape_cast %100 : vector<8xf32> to vector<1x1x8xf32>
    %102 = vector.shape_cast %101 : vector<1x1x8xf32> to vector<1x8xf32>
    %103 = arith.mulf %99, %99 : vector<8x16x8xf32>
    %cst_88 = arith.constant dense<0.000000e+00> : vector<8xf32>
    %104 = vector.multi_reduction <add>, %103, %cst_88 [0, 1] : vector<8x16x8xf32> to vector<8xf32>
    %105 = vector.shape_cast %104 : vector<8xf32> to vector<1x1x8xf32>
    %106 = vector.shape_cast %105 : vector<1x1x8xf32> to vector<1x8xf32>
    %107 = tpu.concatenate %102, %106 in 0 : vector<1x8xf32>, vector<1x8xf32> -> vector<2x8xf32>
    %c0_89 = arith.constant 0 : index
    %c0_90 = arith.constant 0 : index
    %c0_91 = arith.constant 0 : index
    %c0_92 = arith.constant 0 : index
    %108 = vector.load %arg7[%c0_89, %c0_90, %c0_91, %c0_92] : memref<1x1x2x8xf32, #tpu.memory_space<vmem>>, vector<1x1x2x8xf32>
    %109 = vector.shape_cast %108 : vector<1x1x2x8xf32> to vector<2x8xf32>
    %110 = vector.shape_cast %107 : vector<2x8xf32> to vector<1x1x2x8xf32>
    tpu.vector_store %arg7[%c0_89, %c0_90, %c0_91, %c0_92], %110 {strides = array<i32>} : memref<1x1x2x8xf32, #tpu.memory_space<vmem>>, vector<1x1x2x8xf32>,
    %c0_93 = arith.constant 0 : index
    %c0_94 = arith.constant 0 : index
    %c0_95 = arith.constant 0 : index
    %c0_96 = arith.constant 0 : index
    %111 = vector.load %arg6[%c0_93, %c0_94, %c0_95, %c0_96] : memref<1x1x128x8xbf16, #tpu.memory_space<vmem>>, vector<1x1x128x8xbf16>
    %112 = vector.shape_cast %111 : vector<1x1x128x8xbf16> to vector<128x8xbf16>
    %113 = vector.shape_cast %90 : vector<128x8xbf16> to vector<1x1x128x8xbf16>
    tpu.vector_store %arg6[%c0_93, %c0_94, %c0_95, %c0_96], %113 {strides = array<i32>} : memref<1x1x128x8xbf16, #tpu.memory_space<vmem>>, vector<1x1x128x8xbf16>,
    return
  }
  func.func @transform_0(%arg0: i32, %arg1: i32) -> (i32, i32, i32, i32) {
    %c0_i32 = arith.constant 0 : i32
    %c0_i32_0 = arith.constant 0 : i32
    %c0_i32_1 = arith.constant 0 : i32
    return %arg0, %arg1, %c0_i32, %c0_i32_0 : i32, i32, i32, i32
  }
  func.func @transform_1(%arg0: i32, %arg1: i32) -> (i32, i32, i32) {
    %c0_i32 = arith.constant 0 : i32
    %c0_i32_0 = arith.constant 0 : i32
    %c0_i32_1 = arith.constant 0 : i32
    %c0_i32_2 = arith.constant 0 : i32
    return %c0_i32, %c0_i32_0, %c0_i32_1 : i32, i32, i32
  }
  func.func @transform_2(%arg0: i32, %arg1: i32) -> (i32, i32) {
    %c0_i32 = arith.constant 0 : i32
    %c0_i32_0 = arith.constant 0 : i32
    %c0_i32_1 = arith.constant 0 : i32
    return %c0_i32, %c0_i32_0 : i32, i32
  }
  func.func @transform_3(%arg0: i32, %arg1: i32) -> (i32, i32) {
    %c0_i32 = arith.constant 0 : i32
    %c0_i32_0 = arith.constant 0 : i32
    %c0_i32_1 = arith.constant 0 : i32
    return %c0_i32, %c0_i32_0 : i32, i32
  }
  func.func @transform_4(%arg0: i32, %arg1: i32) -> (i32, i32, i32, i32) {
    %c0_i32 = arith.constant 0 : i32
    %c0_i32_0 = arith.constant 0 : i32
    %c0_i32_1 = arith.constant 0 : i32
    return %arg0, %arg1, %c0_i32, %c0_i32_0 : i32, i32, i32, i32
  }
  func.func @transform_5(%arg0: i32, %arg1: i32) -> (i32, i32, i32, i32) {
    %c0_i32 = arith.constant 0 : i32
    %c0_i32_0 = arith.constant 0 : i32
    %c0_i32_1 = arith.constant 0 : i32
    return %arg0, %arg1, %c0_i32, %c0_i32_0 : i32, i32, i32, i32
  }
}

module attributes {stable_mosaic.version = 11 : i64} {
  func.func @_bn_relu_kernel(%arg0: i32, %arg1: memref<512x8xbf16, #tpu.memory_space<vmem>>, %arg2: memref<1x8xf32, #tpu.memory_space<vmem>>, %arg3: memref<1x8xf32, #tpu.memory_space<vmem>>, %arg4: memref<512x8xbf16, #tpu.memory_space<vmem>>) attributes {dimension_semantics = [#tpu.dimension_semantics<parallel>], iteration_bounds = array<i64: 1>, scalar_prefetch = 0 : i64, scratch_operands = 0 : i64, tpu.core_type = #tpu.core_type<tc>, window_params = [{transform_indices = @transform_0, window_bounds = array<i64: 512, 8>}, {pipeline_mode = #tpu.pipeline_mode<synchronous>, transform_indices = @transform_1, window_bounds = array<i64: 1, 8>}, {pipeline_mode = #tpu.pipeline_mode<synchronous>, transform_indices = @transform_2, window_bounds = array<i64: 1, 8>}, {transform_indices = @transform_3, window_bounds = array<i64: 512, 8>}]} {
    %c0 = arith.constant 0 : index
    %c0_0 = arith.constant 0 : index
    %0 = vector.load %arg1[%c0, %c0_0] : memref<512x8xbf16, #tpu.memory_space<vmem>>, vector<512x8xbf16>
    %1 = arith.extf %0 : vector<512x8xbf16> to vector<512x8xf32>
    %c0_1 = arith.constant 0 : index
    %c0_2 = arith.constant 0 : index
    %2 = vector.load %arg2[%c0_1, %c0_2] : memref<1x8xf32, #tpu.memory_space<vmem>>, vector<1x8xf32>
    %3 = vector.broadcast %2 : vector<1x8xf32> to vector<512x8xf32>
    %4 = arith.mulf %1, %3 : vector<512x8xf32>
    %c0_3 = arith.constant 0 : index
    %c0_4 = arith.constant 0 : index
    %5 = vector.load %arg3[%c0_3, %c0_4] : memref<1x8xf32, #tpu.memory_space<vmem>>, vector<1x8xf32>
    %6 = vector.broadcast %5 : vector<1x8xf32> to vector<512x8xf32>
    %7 = arith.addf %4, %6 : vector<512x8xf32>
    %cst = arith.constant 0.000000e+00 : f32
    %8 = vector.broadcast %cst : f32 to vector<512x8xf32>
    %9 = arith.maximumf %7, %8 : vector<512x8xf32>
    %10 = arith.truncf %9 : vector<512x8xf32> to vector<512x8xbf16>
    %c0_5 = arith.constant 0 : index
    %c0_6 = arith.constant 0 : index
    %11 = vector.load %arg4[%c0_5, %c0_6] : memref<512x8xbf16, #tpu.memory_space<vmem>>, vector<512x8xbf16>
    tpu.vector_store %arg4[%c0_5, %c0_6], %10 {strides = array<i32>} : memref<512x8xbf16, #tpu.memory_space<vmem>>, vector<512x8xbf16>,
    return
  }
  func.func @transform_0(%arg0: i32) -> (i32, i32) {
    %c0_i32 = arith.constant 0 : i32
    %c0_i32_0 = arith.constant 0 : i32
    return %arg0, %c0_i32 : i32, i32
  }
  func.func @transform_1(%arg0: i32) -> (i32, i32) {
    %c0_i32 = arith.constant 0 : i32
    %c0_i32_0 = arith.constant 0 : i32
    %c0_i32_1 = arith.constant 0 : i32
    return %c0_i32, %c0_i32_0 : i32, i32
  }
  func.func @transform_2(%arg0: i32) -> (i32, i32) {
    %c0_i32 = arith.constant 0 : i32
    %c0_i32_0 = arith.constant 0 : i32
    %c0_i32_1 = arith.constant 0 : i32
    return %c0_i32, %c0_i32_0 : i32, i32
  }
  func.func @transform_3(%arg0: i32) -> (i32, i32) {
    %c0_i32 = arith.constant 0 : i32
    %c0_i32_0 = arith.constant 0 : i32
    return %arg0, %c0_i32 : i32, i32
  }
}

</mosaic_0001>

<bundles_post_ra>
// kernel: down_unet_2d_block.5
= control target key start
LH: loop header
LB: loop body
LE: loop exit
PB: predicated region body
PF: predicated region fallthrough
CT: control target
= control target key end

     0   :  { %vm406_vm0 = vcmask 60416   ;;  %s1146_s0 = inlined_call_operand.vmem [shape: bf16[512,8], index: 0, kind: input, shape index: {}]   ;;  %s1147_s1 = inlined_call_operand.vmem [shape: f32[1,8], index: 1, kind: input, shape index: {}]   ;;  %s1148_s2 = inlined_call_operand.vmem [shape: f32[1,8], index: 2, kind: input, shape index: {}]   ;;  %s1149_s3 = inlined_call_operand.vmem [shape: bf16[512,8], index: 3, kind: output, shape index: {}]  }
   0x1   :  { %v476_v0 = vld [vmem:[%s1146_s0] sm:$0xff]   ;;  %v603_v5 = vld [vmem:[%s1146_s0 + $0x8] sm:$0xff]   ;;  %v604_v8 = vld [vmem:[%s1146_s0 + $0x10] sm:$0xff]  }
   0x2   :  { %v662_v1 = vld [vmem:[%s1147_s1] ss:$0 sm:$0xff]  ;;  %v477_v2 = vunpack.c.l.bf16 %v476_v0  ;;  %v478_v4 = vunpack.c.h.bf16 %v476_v0  ;;  %v481_v6 = vunpack.c.l.bf16 %v603_v5  ;;  %v482_v7 = vunpack.c.h.bf16 %v603_v5  ;;  %v605_v9 = vld [vmem:[%s1146_s0 + $0x18] sm:$0xff]   ;;  %v607_v39 = vld [vmem:[%s1146_s0 + $0x28] sm:$0xff]  }
   0x3   :  { %v667_v3 = vld [vmem:[%s1148_s2] ss:$0 sm:$0xff]  ;;  %v485_v12 = vunpack.c.l.bf16 %v604_v8  ;;  %v486_v13 = vunpack.c.h.bf16 %v604_v8  ;;  %v489_v16 = vunpack.c.l.bf16 %v605_v9  ;;  %v490_v17 = vunpack.c.h.bf16 %v605_v9  ;;  %v608_v44 = vld [vmem:[%s1146_s0 + $0x30] sm:$0xff]   ;;  %v609_v49 = vld [vmem:[%s1146_s0 + $0x38] sm:$0xff]  }
   0x4   :  { %v146_v10 = vmul.f32 %v662_v1, %v477_v2  ;;  %v147_v11 = vmul.f32 %v662_v1, %v478_v4  ;;  %v148_v14 = vmul.f32 %v662_v1, %v481_v6  ;;  %v149_v15 = vmul.f32 %v662_v1, %v482_v7  ;;  %v606_v34 = vld [vmem:[%s1146_s0 + $0x20] sm:$0xff]  }
   0x5   :  { %v150_v20 = vmul.f32 %v662_v1, %v485_v12  ;;  %v151_v21 = vmul.f32 %v662_v1, %v486_v13  ;;  %v152_v24 = vmul.f32 %v662_v1, %v489_v16  ;;  %v153_v25 = vmul.f32 %v662_v1, %v490_v17  ;;  %v610_v16 = vld [vmem:[%s1146_s0 + $0x40] sm:$0xff]  }
   0x6   :  { %v214_v18 = vadd.f32 %v667_v3, %v146_v10  ;;  %v215_v19 = vadd.f32 %v667_v3, %v147_v11  ;;  %v216_v22 = vadd.f32 %v667_v3, %v148_v14  ;;  %v217_v23 = vadd.f32 %v667_v3, %v149_v15 }
   0x7   :  { %v218_v28 = vadd.f32 %v667_v3, %v150_v20  ;;  %v219_v29 = vadd.f32 %v667_v3, %v151_v21  ;;  %v220_v32 = vadd.f32 %v667_v3, %v152_v24  ;;  %v221_v33 = vadd.f32 %v667_v3, %v153_v25  ;;  %v611_v21 = vld [vmem:[%s1146_s0 + $0x48] sm:$0xff]  }
   0x8   :  { %v278_v26 = vmax.f32 %v214_v18, 0.0  ;;  %v279_v27 = vmax.f32 %v215_v19, 0.0  ;;  %v280_v30 = vmax.f32 %v216_v22, 0.0  ;;  %v281_v31 = vmax.f32 %v217_v23, 0.0 }
   0x9   :  { %v282_v37 = vmax.f32 %v218_v28, 0.0  ;;  %v283_v38 = vmax.f32 %v219_v29, 0.0  ;;  %v284_v42 = vmax.f32 %v220_v32, 0.0  ;;  %v285_v43 = vmax.f32 %v221_v33, 0.0 }
   0xa   :  { %v342_v35 = vpack.c.bf16 %v278_v26, %v278_v26  ;;  %v343_v36 = vpack.c.bf16 %v279_v27, %v279_v27  ;;  %v344_v40 = vpack.c.bf16 %v280_v30, %v280_v30  ;;  %v345_v41 = vpack.c.bf16 %v281_v31, %v281_v31  ;;  %v612_v26 = vld [vmem:[%s1146_s0 + $0x50] sm:$0xff]   ;;  %v613_v31 = vld [vmem:[%s1146_s0 + $0x58] sm:$0xff]  }
   0xb   :  { %v346_v45 = vpack.c.bf16 %v282_v37, %v282_v37  ;;  %v347_v46 = vpack.c.bf16 %v283_v38, %v283_v38  ;;  %v493_v47 = vunpack.c.l.bf16 %v606_v34  ;;  %v494_v48 = vunpack.c.h.bf16 %v606_v34 }
   0xc   :  { %407 = vst.msk [vmem:[%s1149_s3] sm:$0xf] %vm406_vm0, %v342_v35  ;;  %v348_v50 = vpack.c.bf16 %v284_v42, %v284_v42  ;;  %v349_v51 = vpack.c.bf16 %v285_v43, %v285_v43  ;;  %v497_v52 = vunpack.c.l.bf16 %v607_v39  ;;  %v498_v53 = vunpack.c.h.bf16 %v607_v39 }
   0xd   :  { %408 = vst.msk [vmem:[%s1149_s3 + $0x4] sm:$0xf] %vm406_vm0, %v343_v36  ;;  %v154_v54 = vmul.f32 %v662_v1, %v493_v47  ;;  %v155_v55 = vmul.f32 %v662_v1, %v494_v48  ;;  %v501_v56 = vunpack.c.l.bf16 %v608_v44  ;;  %v502_v57 = vunpack.c.h.bf16 %v608_v44 }
   0xe   :  { %409 = vst.msk [vmem:[%s1149_s3 + $0x8] sm:$0xf] %vm406_vm0, %v344_v40  ;;  %v156_v58 = vmul.f32 %v662_v1, %v497_v52  ;;  %v157_v59 = vmul.f32 %v662_v1, %v498_v53  ;;  %v505_v60 = vunpack.c.l.bf16 %v609_v49  ;;  %v506_v61 = vunpack.c.h.bf16 %v609_v49 }
   0xf   :  { %410 = vst.msk [vmem:[%s1149_s3 + $0xc] sm:$0xf] %vm406_vm0, %v345_v41  ;;  %v222_v62 = vadd.f32 %v667_v3, %v154_v54  ;;  %v223_v63 = vadd.f32 %v667_v3, %v155_v55  ;;  %v158_v0 = vmul.f32 %v662_v1, %v501_v56  ;;  %v159_v2 = vmul.f32 %v662_v1, %v502_v57 }
  0x10   :  { %411 = vst.msk [vmem:[%s1149_s3 + $0x10] sm:$0xf] %vm406_vm0, %v346_v45  ;;  %v224_v4 = vadd.f32 %v667_v3, %v156_v58  ;;  %v225_v5 = vadd.f32 %v667_v3, %v157_v59  ;;  %v160_v6 = vmul.f32 %v662_v1, %v505_v60  ;;  %v161_v7 = vmul.f32 %v662_v1, %v506_v61  ;;  %v614_v60 = vld [vmem:[%s1146_s0 + $0x60] sm:$0xff]  }
  0x11   :  { %412 = vst.msk [vmem:[%s1149_s3 + $0x14] sm:$0xf] %vm406_vm0, %v347_v46  ;;  %v286_v8 = vmax.f32 %v222_v62, 0.0  ;;  %v287_v9 = vmax.f32 %v223_v63, 0.0  ;;  %v226_v10 = vadd.f32 %v667_v3, %v158_v0  ;;  %v227_v11 = vadd.f32 %v667_v3, %v159_v2  ;;  %v615_v2 = vld [vmem:[%s1146_s0 + $0x68] sm:$0xff]  }
  0x12   :  { %413 = vst.msk [vmem:[%s1149_s3 + $0x18] sm:$0xf] %vm406_vm0, %v348_v50  ;;  %v288_v12 = vmax.f32 %v224_v4, 0.0  ;;  %v289_v13 = vmax.f32 %v225_v5, 0.0  ;;  %v228_v14 = vadd.f32 %v667_v3, %v160_v6  ;;  %v229_v15 = vadd.f32 %v667_v3, %v161_v7 }
  0x13   :  { %414 = vst.msk [vmem:[%s1149_s3 + $0x1c] sm:$0xf] %vm406_vm0, %v349_v51  ;;  %v350_v17 = vpack.c.bf16 %v286_v8, %v286_v8  ;;  %v351_v18 = vpack.c.bf16 %v287_v9, %v287_v9  ;;  %v290_v19 = vmax.f32 %v226_v10, 0.0  ;;  %v291_v20 = vmax.f32 %v227_v11, 0.0  ;;  %v616_v8 = vld [vmem:[%s1146_s0 + $0x70] sm:$0xff]  }
  0x14   :  { %v352_v22 = vpack.c.bf16 %v288_v12, %v288_v12  ;;  %v353_v23 = vpack.c.bf16 %v289_v13, %v289_v13  ;;  %v292_v24 = vmax.f32 %v228_v14, 0.0  ;;  %v293_v25 = vmax.f32 %v229_v15, 0.0  ;;  %v617_v13 = vld [vmem:[%s1146_s0 + $0x78] sm:$0xff]  }
  0x15   :  { %415 = vst.msk [vmem:[%s1149_s3 + $0x20] sm:$0xf] %vm406_vm0, %v350_v17  ;;  %v354_v27 = vpack.c.bf16 %v290_v19, %v290_v19  ;;  %v355_v28 = vpack.c.bf16 %v291_v20, %v291_v20  ;;  %v509_v29 = vunpack.c.l.bf16 %v610_v16  ;;  %v510_v30 = vunpack.c.h.bf16 %v610_v16 }
  0x16   :  { %416 = vst.msk [vmem:[%s1149_s3 + $0x24] sm:$0xf] %vm406_vm0, %v351_v18  ;;  %v356_v32 = vpack.c.bf16 %v292_v24, %v292_v24  ;;  %v357_v33 = vpack.c.bf16 %v293_v25, %v293_v25  ;;  %v513_v34 = vunpack.c.l.bf16 %v611_v21  ;;  %v514_v35 = vunpack.c.h.bf16 %v611_v21 }
  0x17   :  { %417 = vst.msk [vmem:[%s1149_s3 + $0x28] sm:$0xf] %vm406_vm0, %v352_v22  ;;  %v162_v36 = vmul.f32 %v662_v1, %v509_v29  ;;  %v163_v37 = vmul.f32 %v662_v1, %v510_v30  ;;  %v517_v38 = vunpack.c.l.bf16 %v612_v26  ;;  %v518_v39 = vunpack.c.h.bf16 %v612_v26 }
  0x18   :  { %418 = vst.msk [vmem:[%s1149_s3 + $0x2c] sm:$0xf] %vm406_vm0, %v353_v23  ;;  %v164_v40 = vmul.f32 %v662_v1, %v513_v34  ;;  %v165_v41 = vmul.f32 %v662_v1, %v514_v35  ;;  %v521_v42 = vunpack.c.l.bf16 %v613_v31  ;;  %v522_v43 = vunpack.c.h.bf16 %v613_v31 }
  0x19   :  { %419 = vst.msk [vmem:[%s1149_s3 + $0x30] sm:$0xf] %vm406_vm0, %v354_v27  ;;  %v230_v44 = vadd.f32 %v667_v3, %v162_v36  ;;  %v231_v45 = vadd.f32 %v667_v3, %v163_v37  ;;  %v166_v46 = vmul.f32 %v662_v1, %v517_v38  ;;  %v167_v47 = vmul.f32 %v662_v1, %v518_v39 }
  0x1a   :  { %420 = vst.msk [vmem:[%s1149_s3 + $0x34] sm:$0xf] %vm406_vm0, %v355_v28  ;;  %v232_v48 = vadd.f32 %v667_v3, %v164_v40  ;;  %v233_v49 = vadd.f32 %v667_v3, %v165_v41  ;;  %v168_v50 = vmul.f32 %v662_v1, %v521_v42  ;;  %v169_v51 = vmul.f32 %v662_v1, %v522_v43  ;;  %v618_v42 = vld [vmem:[%s1146_s0 + $0x80] sm:$0xff]  }
  0x1b   :  { %421 = vst.msk [vmem:[%s1149_s3 + $0x38] sm:$0xf] %vm406_vm0, %v356_v32  ;;  %v294_v52 = vmax.f32 %v230_v44, 0.0  ;;  %v295_v53 = vmax.f32 %v231_v45, 0.0  ;;  %v234_v54 = vadd.f32 %v667_v3, %v166_v46  ;;  %v235_v55 = vadd.f32 %v667_v3, %v167_v47  ;;  %v619_v47 = vld [vmem:[%s1146_s0 + $0x88] sm:$0xff]  }
  0x1c   :  { %422 = vst.msk [vmem:[%s1149_s3 + $0x3c] sm:$0xf] %vm406_vm0, %v357_v33  ;;  %v296_v56 = vmax.f32 %v232_v48, 0.0  ;;  %v297_v57 = vmax.f32 %v233_v49, 0.0  ;;  %v236_v58 = vadd.f32 %v667_v3, %v168_v50  ;;  %v237_v59 = vadd.f32 %v667_v3, %v169_v51 }
  0x1d   :  { %v358_v61 = vpack.c.bf16 %v294_v52, %v294_v52  ;;  %v359_v62 = vpack.c.bf16 %v295_v53, %v295_v53  ;;  %v298_v63 = vmax.f32 %v234_v54, 0.0  ;;  %v299_v0 = vmax.f32 %v235_v55, 0.0  ;;  %v620_v52 = vld [vmem:[%s1146_s0 + $0x90] sm:$0xff]  }
  0x1e   :  { %v360_v4 = vpack.c.bf16 %v296_v56, %v296_v56  ;;  %v361_v5 = vpack.c.bf16 %v297_v57, %v297_v57  ;;  %v300_v6 = vmax.f32 %v236_v58, 0.0  ;;  %v301_v7 = vmax.f32 %v237_v59, 0.0  ;;  %v621_v57 = vld [vmem:[%s1146_s0 + $0x98] sm:$0xff]  }
  0x1f   :  { %423 = vst.msk [vmem:[%s1149_s3 + $0x40] sm:$0xf] %vm406_vm0, %v358_v61  ;;  %v362_v9 = vpack.c.bf16 %v298_v63, %v298_v63  ;;  %v363_v10 = vpack.c.bf16 %v299_v0, %v299_v0  ;;  %v525_v11 = vunpack.c.l.bf16 %v614_v60  ;;  %v526_v12 = vunpack.c.h.bf16 %v614_v60 }
  0x20   :  { %424 = vst.msk [vmem:[%s1149_s3 + $0x44] sm:$0xf] %vm406_vm0, %v359_v62  ;;  %v364_v14 = vpack.c.bf16 %v300_v6, %v300_v6  ;;  %v365_v15 = vpack.c.bf16 %v301_v7, %v301_v7  ;;  %v529_v16 = vunpack.c.l.bf16 %v615_v2  ;;  %v530_v17 = vunpack.c.h.bf16 %v615_v2 }
  0x21   :  { %425 = vst.msk [vmem:[%s1149_s3 + $0x48] sm:$0xf] %vm406_vm0, %v360_v4  ;;  %v170_v18 = vmul.f32 %v662_v1, %v525_v11  ;;  %v171_v19 = vmul.f32 %v662_v1, %v526_v12  ;;  %v533_v20 = vunpack.c.l.bf16 %v616_v8  ;;  %v534_v21 = vunpack.c.h.bf16 %v616_v8 }
  0x22   :  { %426 = vst.msk [vmem:[%s1149_s3 + $0x4c] sm:$0xf] %vm406_vm0, %v361_v5  ;;  %v172_v22 = vmul.f32 %v662_v1, %v529_v16  ;;  %v173_v23 = vmul.f32 %v662_v1, %v530_v17  ;;  %v537_v24 = vunpack.c.l.bf16 %v617_v13  ;;  %v538_v25 = vunpack.c.h.bf16 %v617_v13 }
  0x23   :  { %427 = vst.msk [vmem:[%s1149_s3 + $0x50] sm:$0xf] %vm406_vm0, %v362_v9  ;;  %v238_v26 = vadd.f32 %v667_v3, %v170_v18  ;;  %v239_v27 = vadd.f32 %v667_v3, %v171_v19  ;;  %v174_v28 = vmul.f32 %v662_v1, %v533_v20  ;;  %v175_v29 = vmul.f32 %v662_v1, %v534_v21 }
  0x24   :  { %428 = vst.msk [vmem:[%s1149_s3 + $0x54] sm:$0xf] %vm406_vm0, %v363_v10  ;;  %v240_v30 = vadd.f32 %v667_v3, %v172_v22  ;;  %v241_v31 = vadd.f32 %v667_v3, %v173_v23  ;;  %v176_v32 = vmul.f32 %v662_v1, %v537_v24  ;;  %v177_v33 = vmul.f32 %v662_v1, %v538_v25  ;;  %v622_v24 = vld [vmem:[%s1146_s0 + $0xa0] sm:$0xff]  }
  0x25   :  { %429 = vst.msk [vmem:[%s1149_s3 + $0x58] sm:$0xf] %vm406_vm0, %v364_v14  ;;  %v302_v34 = vmax.f32 %v238_v26, 0.0  ;;  %v303_v35 = vmax.f32 %v239_v27, 0.0  ;;  %v242_v36 = vadd.f32 %v667_v3, %v174_v28  ;;  %v243_v37 = vadd.f32 %v667_v3, %v175_v29  ;;  %v623_v29 = vld [vmem:[%s1146_s0 + $0xa8] sm:$0xff]  }
  0x26   :  { %430 = vst.msk [vmem:[%s1149_s3 + $0x5c] sm:$0xf] %vm406_vm0, %v365_v15  ;;  %v304_v38 = vmax.f32 %v240_v30, 0.0  ;;  %v305_v39 = vmax.f32 %v241_v31, 0.0  ;;  %v244_v40 = vadd.f32 %v667_v3, %v176_v32  ;;  %v245_v41 = vadd.f32 %v667_v3, %v177_v33 }
  0x27   :  { %v366_v43 = vpack.c.bf16 %v302_v34, %v302_v34  ;;  %v367_v44 = vpack.c.bf16 %v303_v35, %v303_v35  ;;  %v306_v45 = vmax.f32 %v242_v36, 0.0  ;;  %v307_v46 = vmax.f32 %v243_v37, 0.0  ;;  %v624_v34 = vld [vmem:[%s1146_s0 + $0xb0] sm:$0xff]  }
  0x28   :  { %v368_v48 = vpack.c.bf16 %v304_v38, %v304_v38  ;;  %v369_v49 = vpack.c.bf16 %v305_v39, %v305_v39  ;;  %v308_v50 = vmax.f32 %v244_v40, 0.0  ;;  %v309_v51 = vmax.f32 %v245_v41, 0.0  ;;  %v625_v39 = vld [vmem:[%s1146_s0 + $0xb8] sm:$0xff]  }
  0x29   :  { %431 = vst.msk [vmem:[%s1149_s3 + $0x60] sm:$0xf] %vm406_vm0, %v366_v43  ;;  %v370_v53 = vpack.c.bf16 %v306_v45, %v306_v45  ;;  %v371_v54 = vpack.c.bf16 %v307_v46, %v307_v46  ;;  %v541_v55 = vunpack.c.l.bf16 %v618_v42  ;;  %v542_v56 = vunpack.c.h.bf16 %v618_v42 }
  0x2a   :  { %432 = vst.msk [vmem:[%s1149_s3 + $0x64] sm:$0xf] %vm406_vm0, %v367_v44  ;;  %v372_v58 = vpack.c.bf16 %v308_v50, %v308_v50  ;;  %v373_v59 = vpack.c.bf16 %v309_v51, %v309_v51  ;;  %v545_v60 = vunpack.c.l.bf16 %v619_v47  ;;  %v546_v61 = vunpack.c.h.bf16 %v619_v47 }
  0x2b   :  { %433 = vst.msk [vmem:[%s1149_s3 + $0x68] sm:$0xf] %vm406_vm0, %v368_v48  ;;  %v178_v62 = vmul.f32 %v662_v1, %v541_v55  ;;  %v179_v63 = vmul.f32 %v662_v1, %v542_v56  ;;  %v549_v0 = vunpack.c.l.bf16 %v620_v52  ;;  %v550_v2 = vunpack.c.h.bf16 %v620_v52 }
  0x2c   :  { %434 = vst.msk [vmem:[%s1149_s3 + $0x6c] sm:$0xf] %vm406_vm0, %v369_v49  ;;  %v180_v4 = vmul.f32 %v662_v1, %v545_v60  ;;  %v181_v5 = vmul.f32 %v662_v1, %v546_v61  ;;  %v553_v6 = vunpack.c.l.bf16 %v621_v57  ;;  %v554_v7 = vunpack.c.h.bf16 %v621_v57 }
  0x2d   :  { %435 = vst.msk [vmem:[%s1149_s3 + $0x70] sm:$0xf] %vm406_vm0, %v370_v53  ;;  %v246_v8 = vadd.f32 %v667_v3, %v178_v62  ;;  %v247_v9 = vadd.f32 %v667_v3, %v179_v63  ;;  %v182_v10 = vmul.f32 %v662_v1, %v549_v0  ;;  %v183_v11 = vmul.f32 %v662_v1, %v550_v2 }
  0x2e   :  { %436 = vst.msk [vmem:[%s1149_s3 + $0x74] sm:$0xf] %vm406_vm0, %v371_v54  ;;  %v248_v12 = vadd.f32 %v667_v3, %v180_v4  ;;  %v249_v13 = vadd.f32 %v667_v3, %v181_v5  ;;  %v184_v14 = vmul.f32 %v662_v1, %v553_v6  ;;  %v185_v15 = vmul.f32 %v662_v1, %v554_v7  ;;  %v626_v6 = vld [vmem:[%s1146_s0 + $0xc0] sm:$0xff]  }
  0x2f   :  { %437 = vst.msk [vmem:[%s1149_s3 + $0x78] sm:$0xf] %vm406_vm0, %v372_v58  ;;  %v310_v16 = vmax.f32 %v246_v8, 0.0  ;;  %v311_v17 = vmax.f32 %v247_v9, 0.0  ;;  %v250_v18 = vadd.f32 %v667_v3, %v182_v10  ;;  %v251_v19 = vadd.f32 %v667_v3, %v183_v11  ;;  %v627_v11 = vld [vmem:[%s1146_s0 + $0xc8] sm:$0xff]  }
  0x30   :  { %438 = vst.msk [vmem:[%s1149_s3 + $0x7c] sm:$0xf] %vm406_vm0, %v373_v59  ;;  %v312_v20 = vmax.f32 %v248_v12, 0.0  ;;  %v313_v21 = vmax.f32 %v249_v13, 0.0  ;;  %v252_v22 = vadd.f32 %v667_v3, %v184_v14  ;;  %v253_v23 = vadd.f32 %v667_v3, %v185_v15 }
  0x31   :  { %v374_v25 = vpack.c.bf16 %v310_v16, %v310_v16  ;;  %v375_v26 = vpack.c.bf16 %v311_v17, %v311_v17  ;;  %v314_v27 = vmax.f32 %v250_v18, 0.0  ;;  %v315_v28 = vmax.f32 %v251_v19, 0.0  ;;  %v628_v16 = vld [vmem:[%s1146_s0 + $0xd0] sm:$0xff]  }
  0x32   :  { %v376_v30 = vpack.c.bf16 %v312_v20, %v312_v20  ;;  %v377_v31 = vpack.c.bf16 %v313_v21, %v313_v21  ;;  %v316_v32 = vmax.f32 %v252_v22, 0.0  ;;  %v317_v33 = vmax.f32 %v253_v23, 0.0  ;;  %v629_v21 = vld [vmem:[%s1146_s0 + $0xd8] sm:$0xff]  }
  0x33   :  { %439 = vst.msk [vmem:[%s1149_s3 + $0x80] sm:$0xf] %vm406_vm0, %v374_v25  ;;  %v378_v35 = vpack.c.bf16 %v314_v27, %v314_v27  ;;  %v379_v36 = vpack.c.bf16 %v315_v28, %v315_v28  ;;  %v557_v37 = vunpack.c.l.bf16 %v622_v24  ;;  %v558_v38 = vunpack.c.h.bf16 %v622_v24 }
  0x34   :  { %440 = vst.msk [vmem:[%s1149_s3 + $0x84] sm:$0xf] %vm406_vm0, %v375_v26  ;;  %v380_v40 = vpack.c.bf16 %v316_v32, %v316_v32  ;;  %v381_v41 = vpack.c.bf16 %v317_v33, %v317_v33  ;;  %v561_v42 = vunpack.c.l.bf16 %v623_v29  ;;  %v562_v43 = vunpack.c.h.bf16 %v623_v29 }
  0x35   :  { %441 = vst.msk [vmem:[%s1149_s3 + $0x88] sm:$0xf] %vm406_vm0, %v376_v30  ;;  %v186_v44 = vmul.f32 %v662_v1, %v557_v37  ;;  %v187_v45 = vmul.f32 %v662_v1, %v558_v38  ;;  %v565_v46 = vunpack.c.l.bf16 %v624_v34  ;;  %v566_v47 = vunpack.c.h.bf16 %v624_v34 }
  0x36   :  { %442 = vst.msk [vmem:[%s1149_s3 + $0x8c] sm:$0xf] %vm406_vm0, %v377_v31  ;;  %v188_v48 = vmul.f32 %v662_v1, %v561_v42  ;;  %v189_v49 = vmul.f32 %v662_v1, %v562_v43  ;;  %v569_v50 = vunpack.c.l.bf16 %v625_v39  ;;  %v570_v51 = vunpack.c.h.bf16 %v625_v39 }
  0x37   :  { %443 = vst.msk [vmem:[%s1149_s3 + $0x90] sm:$0xf] %vm406_vm0, %v378_v35  ;;  %v254_v52 = vadd.f32 %v667_v3, %v186_v44  ;;  %v255_v53 = vadd.f32 %v667_v3, %v187_v45  ;;  %v190_v54 = vmul.f32 %v662_v1, %v565_v46  ;;  %v191_v55 = vmul.f32 %v662_v1, %v566_v47 }
  0x38   :  { %444 = vst.msk [vmem:[%s1149_s3 + $0x94] sm:$0xf] %vm406_vm0, %v379_v36  ;;  %v256_v56 = vadd.f32 %v667_v3, %v188_v48  ;;  %v257_v57 = vadd.f32 %v667_v3, %v189_v49  ;;  %v192_v58 = vmul.f32 %v662_v1, %v569_v50  ;;  %v193_v59 = vmul.f32 %v662_v1, %v570_v51  ;;  %v630_v50 = vld [vmem:[%s1146_s0 + $0xe0] sm:$0xff]  }
  0x39   :  { %445 = vst.msk [vmem:[%s1149_s3 + $0x98] sm:$0xf] %vm406_vm0, %v380_v40  ;;  %v318_v60 = vmax.f32 %v254_v52, 0.0  ;;  %v319_v61 = vmax.f32 %v255_v53, 0.0  ;;  %v258_v62 = vadd.f32 %v667_v3, %v190_v54  ;;  %v259_v63 = vadd.f32 %v667_v3, %v191_v55  ;;  %v631_v55 = vld [vmem:[%s1146_s0 + $0xe8] sm:$0xff]  }
  0x3a   :  { %446 = vst.msk [vmem:[%s1149_s3 + $0x9c] sm:$0xf] %vm406_vm0, %v381_v41  ;;  %v320_v0 = vmax.f32 %v256_v56, 0.0  ;;  %v321_v2 = vmax.f32 %v257_v57, 0.0  ;;  %v260_v4 = vadd.f32 %v667_v3, %v192_v58  ;;  %v261_v5 = vadd.f32 %v667_v3, %v193_v59 }
  0x3b   :  { %v382_v7 = vpack.c.bf16 %v318_v60, %v318_v60  ;;  %v383_v8 = vpack.c.bf16 %v319_v61, %v319_v61  ;;  %v322_v9 = vmax.f32 %v258_v62, 0.0  ;;  %v323_v10 = vmax.f32 %v259_v63, 0.0  ;;  %v632_v60 = vld [vmem:[%s1146_s0 + $0xf0] sm:$0xff]  }
  0x3c   :  { %v384_v12 = vpack.c.bf16 %v320_v0, %v320_v0  ;;  %v385_v13 = vpack.c.bf16 %v321_v2, %v321_v2  ;;  %v324_v14 = vmax.f32 %v260_v4, 0.0  ;;  %v325_v15 = vmax.f32 %v261_v5, 0.0  ;;  %v633_v2 = vld [vmem:[%s1146_s0 + $0xf8] sm:$0xff]  }
  0x3d   :  { %447 = vst.msk [vmem:[%s1149_s3 + $0xa0] sm:$0xf] %vm406_vm0, %v382_v7  ;;  %v386_v17 = vpack.c.bf16 %v322_v9, %v322_v9  ;;  %v387_v18 = vpack.c.bf16 %v323_v10, %v323_v10  ;;  %v573_v19 = vunpack.c.l.bf16 %v626_v6  ;;  %v574_v20 = vunpack.c.h.bf16 %v626_v6 }
  0x3e   :  { %448 = vst.msk [vmem:[%s1149_s3 + $0xa4] sm:$0xf] %vm406_vm0, %v383_v8  ;;  %v388_v22 = vpack.c.bf16 %v324_v14, %v324_v14  ;;  %v389_v23 = vpack.c.bf16 %v325_v15, %v325_v15  ;;  %v577_v24 = vunpack.c.l.bf16 %v627_v11  ;;  %v578_v25 = vunpack.c.h.bf16 %v627_v11 }
  0x3f   :  { %449 = vst.msk [vmem:[%s1149_s3 + $0xa8] sm:$0xf] %vm406_vm0, %v384_v12  ;;  %v194_v26 = vmul.f32 %v662_v1, %v573_v19  ;;  %v195_v27 = vmul.f32 %v662_v1, %v574_v20  ;;  %v581_v28 = vunpack.c.l.bf16 %v628_v16  ;;  %v582_v29 = vunpack.c.h.bf16 %v628_v16 }
  0x40   :  { %450 = vst.msk [vmem:[%s1149_s3 + $0xac] sm:$0xf] %vm406_vm0, %v385_v13  ;;  %v196_v30 = vmul.f32 %v662_v1, %v577_v24  ;;  %v197_v31 = vmul.f32 %v662_v1, %v578_v25  ;;  %v585_v32 = vunpack.c.l.bf16 %v629_v21  ;;  %v586_v33 = vunpack.c.h.bf16 %v629_v21 }
  0x41   :  { %451 = vst.msk [vmem:[%s1149_s3 + $0xb0] sm:$0xf] %vm406_vm0, %v386_v17  ;;  %v262_v34 = vadd.f32 %v667_v3, %v194_v26  ;;  %v263_v35 = vadd.f32 %v667_v3, %v195_v27  ;;  %v198_v36 = vmul.f32 %v662_v1, %v581_v28  ;;  %v199_v37 = vmul.f32 %v662_v1, %v582_v29 }
  0x42   :  { %452 = vst.msk [vmem:[%s1149_s3 + $0xb4] sm:$0xf] %vm406_vm0, %v387_v18  ;;  %v264_v38 = vadd.f32 %v667_v3, %v196_v30  ;;  %v265_v39 = vadd.f32 %v667_v3, %v197_v31  ;;  %v200_v40 = vmul.f32 %v662_v1, %v585_v32  ;;  %v201_v41 = vmul.f32 %v662_v1, %v586_v33 }
  0x43   :  { %453 = vst.msk [vmem:[%s1149_s3 + $0xb8] sm:$0xf] %vm406_vm0, %v388_v22  ;;  %v326_v42 = vmax.f32 %v262_v34, 0.0  ;;  %v327_v43 = vmax.f32 %v263_v35, 0.0  ;;  %v266_v44 = vadd.f32 %v667_v3, %v198_v36  ;;  %v267_v45 = vadd.f32 %v667_v3, %v199_v37 }
  0x44   :  { %454 = vst.msk [vmem:[%s1149_s3 + $0xbc] sm:$0xf] %vm406_vm0, %v389_v23  ;;  %v328_v46 = vmax.f32 %v264_v38, 0.0  ;;  %v329_v47 = vmax.f32 %v265_v39, 0.0  ;;  %v268_v48 = vadd.f32 %v667_v3, %v200_v40  ;;  %v269_v49 = vadd.f32 %v667_v3, %v201_v41 }
  0x45   :  { %v390_v51 = vpack.c.bf16 %v326_v42, %v326_v42  ;;  %v391_v52 = vpack.c.bf16 %v327_v43, %v327_v43  ;;  %v330_v53 = vmax.f32 %v266_v44, 0.0  ;;  %v331_v54 = vmax.f32 %v267_v45, 0.0 }
  0x46   :  { %v392_v56 = vpack.c.bf16 %v328_v46, %v328_v46  ;;  %v393_v57 = vpack.c.bf16 %v329_v47, %v329_v47  ;;  %v332_v58 = vmax.f32 %v268_v48, 0.0  ;;  %v333_v59 = vmax.f32 %v269_v49, 0.0 }
  0x47   :  { %455 = vst.msk [vmem:[%s1149_s3 + $0xc0] sm:$0xf] %vm406_vm0, %v390_v51  ;;  %v394_v61 = vpack.c.bf16 %v330_v53, %v330_v53  ;;  %v395_v62 = vpack.c.bf16 %v331_v54, %v331_v54  ;;  %v589_v63 = vunpack.c.l.bf16 %v630_v50  ;;  %v590_v0 = vunpack.c.h.bf16 %v630_v50 }
  0x48   :  { %456 = vst.msk [vmem:[%s1149_s3 + $0xc4] sm:$0xf] %vm406_vm0, %v391_v52  ;;  %v396_v4 = vpack.c.bf16 %v332_v58, %v332_v58  ;;  %v397_v5 = vpack.c.bf16 %v333_v59, %v333_v59  ;;  %v593_v6 = vunpack.c.l.bf16 %v631_v55  ;;  %v594_v7 = vunpack.c.h.bf16 %v631_v55 }
  0x49   :  { %457 = vst.msk [vmem:[%s1149_s3 + $0xc8] sm:$0xf] %vm406_vm0, %v392_v56  ;;  %v202_v8 = vmul.f32 %v662_v1, %v589_v63  ;;  %v203_v9 = vmul.f32 %v662_v1, %v590_v0  ;;  %v597_v10 = vunpack.c.l.bf16 %v632_v60  ;;  %v598_v11 = vunpack.c.h.bf16 %v632_v60 }
  0x4a   :  { %458 = vst.msk [vmem:[%s1149_s3 + $0xcc] sm:$0xf] %vm406_vm0, %v393_v57  ;;  %v204_v12 = vmul.f32 %v662_v1, %v593_v6  ;;  %v205_v13 = vmul.f32 %v662_v1, %v594_v7  ;;  %v601_v14 = vunpack.c.l.bf16 %v633_v2  ;;  %v602_v15 = vunpack.c.h.bf16 %v633_v2 }
  0x4b   :  { %459 = vst.msk [vmem:[%s1149_s3 + $0xd0] sm:$0xf] %vm406_vm0, %v394_v61  ;;  %v270_v16 = vadd.f32 %v667_v3, %v202_v8  ;;  %v271_v17 = vadd.f32 %v667_v3, %v203_v9  ;;  %v206_v18 = vmul.f32 %v662_v1, %v597_v10  ;;  %v207_v19 = vmul.f32 %v662_v1, %v598_v11 }
  0x4c   :  { %460 = vst.msk [vmem:[%s1149_s3 + $0xd4] sm:$0xf] %vm406_vm0, %v395_v62  ;;  %v272_v20 = vadd.f32 %v667_v3, %v204_v12  ;;  %v273_v21 = vadd.f32 %v667_v3, %v205_v13  ;;  %v208_v22 = vmul.f32 %v662_v1, %v601_v14  ;;  %v209_v23 = vmul.f32 %v662_v1, %v602_v15 }
  0x4d   :  { %461 = vst.msk [vmem:[%s1149_s3 + $0xd8] sm:$0xf] %vm406_vm0, %v396_v4  ;;  %v334_v24 = vmax.f32 %v270_v16, 0.0  ;;  %v335_v25 = vmax.f32 %v271_v17, 0.0  ;;  %v274_v26 = vadd.f32 %v667_v3, %v206_v18  ;;  %v275_v27 = vadd.f32 %v667_v3, %v207_v19 }
  0x4e   :  { %462 = vst.msk [vmem:[%s1149_s3 + $0xdc] sm:$0xf] %vm406_vm0, %v397_v5  ;;  %v336_v28 = vmax.f32 %v272_v20, 0.0  ;;  %v337_v29 = vmax.f32 %v273_v21, 0.0  ;;  %v276_v1 = vadd.f32 %v667_v3, %v208_v22  ;;  %v277_v30 = vadd.f32 %v667_v3, %v209_v23 }
  0x4f   :  { %v398_v31 = vpack.c.bf16 %v334_v24, %v334_v24  ;;  %v399_v32 = vpack.c.bf16 %v335_v25, %v335_v25  ;;  %v338_v33 = vmax.f32 %v274_v26, 0.0  ;;  %v339_v34 = vmax.f32 %v275_v27, 0.0 }
  0x50   :  { %v400_v35 = vpack.c.bf16 %v336_v28, %v336_v28  ;;  %v401_v36 = vpack.c.bf16 %v337_v29, %v337_v29  ;;  %v340_v37 = vmax.f32 %v276_v1, 0.0  ;;  %v341_v38 = vmax.f32 %v277_v30, 0.0 }
  0x51   :  { %463 = vst.msk [vmem:[%s1149_s3 + $0xe0] sm:$0xf] %vm406_vm0, %v398_v31  ;;  %v402_v39 = vpack.c.bf16 %v338_v33, %v338_v33  ;;  %v403_v3 = vpack.c.bf16 %v339_v34, %v339_v34 }
  0x52   :  { %464 = vst.msk [vmem:[%s1149_s3 + $0xe4] sm:$0xf] %vm406_vm0, %v399_v32  ;;  %v404_v40 = vpack.c.bf16 %v340_v37, %v340_v37  ;;  %v405_v41 = vpack.c.bf16 %v341_v38, %v341_v38 }
  0x53   :  { %465 = vst.msk [vmem:[%s1149_s3 + $0xe8] sm:$0xf] %vm406_vm0, %v400_v35 }
  0x54   :  { %466 = vst.msk [vmem:[%s1149_s3 + $0xec] sm:$0xf] %vm406_vm0, %v401_v36 }
  0x55   :  { %467 = vst.msk [vmem:[%s1149_s3 + $0xf0] sm:$0xf] %vm406_vm0, %v402_v39 }
  0x56   :  { %468 = vst.msk [vmem:[%s1149_s3 + $0xf4] sm:$0xf] %vm406_vm0, %v403_v3 }
  0x57   :  { %469 = vst.msk [vmem:[%s1149_s3 + $0xf8] sm:$0xf] %vm406_vm0, %v404_v40 }
  0x58   :  { %470 = vst.msk [vmem:[%s1149_s3 + $0xfc] sm:$0xf] %vm406_vm0, %v405_v41 }

// kernel: down_unet_2d_block.3
= control target key start
LH: loop header
LB: loop body
LE: loop exit
PB: predicated region body
PF: predicated region fallthrough
CT: control target
= control target key end

     0   :  { %s3600_s12 = smov 0   ;;  %s3602_s13 = smov 0   ;;  %s4582_s0 = inlined_call_operand.vmem [shape: bf16[2,2,194,4], index: 0, kind: input, shape index: {}]   ;;  %s4583_s1 = inlined_call_operand.vmem [shape: bf16[9,4,8], index: 1, kind: input, shape index: {}]   ;;  %s4584_s2 = inlined_call_operand.vmem [shape: bf16[2,2,162,8], index: 2, kind: output, shape index: {0}]   ;;  %s4585_s3 = inlined_call_operand.vmem [shape: f32[2,2,2,8], index: 3, kind: output, shape index: {1}]  }
   0x1   :  { %s3604_s14 = smov 0   ;;  %s3606_s15 = smov 0  }
   0x2   :  { %s3608_s16 = smov 0  }
   0x3 LB: > { %s23_s17 = sadd.s32 1, %s3569_s14  ;;  %s26_s18 = sadd.s32 1, %s3573_s15  ;;  %s3577_s16 = sphi %s3608_s16, %s14_s16   ;;  %s3573_s15 = sphi %s3606_s15, %s4589_s15   ;;  %s3569_s14 = sphi %s3604_s14, %s4588_s14   ;;  %s3565_s13 = sphi %s3602_s13, %s4587_s13   ;;  %s3561_s12 = sphi %s3600_s12, %s4586_s12  }
   0x4   : > { %p24_p0 = scmp.ge.s32.totalorder %s23_s17, 2  ;;  %p2936_p1 = scmp.ge.s32.totalorder %s3577_s16, 1 }
   0x5   : > { %p162_p2 = scmp.lt.s32.totalorder %s3577_s16, 5 }
   0x6   : > { %s4591_s17 = smov (%p24_p0, %s23_s17), 0  ;;  %s4593_s18 = smov (!%p24_p0, %s26_s18), %s3573_s15 }
   0x7   : > { %p163_p3 = pnand %p2936_p1, %p162_p2  ;;  %p28_p4 = scmp.ge.s32.totalorder %s4593_s18, 2 }
   0x8   : > { %p202_p5 = scmp.lt.s32.totalorder (!%p163_p3), %s3565_s13, 1  ;;  %p204_p6 = scmp.lt.s32.totalorder (!%p163_p3), %s3561_s12, 1 }
   0x9   : > { %s4595_s18 = smov (%p28_p4, %s4593_s18), 0  ;;  %166 = sbr.rel (%p163_p3) target bundleno = 558 (0x22e), region = 28 }
   0xe   : > { %v249_v0 = vld [vmem:[%s4583_s1] sm:$0x3]  ;;  %vm331_vm0 = vcmask 1041408   ;;  %v2991_v2 = vld [vmem:[%s4583_s1 + $0x2] sm:$0x3]  ;;  %s4597_s13 = smov (!%p202_p5, %s3565_s13), 1 }
   0xf   : > { %v333_v1 = vsel %vm331_vm0, %v249_v0, 0  ;;  %v3093_v3 = vld [vmem:[%s4583_s1 + $0x6] sm:$0x3]  ;;  %v607_v4 = vsel %vm331_vm0, %v2991_v2, 0  ;;  %v3144_v6 = vld [vmem:[%s4583_s1 + $0x8] sm:$0x3] }
  0x10   : > { %3491 = vmatpush.bf16.msra.mxu1 %v333_v1  ;;  %3493 = vmatpush.bf16.msra.mxu3 %v333_v1  ;;  %v1081_v5 = vsel %vm331_vm0, %v3093_v3, 0  ;;  %s4599_s12 = smov (!%p204_p6, %s3561_s12), 1  ;;  %v1393_v7 = vsel %vm331_vm0, %v3144_v6, 0  ;;  %s3495_s27 = smul.u32 50, %s4597_s13  ;;  %vm300_vm1 = vcmask 31744   ;;  %vm804_vm2 = vcmask 1046528  }
  0x11   : > { %342 = vmatpush.bf16.msra.mxu0 %v333_v1  ;;  %3492 = vmatpush.bf16.msra.mxu2 %v333_v1  ;;  %s3494_s28 = smul.u32 25, %s4599_s12  ;;  %v3042_v12 = vld [vmem:[%s4583_s1 + $0x4] sm:$0x3]  ;;  %v3195_v24 = vld [vmem:[%s4583_s1 + $0xa] sm:$0x3]  ;;  %vm394_vm4 = vcmask 64512  }
  0x12   : > { %v857_v13 = vsel %vm331_vm0, %v3042_v12, 0  ;;  %v3246_v25 = vld [vmem:[%s4583_s1 + $0xc] sm:$0x3]  ;;  %v1642_v26 = vsel %vm331_vm0, %v3195_v24, 0  ;;  %v3297_v28 = vld [vmem:[%s4583_s1 + $0xe] sm:$0x3] }
  0x13   : > { %s208_s29 = sadd.s32 %s3495_s27, %s3494_s28  ;;  %v1866_v27 = vsel %vm331_vm0, %v3246_v25, 0  ;;  %v2178_v29 = vsel %vm331_vm0, %v3297_v28, 0  ;;  %v3348_v38 = vld [vmem:[%s4583_s1 + $0x10] sm:$0x3]  ;;  %vm491_vm3 = vsmask.f32 7424 }
  0x14   : > { %616 = vmatpush.bf16.msrb.mxu1 %v607_v4  ;;  %1090 = vmatpush.bf16.msrb.mxu3 %v1081_v5  ;;  %s2937_s30 = sshll.u32 %s208_s29, 2  ;;  %v2427_v41 = vsel %vm331_vm0, %v3348_v38, 0  ;;  %s3496_s24 = smul.u32 21, %s4599_s12  ;;  %vm2788_vm5 = vcmask 57344   ;;  %vm2767_vm6 = vcmask 60416   ;;  %vm2763_vm8 = vcmask 1040384  }
  0x15   : > { %1402 = vmatpush.bf16.msrb.mxu0 %v1393_v7  ;;  %s3655_s6 = scalar_lea.vmem %s4582_s0, %s2937_s30  ;;  %866 = vmatpush.bf16.msrb.mxu2 %v857_v13  ;;  %s3497_s25 = smul.u32 42, %s4597_s13  ;;  %vm2765_vm9 = vcmask 58368  }
  0x16   : > { %v3404_v8 = vld [vmem:[%s3655_s6 + $0x18] sm:$0xff]  ;;  %v3401_v10 = vld [vmem:[%s3655_s6] sm:$0xff]  ;;  %v3407_v11 = vld [vmem:[%s3655_s6 + $0x30] sm:$0xff]  ;;  %s2939_s4 = sshll.u32 %s4597_s13, 1 }
  0x17   : > { %v3408_v9 = vld [vmem:[%s3655_s6 + $0x38] sm:$0xff]  ;;  %2984 = vmatmul.msk.bf16.vlgmr.msra.gmra.mxu1 %vm300_vm1, %v3404_v8  ;;  %2981 = vmatmul.msk.bf16.vlgmr.msra.gmra.mxu0 %vm300_vm1, %v3401_v10  ;;  %v3045_v14 = vld [vmem:[%s3655_s6] sm:$0xe]  ;;  %v3421_v15 = vld [vmem:[%s3655_s6] sm:$0xf0]  ;;  %s217_s26 = sadd.s32 %s3497_s25, %s3496_s24  ;;  %s225_s5 = sadd.s32 %s2939_s4, %s4599_s12 }
  0x18   : > { %2988 = vmatmul.msk.bf16.vlgmr.msra.gmra.mxu3 %vm300_vm1, %v3408_v9  ;;  %2987 = vmatmul.msk.bf16.vlgmr.msra.gmra.mxu2 %vm300_vm1, %v3407_v11  ;;  %v3422_v16 = vld [vmem:[%s3655_s6 + $0x8] sm:$0xff]  ;;  %v3046_v17 = vor.u32 %v3421_v15, %v3045_v14  ;;  %v3405_v20 = vld [vmem:[%s3655_s6 + $0x20] sm:$0xff]  ;;  %v3423_v30 = vld [vmem:[%s3655_s6 + $0x10] sm:$0xff]  ;;  %s2938_s27 = sshll.u32 %s217_s26, 2 }
  0x19   : > { %v806_v19 = vrot.slane %v3422_v16, 1  ;;  %v3409_v21 = vld [vmem:[%s3655_s6 + $0x40] sm:$0xff]  ;;  %v3402_v22 = vld [vmem:[%s3655_s6 + $0x8] sm:$0xff]  ;;  %1651 = vmatpush.bf16.msra.mxu1 %v1642_v26  ;;  %1875 = vmatpush.bf16.msra.mxu2 %v1866_v27  ;;  %v808_v31 = vrot.slane %v3423_v30, 1  ;;  %v3403_v35 = vld [vmem:[%s3655_s6 + $0x10] sm:$0xff]  ;;  %s4309_s30 = scalar_lea.vmem %s4584_s2, %s2938_s27 }
  0x1a   : > { %v805_v18 = vrot.slane %v3046_v17, 1  ;;  %2187 = vmatpush.bf16.msra.mxu3 %v2178_v29  ;;  %v3406_v32 = vld [vmem:[%s3655_s6 + $0x28] sm:$0xff]  ;;  %v3411_v34 = vld [vmem:[%s3655_s6] sm:$0xff]  ;;  %v3442_v42 = vld [vmem:[%s3655_s6 + $0x10] sm:$0xff]  ;;  %2436 = vmatpush.bf16.msra.mxu0 %v2427_v41 }
  0x1b   : > { %v3410_v33 = vld [vmem:[%s3655_s6 + $0x48] sm:$0xff]  ;;  %v809_v36 = vsel %vm804_vm2, %v806_v19, %v808_v31  ;;  %v495_v40 = vshll.u32 %v3411_v34, 16  ;;  %v493_v44 = vshrl.u32 %v3411_v34, 16  ;;  %v1286_v49 = vshll.u32 %v3442_v42, 16  ;;  %v3424_v50 = vld [vmem:[%s3655_s6 + $0x18] sm:$0xff]  ;;  %v3413_v60 = vld [vmem:[%s3655_s6 + $0x10] sm:$0xff] }
  0x1c   : > { %v807_v23 = vsel %vm804_vm2, %v805_v18, %v806_v19  ;;  %v3441_v37 = vld [vmem:[%s3655_s6 + $0x8] sm:$0xff]  ;;  %v810_v55 = vrot.slane %v3424_v50, 1  ;;  %v3443_v61 = vld [vmem:[%s3655_s6 + $0x18] sm:$0xff]  ;;  %v508_v63 = vshll.u32 %v3413_v60, 16  ;;  %v1290_v0 = vshrl.u32 %v3442_v42, 16  ;;  %v3425_v2 = vld [vmem:[%s3655_s6 + $0x20] sm:$0xff] }
  0x1d   : > { %v3412_v39 = vld [vmem:[%s3655_s6 + $0x8] sm:$0xff]  ;;  %v1281_v43 = vshll.u32 %v3441_v37, 16  ;;  %v497_v45 = vrot.slane %v495_v40, 1  ;;  %v1279_v47 = vshrl.u32 %v3441_v37, 16  ;;  %v1288_v54 = vrot.slane %v1286_v49, 1  ;;  %v3432_v8 = vld [vmem:[%s3655_s6 + $0x10] sm:$0xff] }
  0x1e   : > { %v500_v46 = vshll.u32 %v3412_v39, 16  ;;  %v3431_v56 = vld [vmem:[%s3655_s6 + $0x8] sm:$0xff]  ;;  %v811_v59 = vsel %vm804_vm2, %v808_v31, %v810_v55  ;;  %v504_v62 = vshrl.u32 %v3412_v39, 16  ;;  %v1294_v1 = vshll.u32 %v3443_v61, 16  ;;  %v3414_v12 = vld [vmem:[%s3655_s6 + $0x18] sm:$0xff]  ;;  %v3444_v13 = vld [vmem:[%s3655_s6 + $0x20] sm:$0xff] }
  0x1f   : > { %v1283_v48 = vrot.slane %v1281_v43, 1  ;;  %v498_v51 = vor.u32 %v497_v45, %v493_v44  ;;  %v510_v4 = vrot.slane %v508_v63, 1  ;;  %v1292_v5 = vor.u32 %v1290_v0, %v1288_v54  ;;  %v3426_v18 = vld [vmem:[%s3655_s6 + $0x28] sm:$0xff]  ;;  %v3433_v24 = vld [vmem:[%s3655_s6 + $0x18] sm:$0xff]  ;;  %v3415_v28 = vld [vmem:[%s3655_s6 + $0x20] sm:$0xff] }
  0x20   : > { %v502_v52 = vrot.slane %v500_v46, 1  ;;  %v1296_v6 = vrot.slane %v1294_v1, 1  ;;  %v812_v7 = vrot.slane %v3425_v2, 1  ;;  %v512_v14 = vshrl.u32 %v3413_v60, 16  ;;  %v3445_v29 = vld [vmem:[%s3655_s6 + $0x28] sm:$0xff]  ;;  %v3427_v34 = vld [vmem:[%s3655_s6 + $0x30] sm:$0xff] }
  0x21   : > { %v1284_v53 = vor.u32 %v1283_v48, %v1279_v47  ;;  %v516_v15 = vshll.u32 %v3414_v12, 16  ;;  %v1298_v16 = vshrl.u32 %v3443_v61, 16  ;;  %v1302_v17 = vshll.u32 %v3444_v13, 16  ;;  %v3434_v40 = vld [vmem:[%s3655_s6 + $0x20] sm:$0xff]  ;;  %v3416_v44 = vld [vmem:[%s3655_s6 + $0x28] sm:$0xff]  ;;  %v3446_v45 = vld [vmem:[%s3655_s6 + $0x30] sm:$0xff] }
  0x22   : > { %v503_v57 = vsel %vm491_vm3, %v498_v51, %v502_v52  ;;  %v506_v3 = vor.u32 %v504_v62, %v502_v52  ;;  %v1297_v10 = vsel %vm491_vm3, %v1292_v5, %v1296_v6  ;;  %v813_v11 = vsel %vm804_vm2, %v810_v55, %v812_v7  ;;  %v3428_v50 = vld [vmem:[%s3655_s6 + $0x38] sm:$0xff]  ;;  %v3417_v60 = vld [vmem:[%s3655_s6 + $0x30] sm:$0xff]  ;;  %v3429_v2 = vld [vmem:[%s3655_s6 + $0x40] sm:$0xff] }
  0x23   : > { %v1289_v58 = vsel %vm491_vm3, %v1284_v53, %v1288_v54  ;;  %v514_v19 = vor.u32 %v512_v14, %v510_v4  ;;  %v520_v30 = vshrl.u32 %v3414_v12, 16  ;;  %v524_v31 = vshll.u32 %v3415_v28, 16  ;;  %v3447_v61 = vld [vmem:[%s3655_s6 + $0x38] sm:$0xff] }
  0x24   : > { %v511_v9 = vsel %vm491_vm3, %v506_v3, %v510_v4  ;;  %v816_v39 = vrot.slane %v3427_v34, 1  ;;  %v528_v46 = vshrl.u32 %v3415_v28, 16  ;;  %v532_v47 = vshll.u32 %v3416_v44, 16  ;;  %v3418_v14 = vld [vmem:[%s3655_s6 + $0x38] sm:$0xff] }
  0x25   : > { %v1314_v48 = vshrl.u32 %v3445_v29, 16  ;;  %v1318_v49 = vshll.u32 %v3446_v45, 16  ;;  %v818_v55 = vrot.slane %v3428_v50, 1  ;;  %v536_v62 = vshrl.u32 %v3416_v44, 16 }
  0x26   : > { %v534_v52 = vrot.slane %v532_v47, 1  ;;  %v540_v63 = vshll.u32 %v3417_v60, 16  ;;  %v1322_v0 = vshrl.u32 %v3446_v45, 16  ;;  %v1326_v1 = vshll.u32 %v3447_v61, 16 }
  0x27   : > { %2985 = vmatmul.msk.bf16.gmra.mxu1 %vm300_vm1, %v3405_v20  ;;  %2982 = vmatmul.msk.bf16.gmra.mxu0 %vm300_vm1, %v3402_v22  ;;  %v518_v20 = vrot.slane %v516_v15, 1  ;;  %v1304_v22 = vrot.slane %v1302_v17, 1  ;;  %v1320_v54 = vrot.slane %v1318_v49, 1  ;;  %v3448_v15 = vld [vmem:[%s3655_s6 + $0x40] sm:$0xff]  ;;  %v552_v44 = vshrl.u32 %v3418_v14, 16 }
  0x28   : > { %2989 = vmatmul.msk.bf16.gmra.mxu3 %vm300_vm1, %v3409_v21  ;;  %3083 = vmatmul.msk.bf16.vlgmr.msrb.gmra.mxu2 %vm300_vm1, %v807_v23  ;;  %v1300_v21 = vor.u32 %v1298_v16, %v1296_v6  ;;  %v814_v23 = vrot.slane %v3426_v18, 1  ;;  %v538_v3 = vor.u32 %v536_v62, %v534_v52  ;;  %v542_v4 = vrot.slane %v540_v63, 1 }
  0x29   : > { %v519_v25 = vsel %vm491_vm3, %v514_v19, %v518_v20  ;;  %v1324_v5 = vor.u32 %v1322_v0, %v1320_v54  ;;  %v1328_v6 = vrot.slane %v1326_v1, 1  ;;  %v544_v19 = vshrl.u32 %v3417_v60, 16  ;;  %v3420_v0 = vld [vmem:[%s3655_s6 + $0x48] sm:$0xff]  ;;  %v3450_v1 = vld [vmem:[%s3655_s6 + $0x50] sm:$0xff] }
  0x2a   : > { %v1305_v26 = vsel %vm491_vm3, %v1300_v21, %v1304_v22  ;;  %v815_v27 = vsel %vm804_vm2, %v812_v7, %v814_v23  ;;  %v817_v43 = vsel %vm804_vm2, %v814_v23, %v816_v39  ;;  %v820_v7 = vrot.slane %v3429_v2, 1 }
  0x2b   : > { %v1329_v12 = vsel %vm491_vm3, %v1324_v5, %v1328_v6  ;;  %v1334_v23 = vshll.u32 %v3448_v15, 16 }
  0x2d   : > { %v1336_v28 = vrot.slane %v1334_v23, 1  ;;  %v3461_v23 = vld [vmem:[%s3655_s6 + $0x10] sm:$0xff] }
  0x37   : > { %2986 = vmatmul.msk.bf16.gmra.mxu1 %vm300_vm1, %v3406_v32  ;;  %2983 = vmatmul.msk.bf16.gmra.mxu0 %vm300_vm1, %v3403_v35  ;;  %v1306_v32 = vshrl.u32 %v3444_v13, 16  ;;  %v522_v35 = vor.u32 %v520_v30, %v518_v20  ;;  %v821_v13 = vsel %vm804_vm2, %v818_v55, %v820_v7  ;;  %v548_v20 = vshll.u32 %v3418_v14, 16 }
  0x38   : > { %2990 = vmatmul.msk.bf16.gmra.mxu3 %vm300_vm1, %v3410_v33  ;;  %3084 = vmatmul.msk.bf16.gmra.mxu2 %vm300_vm1, %v809_v36  ;;  %v1310_v33 = vshll.u32 %v3445_v29, 16  ;;  %v526_v36 = vrot.slane %v524_v31, 1  ;;  %v3437_v31 = vld [vmem:[%s3655_s6 + $0x38] sm:$0xff] }
  0x39   : > { %v1308_v37 = vor.u32 %v1306_v32, %v1304_v22  ;;  %v1330_v22 = vshrl.u32 %v3447_v61, 16 }
  0x3a   : > { %v1312_v38 = vrot.slane %v1310_v33, 1  ;;  %v527_v41 = vsel %vm491_vm3, %v522_v35, %v526_v36  ;;  %v530_v51 = vor.u32 %v528_v46, %v526_v36 }
  0x3c   : > { %v1313_v42 = vsel %vm491_vm3, %v1308_v37, %v1312_v38  ;;  %v1316_v53 = vor.u32 %v1314_v48, %v1312_v38  ;;  %v3419_v38 = vld [vmem:[%s3655_s6 + $0x40] sm:$0xff]  ;;  %v1338_v48 = vshrl.u32 %v3448_v15, 16 }
  0x3d   : > { %v556_v45 = vshll.u32 %v3419_v38, 16  ;;  %v560_v5 = vshrl.u32 %v3419_v38, 16  ;;  %v1354_v38 = vshrl.u32 %v3450_v1, 16 }
  0x47   : > { %3032 = vmatmul.msk.bf16.vlgmr.msrb.gmra.mxu1 %vm300_vm1, %v503_v57  ;;  %3185 = vmatmul.msk.bf16.vlgmr.msrb.gmra.mxu0 %vm300_vm1, %v1289_v58  ;;  %v535_v57 = vsel %vm491_vm3, %v530_v51, %v534_v52  ;;  %v1321_v58 = vsel %vm491_vm3, %v1316_v53, %v1320_v54  ;;  %v558_v52 = vrot.slane %v556_v45, 1  ;;  %v1340_v53 = vor.u32 %v1338_v48, %v1336_v28  ;;  %v3440_v48 = vld [vmem:[%s3655_s6 + $0x50] sm:$0xff] }
  0x48   : > { %3134 = vmatmul.msk.bf16.vlgmr.msrb.gmra.mxu3 %vm300_vm1, %v3431_v56  ;;  %3085 = vmatmul.msk.bf16.gmra.mxu2 %vm300_vm1, %v811_v59  ;;  %v3435_v56 = vld [vmem:[%s3655_s6 + $0x28] sm:$0xff]  ;;  %v819_v59 = vsel %vm804_vm2, %v816_v39, %v818_v55 }
  0x49   : > { %v3449_v39 = vld [vmem:[%s3655_s6 + $0x48] sm:$0xff] }
  0x4a   : > { %v1342_v49 = vshll.u32 %v3449_v39, 16 }
  0x4c   : > { %v1344_v54 = vrot.slane %v1342_v49, 1 }
  0x4e   : > { %v1345_v62 = vsel %vm491_vm3, %v1340_v53, %v1344_v54  ;;  %v3471_v53 = vld [vmem:[%s3655_s6 + $0x10] sm:$0xff] }
  0x57   : > { %3033 = vmatmul.msk.bf16.gmra.mxu1 %vm300_vm1, %v511_v9  ;;  %3186 = vmatmul.msk.bf16.gmra.mxu0 %vm300_vm1, %v1297_v10  ;;  %v543_v10 = vsel %vm491_vm3, %v538_v3, %v542_v4 }
  0x58   : > { %3135 = vmatmul.msk.bf16.gmra.mxu3 %vm300_vm1, %v3432_v8  ;;  %3086 = vmatmul.msk.bf16.gmra.mxu2 %vm300_vm1, %v813_v11  ;;  %v3436_v8 = vld [vmem:[%s3655_s6 + $0x30] sm:$0xff] }
  0x67   : > { %3034 = vmatmul.msk.bf16.gmra.mxu1 %vm300_vm1, %v519_v25  ;;  %3187 = vmatmul.msk.bf16.gmra.mxu0 %vm300_vm1, %v1305_v26  ;;  %v546_v25 = vor.u32 %v544_v19, %v542_v4  ;;  %v550_v26 = vrot.slane %v548_v20, 1 }
  0x68   : > { %3136 = vmatmul.msk.bf16.gmra.mxu3 %vm300_vm1, %v3433_v24  ;;  %3087 = vmatmul.msk.bf16.gmra.mxu2 %vm300_vm1, %v815_v27  ;;  %v3430_v24 = vld [vmem:[%s3655_s6 + $0x48] sm:$0xff]  ;;  %v1332_v27 = vor.u32 %v1330_v22, %v1328_v6  ;;  %v564_v6 = vshll.u32 %v3420_v0, 16 }
  0x69   : > { %v822_v29 = vrot.slane %v3430_v24, 1  ;;  %v551_v34 = vsel %vm491_vm3, %v546_v25, %v550_v26  ;;  %v554_v51 = vor.u32 %v552_v44, %v550_v26 }
  0x6a   : > { %v1337_v36 = vsel %vm491_vm3, %v1332_v27, %v1336_v28 }
  0x6b   : > { %v823_v37 = vsel %vm804_vm2, %v820_v7, %v822_v29  ;;  %v559_v60 = vsel %vm491_vm3, %v554_v51, %v558_v52 }
  0x77   : > { %3035 = vmatmul.msk.bf16.gmra.mxu1 %vm300_vm1, %v527_v41  ;;  %3188 = vmatmul.msk.bf16.gmra.mxu0 %vm300_vm1, %v1313_v42  ;;  %v748_v42 = vld [vmem:[%s3655_s6 + $0x50] sm:$0x1] }
  0x78   : > { %3137 = vmatmul.msk.bf16.gmra.mxu3 %vm300_vm1, %v3434_v40  ;;  %3088 = vmatmul.msk.bf16.gmra.mxu2 %vm300_vm1, %v817_v43  ;;  %v792_v46 = vunpack.c.l.b16 %v748_v42 }
  0x7a   : > { %v803_v50 = vpack.c.b16 %v792_v46, %v792_v46 }
  0x7c   : > { %v824_v55 = vrot.slane %v803_v50, 1 }
  0x7e   : > { %v825_v63 = vsel %vm804_vm2, %v822_v29, %v824_v55 }
  0x87   : > { %3036 = vmatmul.msk.bf16.gmra.mxu1 %vm300_vm1, %v535_v57  ;;  %3189 = vmatmul.msk.bf16.gmra.mxu0 %vm300_vm1, %v1321_v58  ;;  %v3438_v57 = vld [vmem:[%s3655_s6 + $0x40] sm:$0xff] }
  0x88   : > { %3138 = vmatmul.msk.bf16.gmra.mxu3 %vm300_vm1, %v3435_v56  ;;  %3089 = vmatmul.msk.bf16.gmra.mxu2 %vm300_vm1, %v819_v59 }
  0x94   : > { %v359_v9 = vpop.f32.mrf.mxu1  ;;  %v344_v11 = vpop.f32.mrf.mxu0 }
  0x95   : > { %401 = vst.msk [vmem:[#allocation2 + $0x30] sm:$0xff] %vm394_vm4, %v359_v9  ;;  %v1350_v9 = vshll.u32 %v3450_v1, 16 }
  0x96   : > { %395 = vst.msk [vmem:[#allocation2] sm:$0xff] %vm394_vm4, %v344_v11  ;;  %v566_v11 = vrot.slane %v564_v6, 1 }
  0x97   : > { %3037 = vmatmul.msk.bf16.gmra.mxu1 %vm300_vm1, %v543_v10  ;;  %3190 = vmatmul.msk.bf16.gmra.mxu0 %vm300_vm1, %v1329_v12  ;;  %v562_v10 = vor.u32 %v560_v5, %v558_v52  ;;  %v435_v12 = vld [vmem:[%s3655_s6 + $0x50] sm:$0x1]  ;;  %v1352_v14 = vrot.slane %v1350_v9, 1 }
  0x98   : > { %3139 = vmatmul.msk.bf16.gmra.mxu3 %vm300_vm1, %v3436_v8  ;;  %3090 = vmatmul.msk.bf16.gmra.mxu2 %vm300_vm1, %v821_v13  ;;  %v1346_v8 = vshrl.u32 %v3449_v39, 16  ;;  %v479_v22 = vunpack.c.l.b16 %v435_v12 }
  0x99   : > { %v1356_v45 = vor.u32 %v1354_v38, %v1352_v14  ;;  %v3463_v38 = vld [vmem:[%s3655_s6 + $0x20] sm:$0xff] }
  0x9a   : > { %v1348_v13 = vor.u32 %v1346_v8, %v1344_v54  ;;  %v490_v28 = vpack.c.b16 %v479_v22, %v479_v22  ;;  %v3462_v54 = vld [vmem:[%s3655_s6 + $0x18] sm:$0xff]  ;;  %v3872_v8 = vld [vmem:[%s3655_s6 + $0x10] sm:$0xff] }
  0x9b   : > { %v379_v16 = vpop.f32.mrf.mxu3  ;;  %v374_v17 = vpop.f32.mrf.mxu2  ;;  %v1591_v22 = vrot.slane %v3872_v8, 1 }
  0x9c   : > { %409 = vst.msk [vmem:[#allocation2 + $0x70] sm:$0xff] %vm394_vm4, %v379_v16  ;;  %v361_v18 = vpop.f32.mrf.mxu1  ;;  %v346_v21 = vpop.f32.mrf.mxu0  ;;  %v3439_v16 = vld [vmem:[%s3655_s6 + $0x48] sm:$0xff]  ;;  %v1353_v26 = vsel %vm491_vm3, %v1348_v13, %v1352_v14 }
  0x9d   : > { %407 = vst.msk [vmem:[#allocation2 + $0x60] sm:$0xff] %vm394_vm4, %v374_v17  ;;  %v668_v20 = vld [vmem:[#allocation2] sm:$0xff] }
  0x9e   : > { %402 = vst.msk [vmem:[#allocation2 + $0x38] sm:$0xff] %vm394_vm4, %v361_v18  ;;  %v1222_v18 = vld [vmem:[%s3655_s6 + $0x58] sm:$0x1] }
  0x9f   : > { %396 = vst.msk [vmem:[#allocation2 + $0x8] sm:$0xff] %vm394_vm4, %v346_v21  ;;  %v567_v21 = vsel %vm491_vm3, %v562_v10, %v566_v11  ;;  %v1266_v27 = vunpack.c.l.b16 %v1222_v18  ;;  %v2064_v10 = vshrl.u32 %v3471_v53, 16 }
  0xa1   : > { %v1277_v29 = vpack.c.b16 %v1266_v27, %v1266_v27 }
  0xa3   : > { %v381_v30 = vpop.f32.mrf.mxu3  ;;  %v376_v32 = vpop.f32.mrf.mxu2  ;;  %v1358_v39 = vshll.u32 %v1277_v29, 16 }
  0xa4   : > { %410 = vst.msk [vmem:[#allocation2 + $0x78] sm:$0xff] %vm394_vm4, %v381_v30  ;;  %v364_v33 = vpop.f32.mrf.mxu1  ;;  %v349_v35 = vpop.f32.mrf.mxu0 }
  0xa5   : > { %408 = vst.msk [vmem:[#allocation2 + $0x68] sm:$0xff] %vm394_vm4, %v376_v32  ;;  %v1360_v46 = vrot.slane %v1358_v39, 1 }
  0xa6   : > { %403 = vst.msk [vmem:[#allocation2 + $0x40] sm:$0xff] %vm394_vm4, %v364_v33  ;;  %v669_v33 = vld [vmem:[#allocation2 + $0x8] sm:$0xff] }
  0xa7   : > { %397 = vst.msk [vmem:[#allocation2 + $0x10] sm:$0xff] %vm394_vm4, %v349_v35  ;;  %3038 = vmatmul.msk.bf16.gmra.mxu1 %vm300_vm1, %v551_v34  ;;  %3191 = vmatmul.msk.bf16.gmra.mxu0 %vm300_vm1, %v1337_v36  ;;  %v568_v34 = vshrl.u32 %v3420_v0, 16  ;;  %v572_v35 = vshll.u32 %v490_v28, 16  ;;  %v3198_v0 = vld [vmem:[%s3655_s6 + $0x8] sm:$0xe] }
  0xa8   : > { %3140 = vmatmul.msk.bf16.gmra.mxu3 %vm300_vm1, %v3437_v31  ;;  %3091 = vmatmul.msk.bf16.gmra.mxu2 %vm300_vm1, %v823_v37 }
  0xa9   : > { %v574_v44 = vrot.slane %v572_v35, 1 }
  0xab   : > { %v384_v40 = vpop.f32.mrf.mxu3  ;;  %v3797_v41 = vpop.f32.mrf.mxu2 }
  0xac   : > { %411 = vst.msk [vmem:[#allocation2 + $0x80] sm:$0xff] %vm394_vm4, %v384_v40  ;;  %v366_v43 = vpop.f32.mrf.mxu1  ;;  %v351_v47 = vpop.f32.mrf.mxu0 }
  0xad   : > { %404 = vst.msk [vmem:[#allocation2 + $0x48] sm:$0xff] %vm394_vm4, %v366_v43  ;;  %v570_v43 = vor.u32 %v568_v34, %v566_v11 }
  0xae   : > { %398 = vst.msk [vmem:[#allocation2 + $0x18] sm:$0xff] %vm394_vm4, %v351_v47  ;;  %v670_v51 = vld [vmem:[#allocation2 + $0x10] sm:$0xff] }
  0xaf   : > { %v575_v52 = vsel %vm491_vm3, %v570_v43, %v574_v44 }
  0xb3   : > { %v386_v56 = vpop.f32.mrf.mxu3  ;;  %v3804_v58 = vpop.f32.mrf.mxu2 }
  0xb4   : > { %412 = vst.msk [vmem:[#allocation2 + $0x88] sm:$0xff] %vm394_vm4, %v386_v56  ;;  %v369_v59 = vpop.f32.mrf.mxu1  ;;  %v354_v61 = vpop.f32.mrf.mxu0  ;;  %v1361_v56 = vsel %vm491_vm3, %v1356_v45, %v1360_v46  ;;  %v3905_v45 = vld [vmem:[%s3655_s6 + $0x20] sm:$0xff] }
  0xb5   : > { %405 = vst.msk [vmem:[#allocation2 + $0x50] sm:$0xff] %vm394_vm4, %v369_v59 }
  0xb6   : > { %399 = vst.msk [vmem:[#allocation2 + $0x20] sm:$0xff] %vm394_vm4, %v354_v61  ;;  %v3860_v61 = vld [vmem:[%s3655_s6 + $0x18] sm:$0xff] }
  0xb7   : > { %3039 = vmatmul.msk.bf16.gmra.mxu1 %vm300_vm1, %v559_v60  ;;  %3192 = vmatmul.msk.bf16.gmra.mxu0 %vm300_vm1, %v1345_v62  ;;  %v2066_v62 = vshll.u32 %v3471_v53, 16  ;;  %v2071_v12 = vshll.u32 %v3860_v61, 16  ;;  %v3915_v53 = vld [vmem:[%s3655_s6 + $0x18] sm:$0xff] }
  0xb8   : > { %3141 = vmatmul.msk.bf16.gmra.mxu3 %vm300_vm1, %v3438_v57  ;;  %3092 = vmatmul.msk.bf16.gmra.mxu2 %vm300_vm1, %v825_v63 }
  0xb9   : > { %v2068_v11 = vrot.slane %v2066_v62, 1 }
  0xbb   : > { %v389_v2 = vpop.f32.mrf.mxu3  ;;  %v3818_v3 = vpop.f32.mrf.mxu2 }
  0xbc   : > { %413 = vst.msk [vmem:[#allocation2 + $0x90] sm:$0xff] %vm394_vm4, %v389_v2  ;;  %v371_v4 = vpop.f32.mrf.mxu1  ;;  %v356_v7 = vpop.f32.mrf.mxu0  ;;  %v3351_v2 = vld [vmem:[%s3655_s6 + $0x10] sm:$0xe] }
  0xbd   : > { %406 = vst.msk [vmem:[#allocation2 + $0x58] sm:$0xff] %vm394_vm4, %v371_v4  ;;  %v3481_v4 = vld [vmem:[%s3655_s6 + $0x10] sm:$0xf0]  ;;  %v672_v34 = vld [vmem:[#allocation2 + $0x20] sm:$0xff] }
  0xbe   : > { %400 = vst.msk [vmem:[#allocation2 + $0x28] sm:$0xff] %vm394_vm4, %v356_v7  ;;  %v671_v7 = vld [vmem:[#allocation2 + $0x18] sm:$0xff] }
  0xc3   : > { %v391_v15 = vpop.f32.mrf.mxu3  ;;  %v3825_v17 = vpop.f32.mrf.mxu2 }
  0xc4   : > { %414 = vst.msk [vmem:[#allocation2 + $0x98] sm:$0xff] %vm394_vm4, %v391_v15  ;;  %v618_v19 = vpop.f32.mrf.mxu1  ;;  %v3830_v25 = vpop.f32.mrf.mxu0  ;;  %v3878_v15 = vld [vmem:[%s3655_s6 + $0x18] sm:$0xff] }
  0xc5   : > { %v688_v24 = vadd.f32 %v668_v20, %v618_v19  ;;  %v2376_v28 = vrot.slane %v3878_v15, 1 }
  0xc7   : > { %708 = vst.msk [vmem:[#allocation2] sm:$0xff] %vm394_vm4, %v688_v24  ;;  %3040 = vmatmul.msk.bf16.gmra.mxu1 %vm300_vm1, %v567_v21  ;;  %3193 = vmatmul.msk.bf16.gmra.mxu0 %vm300_vm1, %v1353_v26  ;;  %v2073_v24 = vrot.slane %v2071_v12, 1  ;;  %v3464_v12 = vld [vmem:[%s3655_s6 + $0x28] sm:$0xff] }
  0xc8   : > { %3142 = vmatmul.msk.bf16.gmra.mxu3 %vm300_vm1, %v3439_v16  ;;  %3287 = vmatmul.msk.bf16.vlgmr.msra.gmra.mxu2 %vm300_vm1, %v3461_v23  ;;  %v3352_v16 = vor.u32 %v3481_v4, %v3351_v2  ;;  %v2069_v23 = vor.u32 %v2068_v11, %v2064_v10 }
  0xca   : > { %v2375_v27 = vrot.slane %v3352_v16, 1 }
  0xcb   : > { %v1092_v30 = vpop.f32.mrf.mxu3  ;;  %v3838_v31 = vpop.f32.mrf.mxu2 }
  0xcc   : > { %v620_v32 = vpop.f32.mrf.mxu1  ;;  %v3840_v37 = vpop.f32.mrf.mxu0 }
  0xcd   : > { %v689_v36 = vadd.f32 %v669_v33, %v620_v32 }
  0xce   : > { %v918_v40 = vld [vmem:[#allocation2] sm:$0xff] }
  0xcf   : > { %v938_v42 = vadd.f32 %v918_v40, %v3797_v41  ;;  %709 = vst.msk [vmem:[#allocation2 + $0x8] sm:$0xff] %vm394_vm4, %v689_v36  ;;  %v2074_v36 = vsel %vm491_vm3, %v2069_v23, %v2073_v24 }
  0xd1   : > { %958 = vst.msk [vmem:[#allocation2] sm:$0xff] %vm394_vm4, %v938_v42 }
  0xd3   : > { %v1094_v47 = vpop.f32.mrf.mxu3  ;;  %v3846_v49 = vpop.f32.mrf.mxu2 }
  0xd4   : > { %v623_v50 = vpop.f32.mrf.mxu1  ;;  %v3851_v55 = vpop.f32.mrf.mxu0 }
  0xd5   : > { %v690_v41 = vadd.f32 %v670_v51, %v623_v50 }
  0xd6   : > { %v919_v57 = vld [vmem:[#allocation2 + $0x8] sm:$0xff] }
  0xd7   : > { %v939_v59 = vadd.f32 %v919_v57, %v3804_v58  ;;  %710 = vst.msk [vmem:[#allocation2 + $0x10] sm:$0xff] %vm394_vm4, %v690_v41  ;;  %3041 = vmatmul.msk.bf16.gmra.mxu1 %vm300_vm1, %v575_v52  ;;  %3194 = vmatmul.msk.bf16.gmra.mxu0 %vm300_vm1, %v1361_v56  ;;  %v3451_v58 = vld [vmem:[%s3655_s6 + $0x8] sm:$0xf0]  ;;  %v2079_v41 = vshll.u32 %v3905_v45, 16 }
  0xd8   : > { %3143 = vmatmul.msk.bf16.gmra.mxu3 %vm300_vm1, %v3440_v48  ;;  %v1142_v60 = vld [vmem:[#allocation2] sm:$0xff]  ;;  %3288 = vmatmul.msk.bf16.gmra.mxu2 %vm300_vm1, %v3462_v54  ;;  %v3199_v9 = vor.u32 %v3451_v58, %v3198_v0  ;;  %v673_v52 = vld [vmem:[#allocation2 + $0x28] sm:$0xff]  ;;  %v2075_v54 = vshrl.u32 %v3860_v61, 16 }
  0xd9   : > { %959 = vst.msk [vmem:[#allocation2 + $0x8] sm:$0xff] %vm394_vm4, %v939_v59  ;;  %v1162_v63 = vadd.f32 %v1142_v60, %v1092_v30  ;;  %v3923_v59 = vld [vmem:[%s3655_s6 + $0x20] sm:$0xff]  ;;  %v2081_v61 = vrot.slane %v2079_v41, 1 }
  0xda   : > { %v1590_v21 = vrot.slane %v3199_v9, 1  ;;  %v2077_v0 = vor.u32 %v2075_v54, %v2073_v24  ;;  %v674_v9 = vld [vmem:[#allocation2 + $0x30] sm:$0xff] }
  0xdb   : > { %v1097_v1 = vpop.f32.mrf.mxu3  ;;  %1182 = vst.msk [vmem:[#allocation2] sm:$0xff] %vm394_vm4, %v1162_v63  ;;  %v3869_v5 = vpop.f32.mrf.mxu2  ;;  %v1593_v63 = vrot.slane %v3915_v53, 1 }
  0xdc   : > { %v625_v6 = vpop.f32.mrf.mxu1  ;;  %v3875_v14 = vpop.f32.mrf.mxu0  ;;  %v1592_v35 = vsel %vm804_vm2, %v1590_v21, %v1591_v22  ;;  %v2082_v11 = vsel %vm491_vm3, %v2077_v0, %v2081_v61 }
  0xdd   : > { %v691_v13 = vadd.f32 %v671_v7, %v625_v6  ;;  %v1594_v10 = vsel %vm804_vm2, %v1591_v22, %v1593_v63 }
  0xde   : > { %v920_v18 = vld [vmem:[#allocation2 + $0x10] sm:$0xff] }
  0xdf   : > { %v940_v19 = vadd.f32 %v920_v18, %v3818_v3  ;;  %711 = vst.msk [vmem:[#allocation2 + $0x18] sm:$0xff] %vm394_vm4, %v691_v13 }
  0xe0   : > { %v1143_v20 = vld [vmem:[#allocation2 + $0x8] sm:$0xff] }
  0xe1   : > { %960 = vst.msk [vmem:[#allocation2 + $0x10] sm:$0xff] %vm394_vm4, %v940_v19  ;;  %v1163_v26 = vadd.f32 %v1143_v20, %v1094_v47  ;;  %v3954_v20 = vld [vmem:[%s3655_s6 + $0x28] sm:$0xff] }
  0xe2   : > { %v1454_v29 = vld [vmem:[#allocation2] sm:$0xff] }
  0xe3   : > { %v1099_v30 = vpop.f32.mrf.mxu3  ;;  %1183 = vst.msk [vmem:[#allocation2 + $0x8] sm:$0xff] %vm394_vm4, %v1163_v26  ;;  %v1474_v3 = vadd.f32 %v1454_v29, %v3830_v25  ;;  %v3887_v32 = vpop.f32.mrf.mxu2  ;;  %v2377_v25 = vsel %vm804_vm2, %v2375_v27, %v2376_v28  ;;  %v675_v26 = vld [vmem:[#allocation2 + $0x38] sm:$0xff]  ;;  %v3964_v27 = vld [vmem:[%s3655_s6 + $0x20] sm:$0xff]  ;;  %v2087_v29 = vshll.u32 %v3954_v20, 16 }
  0xe4   : > { %v628_v33 = vpop.f32.mrf.mxu1  ;;  %v3895_v40 = vpop.f32.mrf.mxu0 }
  0xe5   : > { %1494 = vst.msk [vmem:[#allocation2] sm:$0xff] %vm394_vm4, %v1474_v3  ;;  %v692_v39 = vadd.f32 %v672_v34, %v628_v33  ;;  %v3972_v33 = vld [vmem:[%s3655_s6 + $0x28] sm:$0xff] }
  0xe6   : > { %v921_v42 = vld [vmem:[#allocation2 + $0x18] sm:$0xff] }
  0xe7   : > { %v941_v43 = vadd.f32 %v921_v42, %v3825_v17  ;;  %712 = vst.msk [vmem:[#allocation2 + $0x20] sm:$0xff] %vm394_vm4, %v692_v39  ;;  %3236 = vmatmul.msk.bf16.vlgmr.msra.gmra.mxu1 %vm300_vm1, %v1592_v35  ;;  %3389 = vmatmul.msk.bf16.vlgmr.msra.gmra.mxu0 %vm300_vm1, %v2377_v25  ;;  %v2089_v39 = vrot.slane %v2087_v29, 1  ;;  %v2380_v42 = vrot.slane %v3972_v33, 1 }
  0xe8   : > { %3338 = vmatmul.msk.bf16.vlgmr.msra.gmra.mxu3 %vm300_vm1, %v2074_v36  ;;  %v1144_v44 = vld [vmem:[#allocation2 + $0x10] sm:$0xff]  ;;  %3289 = vmatmul.msk.bf16.gmra.mxu2 %vm300_vm1, %v3463_v38  ;;  %v1595_v36 = vrot.slane %v3964_v27, 1 }
  0xe9   : > { %961 = vst.msk [vmem:[#allocation2 + $0x18] sm:$0xff] %vm394_vm4, %v941_v43  ;;  %v1164_v46 = vadd.f32 %v1144_v44, %v1097_v1  ;;  %v2378_v1 = vrot.slane %v3923_v59, 1 }
  0xea   : > { %v1455_v47 = vld [vmem:[#allocation2 + $0x8] sm:$0xff] }
  0xeb   : > { %v1102_v17 = vpop.f32.mrf.mxu3  ;;  %1184 = vst.msk [vmem:[#allocation2 + $0x10] sm:$0xff] %vm394_vm4, %v1164_v46  ;;  %v1475_v48 = vadd.f32 %v1455_v47, %v3840_v37  ;;  %v3912_v50 = vpop.f32.mrf.mxu2  ;;  %v676_v47 = vld [vmem:[#allocation2 + $0x40] sm:$0xff] }
  0xec   : > { %v630_v51 = vpop.f32.mrf.mxu1  ;;  %v3920_v57 = vpop.f32.mrf.mxu0 }
  0xed   : > { %1495 = vst.msk [vmem:[#allocation2 + $0x8] sm:$0xff] %vm394_vm4, %v1475_v48  ;;  %v693_v56 = vadd.f32 %v673_v52, %v630_v51  ;;  %v3465_v51 = vld [vmem:[%s3655_s6 + $0x30] sm:$0xff] }
  0xee   : > { %v922_v60 = vld [vmem:[#allocation2 + $0x20] sm:$0xff] }
  0xef   : > { %v942_v37 = vadd.f32 %v922_v60, %v3838_v31  ;;  %713 = vst.msk [vmem:[#allocation2 + $0x28] sm:$0xff] %vm394_vm4, %v693_v56  ;;  %v4003_v60 = vld [vmem:[%s3655_s6 + $0x30] sm:$0xff] }
  0xf0   : > { %v1145_v62 = vld [vmem:[#allocation2 + $0x18] sm:$0xff] }
  0xf1   : > { %962 = vst.msk [vmem:[#allocation2 + $0x20] sm:$0xff] %vm394_vm4, %v942_v37  ;;  %v1165_v58 = vadd.f32 %v1145_v62, %v1099_v30 }
  0xf2   : > { %v1456_v2 = vld [vmem:[#allocation2 + $0x10] sm:$0xff] }
  0xf3   : > { %v1104_v4 = vpop.f32.mrf.mxu3  ;;  %1185 = vst.msk [vmem:[#allocation2 + $0x18] sm:$0xff] %vm394_vm4, %v1165_v58  ;;  %v1476_v6 = vadd.f32 %v1456_v2, %v3851_v55  ;;  %v3932_v31 = vpop.f32.mrf.mxu2  ;;  %v2379_v55 = vsel %vm804_vm2, %v2376_v28, %v2378_v1  ;;  %v2083_v28 = vshrl.u32 %v3905_v45, 16  ;;  %v4013_v58 = vld [vmem:[%s3655_s6 + $0x28] sm:$0xff]  ;;  %v2095_v2 = vshll.u32 %v4003_v60, 16 }
  0xf4   : > { %v633_v7 = vpop.f32.mrf.mxu1  ;;  %v3942_v16 = vpop.f32.mrf.mxu0 }
  0xf5   : > { %1496 = vst.msk [vmem:[#allocation2 + $0x10] sm:$0xff] %vm394_vm4, %v1476_v6  ;;  %v694_v13 = vadd.f32 %v674_v9, %v633_v7  ;;  %v2085_v38 = vor.u32 %v2083_v28, %v2081_v61  ;;  %v677_v61 = vld [vmem:[#allocation2 + $0x48] sm:$0xff]  ;;  %v4021_v7 = vld [vmem:[%s3655_s6 + $0x30] sm:$0xff] }
  0xf6   : > { %v923_v18 = vld [vmem:[#allocation2 + $0x28] sm:$0xff] }
  0xf7   : > { %v943_v19 = vadd.f32 %v923_v18, %v3846_v49  ;;  %714 = vst.msk [vmem:[#allocation2 + $0x30] sm:$0xff] %vm394_vm4, %v694_v13  ;;  %3237 = vmatmul.msk.bf16.gmra.mxu1 %vm300_vm1, %v1594_v10  ;;  %3390 = vmatmul.msk.bf16.gmra.mxu0 %vm300_vm1, %v2379_v55  ;;  %v2090_v48 = vsel %vm491_vm3, %v2085_v38, %v2089_v39  ;;  %v2097_v13 = vrot.slane %v2095_v2, 1  ;;  %v2382_v18 = vrot.slane %v4021_v7, 1 }
  0xf8   : > { %3339 = vmatmul.msk.bf16.gmra.mxu3 %vm300_vm1, %v2082_v11  ;;  %v1146_v8 = vld [vmem:[#allocation2 + $0x20] sm:$0xff]  ;;  %3290 = vmatmul.msk.bf16.gmra.mxu2 %vm300_vm1, %v3464_v12  ;;  %v1597_v11 = vrot.slane %v4013_v58, 1 }
  0xf9   : > { %963 = vst.msk [vmem:[#allocation2 + $0x28] sm:$0xff] %vm394_vm4, %v943_v19  ;;  %v1166_v15 = vadd.f32 %v1146_v8, %v1102_v17  ;;  %v1596_v17 = vsel %vm804_vm2, %v1593_v63, %v1595_v36 }
  0xfa   : > { %v1457_v21 = vld [vmem:[#allocation2 + $0x18] sm:$0xff] }
  0xfb   : > { %v1107_v49 = vpop.f32.mrf.mxu3  ;;  %1186 = vst.msk [vmem:[#allocation2 + $0x20] sm:$0xff] %vm394_vm4, %v1166_v15  ;;  %v1477_v22 = vadd.f32 %v1457_v21, %v3875_v14  ;;  %v3961_v23 = vpop.f32.mrf.mxu2  ;;  %v678_v21 = vld [vmem:[#allocation2 + $0x50] sm:$0xff] }
  0xfc   : > { %v635_v24 = vpop.f32.mrf.mxu1  ;;  %v3969_v3 = vpop.f32.mrf.mxu0 }
  0xfd   : > { %1497 = vst.msk [vmem:[#allocation2 + $0x18] sm:$0xff] %vm394_vm4, %v1477_v22  ;;  %v695_v30 = vadd.f32 %v675_v26, %v635_v24  ;;  %v3466_v24 = vld [vmem:[%s3655_s6 + $0x38] sm:$0xff] }
  0xfe   : > { %v924_v34 = vld [vmem:[#allocation2 + $0x30] sm:$0xff] }
  0xff   : > { %v944_v14 = vadd.f32 %v924_v34, %v3869_v5  ;;  %715 = vst.msk [vmem:[#allocation2 + $0x38] sm:$0xff] %vm394_vm4, %v695_v30  ;;  %v4052_v34 = vld [vmem:[%s3655_s6 + $0x38] sm:$0xff] }
 0x100   : > { %v1147_v35 = vld [vmem:[#allocation2 + $0x28] sm:$0xff] }
 0x101   : > { %964 = vst.msk [vmem:[#allocation2 + $0x30] sm:$0xff] %vm394_vm4, %v944_v14  ;;  %v1167_v25 = vadd.f32 %v1147_v35, %v1104_v4 }
 0x102   : > { %v1458_v43 = vld [vmem:[#allocation2 + $0x20] sm:$0xff] }
 0x103   : > { %v1109_v44 = vpop.f32.mrf.mxu3  ;;  %1187 = vst.msk [vmem:[#allocation2 + $0x28] sm:$0xff] %vm394_vm4, %v1167_v25  ;;  %v1478_v45 = vadd.f32 %v1458_v43, %v3895_v40  ;;  %v3981_v5 = vpop.f32.mrf.mxu2  ;;  %v2381_v40 = vsel %vm804_vm2, %v2378_v1, %v2380_v42  ;;  %v2091_v1 = vshrl.u32 %v3954_v20, 16  ;;  %v4062_v25 = vld [vmem:[%s3655_s6 + $0x30] sm:$0xff]  ;;  %v2103_v43 = vshll.u32 %v4052_v34, 16 }
 0x104   : > { %v638_v46 = vpop.f32.mrf.mxu1  ;;  %v3991_v54 = vpop.f32.mrf.mxu0 }
 0x105   : > { %1498 = vst.msk [vmem:[#allocation2 + $0x20] sm:$0xff] %vm394_vm4, %v1478_v45  ;;  %v696_v52 = vadd.f32 %v676_v47, %v638_v46  ;;  %v2093_v12 = vor.u32 %v2091_v1, %v2089_v39  ;;  %v679_v39 = vld [vmem:[#allocation2 + $0x58] sm:$0xff] }
 0x106   : > { %v925_v41 = vld [vmem:[#allocation2 + $0x38] sm:$0xff] }
 0x107   : > { %v945_v56 = vadd.f32 %v925_v41, %v3887_v32  ;;  %716 = vst.msk [vmem:[#allocation2 + $0x40] sm:$0xff] %vm394_vm4, %v696_v52  ;;  %3238 = vmatmul.msk.bf16.gmra.mxu1 %vm300_vm1, %v1596_v17  ;;  %3391 = vmatmul.msk.bf16.gmra.mxu0 %vm300_vm1, %v2381_v40  ;;  %v2098_v22 = vsel %vm491_vm3, %v2093_v12, %v2097_v13  ;;  %v4070_v46 = vld [vmem:[%s3655_s6 + $0x38] sm:$0xff]  ;;  %v2105_v52 = vrot.slane %v2103_v43, 1 }
 0x108   : > { %3340 = vmatmul.msk.bf16.gmra.mxu3 %vm300_vm1, %v2090_v48  ;;  %v1148_v53 = vld [vmem:[#allocation2 + $0x30] sm:$0xff]  ;;  %3291 = vmatmul.msk.bf16.gmra.mxu2 %vm300_vm1, %v3465_v51  ;;  %v1599_v48 = vrot.slane %v4062_v25, 1  ;;  %v2384_v41 = vrot.slane %v4070_v46, 1 }
 0x109   : > { %965 = vst.msk [vmem:[#allocation2 + $0x38] sm:$0xff] %vm394_vm4, %v945_v56  ;;  %v1168_v59 = vadd.f32 %v1148_v53, %v1107_v49  ;;  %v1598_v49 = vsel %vm804_vm2, %v1595_v36, %v1597_v11 }
 0x10a   : > { %v1459_v37 = vld [vmem:[#allocation2 + $0x28] sm:$0xff] }
 0x10b   : > { %v1112_v32 = vpop.f32.mrf.mxu3  ;;  %1188 = vst.msk [vmem:[#allocation2 + $0x30] sm:$0xff] %vm394_vm4, %v1168_v59  ;;  %v1479_v62 = vadd.f32 %v1459_v37, %v3920_v57  ;;  %v4010_v63 = vpop.f32.mrf.mxu2  ;;  %v680_v37 = vld [vmem:[#allocation2 + $0x60] sm:$0xff] }
 0x10c   : > { %v640_v0 = vpop.f32.mrf.mxu1  ;;  %v4018_v6 = vpop.f32.mrf.mxu0 }
 0x10d   : > { %1499 = vst.msk [vmem:[#allocation2 + $0x28] sm:$0xff] %vm394_vm4, %v1479_v62  ;;  %v697_v4 = vadd.f32 %v677_v61, %v640_v0  ;;  %v3467_v0 = vld [vmem:[%s3655_s6 + $0x40] sm:$0xff] }
 0x10e   : > { %v926_v9 = vld [vmem:[#allocation2 + $0x40] sm:$0xff] }
 0x10f   : > { %v946_v57 = vadd.f32 %v926_v9, %v3912_v50  ;;  %717 = vst.msk [vmem:[#allocation2 + $0x48] sm:$0xff] %vm394_vm4, %v697_v4  ;;  %v4101_v9 = vld [vmem:[%s3655_s6 + $0x40] sm:$0xff] }
 0x110   : > { %v1149_v10 = vld [vmem:[#allocation2 + $0x38] sm:$0xff] }
 0x111   : > { %966 = vst.msk [vmem:[#allocation2 + $0x40] sm:$0xff] %vm394_vm4, %v946_v57  ;;  %v1169_v55 = vadd.f32 %v1149_v10, %v1109_v44 }
 0x112   : > { %v1460_v19 = vld [vmem:[#allocation2 + $0x30] sm:$0xff] }
 0x113   : > { %v1114_v8 = vpop.f32.mrf.mxu3  ;;  %1189 = vst.msk [vmem:[#allocation2 + $0x38] sm:$0xff] %vm394_vm4, %v1169_v55  ;;  %v1480_v20 = vadd.f32 %v1460_v19, %v3942_v16  ;;  %v4030_v50 = vpop.f32.mrf.mxu2  ;;  %v2383_v16 = vsel %vm804_vm2, %v2380_v42, %v2382_v18  ;;  %v2099_v42 = vshrl.u32 %v4003_v60, 16  ;;  %v4111_v55 = vld [vmem:[%s3655_s6 + $0x38] sm:$0xff]  ;;  %v2111_v19 = vshll.u32 %v4101_v9, 16 }
 0x114   : > { %v643_v15 = vpop.f32.mrf.mxu1  ;;  %v4040_v28 = vpop.f32.mrf.mxu0 }
 0x115   : > { %1500 = vst.msk [vmem:[#allocation2 + $0x30] sm:$0xff] %vm394_vm4, %v1480_v20  ;;  %v698_v26 = vadd.f32 %v678_v21, %v643_v15  ;;  %v2101_v51 = vor.u32 %v2099_v42, %v2097_v13  ;;  %v681_v13 = vld [vmem:[#allocation2 + $0x68] sm:$0xff]  ;;  %v4119_v15 = vld [vmem:[%s3655_s6 + $0x40] sm:$0xff] }
 0x116   : > { %v927_v29 = vld [vmem:[#allocation2 + $0x48] sm:$0xff] }
 0x117   : > { %v947_v30 = vadd.f32 %v927_v29, %v3932_v31  ;;  %718 = vst.msk [vmem:[#allocation2 + $0x50] sm:$0xff] %vm394_vm4, %v698_v26  ;;  %3239 = vmatmul.msk.bf16.gmra.mxu1 %vm300_vm1, %v1598_v49  ;;  %3392 = vmatmul.msk.bf16.gmra.mxu0 %vm300_vm1, %v2383_v16  ;;  %v2106_v62 = vsel %vm491_vm3, %v2101_v51, %v2105_v52  ;;  %v2113_v26 = vrot.slane %v2111_v19, 1  ;;  %v2386_v29 = vrot.slane %v4119_v15, 1 }
 0x118   : > { %3341 = vmatmul.msk.bf16.gmra.mxu3 %vm300_vm1, %v2098_v22  ;;  %v1150_v27 = vld [vmem:[#allocation2 + $0x40] sm:$0xff]  ;;  %3292 = vmatmul.msk.bf16.gmra.mxu2 %vm300_vm1, %v3466_v24  ;;  %v1601_v22 = vrot.slane %v4111_v55, 1 }
 0x119   : > { %967 = vst.msk [vmem:[#allocation2 + $0x48] sm:$0xff] %vm394_vm4, %v947_v30  ;;  %v1170_v33 = vadd.f32 %v1150_v27, %v1112_v32  ;;  %v1600_v32 = vsel %vm804_vm2, %v1597_v11, %v1599_v48 }
 0x11a   : > { %v1461_v14 = vld [vmem:[#allocation2 + $0x38] sm:$0xff] }
 0x11b   : > { %v1117_v31 = vpop.f32.mrf.mxu3  ;;  %1190 = vst.msk [vmem:[#allocation2 + $0x40] sm:$0xff] %vm394_vm4, %v1170_v33  ;;  %v1481_v35 = vadd.f32 %v1461_v14, %v3969_v3  ;;  %v4059_v36 = vpop.f32.mrf.mxu2  ;;  %v682_v14 = vld [vmem:[#allocation2 + $0x70] sm:$0xff] }
 0x11c   : > { %v645_v38 = vpop.f32.mrf.mxu1  ;;  %v4067_v45 = vpop.f32.mrf.mxu0 }
 0x11d   : > { %1501 = vst.msk [vmem:[#allocation2 + $0x38] sm:$0xff] %vm394_vm4, %v1481_v35  ;;  %v699_v44 = vadd.f32 %v679_v39, %v645_v38  ;;  %v3468_v38 = vld [vmem:[%s3655_s6 + $0x48] sm:$0xff] }
 0x11e   : > { %v928_v47 = vld [vmem:[#allocation2 + $0x50] sm:$0xff] }
 0x11f   : > { %v948_v3 = vadd.f32 %v928_v47, %v3961_v23  ;;  %719 = vst.msk [vmem:[#allocation2 + $0x58] sm:$0xff] %vm394_vm4, %v699_v44  ;;  %v4150_v47 = vld [vmem:[%s3655_s6 + $0x48] sm:$0xff] }
 0x120   : > { %v1151_v17 = vld [vmem:[#allocation2 + $0x48] sm:$0xff] }
 0x121   : > { %968 = vst.msk [vmem:[#allocation2 + $0x50] sm:$0xff] %vm394_vm4, %v948_v3  ;;  %v1171_v40 = vadd.f32 %v1151_v17, %v1114_v8 }
 0x122   : > { %v1462_v56 = vld [vmem:[#allocation2 + $0x40] sm:$0xff] }
 0x123   : > { %v1119_v53 = vpop.f32.mrf.mxu3  ;;  %1191 = vst.msk [vmem:[#allocation2 + $0x48] sm:$0xff] %vm394_vm4, %v1171_v40  ;;  %v1482_v60 = vadd.f32 %v1462_v56, %v3991_v54  ;;  %v4079_v23 = vpop.f32.mrf.mxu2  ;;  %v2385_v54 = vsel %vm804_vm2, %v2382_v18, %v2384_v41  ;;  %v2107_v18 = vshrl.u32 %v4052_v34, 16  ;;  %v4160_v40 = vld [vmem:[%s3655_s6 + $0x40] sm:$0xff]  ;;  %v2119_v56 = vshll.u32 %v4150_v47, 16 }
 0x124   : > { %v648_v59 = vpop.f32.mrf.mxu1  ;;  %v4089_v1 = vpop.f32.mrf.mxu0 }
 0x125   : > { %1502 = vst.msk [vmem:[#allocation2 + $0x40] sm:$0xff] %vm394_vm4, %v1482_v60  ;;  %v700_v61 = vadd.f32 %v680_v37, %v648_v59  ;;  %v2109_v24 = vor.u32 %v2107_v18, %v2105_v52  ;;  %v683_v52 = vld [vmem:[#allocation2 + $0x78] sm:$0xff]  ;;  %v4168_v59 = vld [vmem:[%s3655_s6 + $0x48] sm:$0xff] }
 0x126   : > { %v929_v2 = vld [vmem:[#allocation2 + $0x58] sm:$0xff] }
 0x127   : > { %v949_v4 = vadd.f32 %v929_v2, %v3981_v5  ;;  %720 = vst.msk [vmem:[#allocation2 + $0x60] sm:$0xff] %vm394_vm4, %v700_v61  ;;  %3240 = vmatmul.msk.bf16.gmra.mxu1 %vm300_vm1, %v1600_v32  ;;  %3393 = vmatmul.msk.bf16.gmra.mxu0 %vm300_vm1, %v2385_v54  ;;  %v2114_v35 = vsel %vm491_vm3, %v2109_v24, %v2113_v26  ;;  %v2121_v61 = vrot.slane %v2119_v56, 1  ;;  %v2388_v2 = vrot.slane %v4168_v59, 1 }
 0x128   : > { %3342 = vmatmul.msk.bf16.gmra.mxu3 %vm300_vm1, %v2106_v62  ;;  %v1152_v58 = vld [vmem:[#allocation2 + $0x50] sm:$0xff]  ;;  %3293 = vmatmul.msk.bf16.gmra.mxu2 %vm300_vm1, %v3467_v0  ;;  %v1603_v62 = vrot.slane %v4160_v40, 1 }
 0x129   : > { %969 = vst.msk [vmem:[#allocation2 + $0x58] sm:$0xff] %vm394_vm4, %v949_v4  ;;  %v1172_v7 = vadd.f32 %v1152_v58, %v1117_v31  ;;  %v1602_v31 = vsel %vm804_vm2, %v1599_v48, %v1601_v22 }
 0x12a   : > { %v1463_v57 = vld [vmem:[#allocation2 + $0x48] sm:$0xff] }
 0x12b   : > { %v1122_v5 = vpop.f32.mrf.mxu3  ;;  %1192 = vst.msk [vmem:[#allocation2 + $0x50] sm:$0xff] %vm394_vm4, %v1172_v7  ;;  %v1483_v10 = vadd.f32 %v1463_v57, %v4018_v6  ;;  %v4108_v11 = vpop.f32.mrf.mxu2  ;;  %v684_v57 = vld [vmem:[#allocation2 + $0x80] sm:$0xff] }
 0x12c   : > { %v650_v12 = vpop.f32.mrf.mxu1  ;;  %v4116_v20 = vpop.f32.mrf.mxu0 }
 0x12d   : > { %1503 = vst.msk [vmem:[#allocation2 + $0x48] sm:$0xff] %vm394_vm4, %v1483_v10  ;;  %v701_v8 = vadd.f32 %v681_v13, %v650_v12  ;;  %v3469_v12 = vld [vmem:[%s3655_s6 + $0x50] sm:$0xff] }
 0x12e   : > { %v930_v21 = vld [vmem:[#allocation2 + $0x60] sm:$0xff] }
 0x12f   : > { %v950_v6 = vadd.f32 %v930_v21, %v4010_v63  ;;  %721 = vst.msk [vmem:[#allocation2 + $0x68] sm:$0xff] %vm394_vm4, %v701_v8  ;;  %v4197_v21 = vld [vmem:[%s3655_s6 + $0x50] sm:$0xff] }
 0x130   : > { %v1153_v49 = vld [vmem:[#allocation2 + $0x58] sm:$0xff] }
 0x131   : > { %970 = vst.msk [vmem:[#allocation2 + $0x60] sm:$0xff] %vm394_vm4, %v950_v6  ;;  %v1173_v16 = vadd.f32 %v1153_v49, %v1119_v53 }
 0x132   : > { %v1464_v30 = vld [vmem:[#allocation2 + $0x50] sm:$0xff] }
 0x133   : > { %v1124_v27 = vpop.f32.mrf.mxu3  ;;  %1193 = vst.msk [vmem:[#allocation2 + $0x58] sm:$0xff] %vm394_vm4, %v1173_v16  ;;  %v1484_v34 = vadd.f32 %v1464_v30, %v4040_v28  ;;  %v4128_v63 = vpop.f32.mrf.mxu2  ;;  %v2387_v28 = vsel %vm804_vm2, %v2384_v41, %v2386_v29  ;;  %v2115_v41 = vshrl.u32 %v4101_v9, 16  ;;  %v4207_v16 = vld [vmem:[%s3655_s6 + $0x48] sm:$0xff]  ;;  %v2127_v30 = vshll.u32 %v4197_v21, 16 }
 0x134   : > { %v653_v33 = vpop.f32.mrf.mxu1  ;;  %v4138_v42 = vpop.f32.mrf.mxu0 }
 0x135   : > { %1504 = vst.msk [vmem:[#allocation2 + $0x50] sm:$0xff] %vm394_vm4, %v1484_v34  ;;  %v702_v39 = vadd.f32 %v682_v14, %v653_v33  ;;  %v2117_v0 = vor.u32 %v2115_v41, %v2113_v26  ;;  %v685_v26 = vld [vmem:[#allocation2 + $0x88] sm:$0xff]  ;;  %v4215_v33 = vld [vmem:[%s3655_s6 + $0x50] sm:$0xff]  ;;  %v3470_v41 = vld [vmem:[%s3655_s6 + $0x58] sm:$0xff] }
 0x136   : > { %v931_v43 = vld [vmem:[#allocation2 + $0x68] sm:$0xff] }
 0x137   : > { %v951_v44 = vadd.f32 %v931_v43, %v4030_v50  ;;  %722 = vst.msk [vmem:[#allocation2 + $0x70] sm:$0xff] %vm394_vm4, %v702_v39  ;;  %3241 = vmatmul.msk.bf16.gmra.mxu1 %vm300_vm1, %v1602_v31  ;;  %3394 = vmatmul.msk.bf16.gmra.mxu0 %vm300_vm1, %v2387_v28  ;;  %v2122_v10 = vsel %vm491_vm3, %v2117_v0, %v2121_v61  ;;  %v2129_v39 = vrot.slane %v2127_v30, 1  ;;  %v2390_v43 = vrot.slane %v4215_v33, 1  ;;  %v687_v0 = vld [vmem:[#allocation2 + $0x98] sm:$0xff] }
 0x138   : > { %3343 = vmatmul.msk.bf16.gmra.mxu3 %vm300_vm1, %v2114_v35  ;;  %v1154_v25 = vld [vmem:[#allocation2 + $0x60] sm:$0xff]  ;;  %3294 = vmatmul.msk.bf16.gmra.mxu2 %vm300_vm1, %v3468_v38  ;;  %v1605_v35 = vrot.slane %v4207_v16, 1 }
 0x139   : > { %971 = vst.msk [vmem:[#allocation2 + $0x68] sm:$0xff] %vm394_vm4, %v951_v44  ;;  %v1174_v46 = vadd.f32 %v1154_v25, %v1122_v5  ;;  %v1604_v5 = vsel %vm804_vm2, %v1601_v22, %v1603_v62 }
 0x13a   : > { %v1465_v3 = vld [vmem:[#allocation2 + $0x58] sm:$0xff] }
 0x13b   : > { %v1127_v50 = vpop.f32.mrf.mxu3  ;;  %1194 = vst.msk [vmem:[#allocation2 + $0x60] sm:$0xff] %vm394_vm4, %v1174_v46  ;;  %v1485_v17 = vadd.f32 %v1465_v3, %v4067_v45  ;;  %v4157_v48 = vpop.f32.mrf.mxu2  ;;  %v686_v46 = vld [vmem:[#allocation2 + $0x90] sm:$0xff]  ;;  %v1606_v3 = vsel %vm804_vm2, %v1603_v62, %v1605_v35 }
 0x13c   : > { %v655_v51 = vpop.f32.mrf.mxu1  ;;  %v4165_v60 = vpop.f32.mrf.mxu0 }
 0x13d   : > { %1505 = vst.msk [vmem:[#allocation2 + $0x58] sm:$0xff] %vm394_vm4, %v1485_v17  ;;  %v703_v53 = vadd.f32 %v683_v52, %v655_v51 }
 0x13e   : > { %v932_v37 = vld [vmem:[#allocation2 + $0x70] sm:$0xff] }
 0x13f   : > { %v952_v45 = vadd.f32 %v932_v37, %v4059_v36  ;;  %723 = vst.msk [vmem:[#allocation2 + $0x78] sm:$0xff] %vm394_vm4, %v703_v53  ;;  %v4244_v37 = vld [vmem:[%s3655_s6 + $0x58] sm:$0xff] }
 0x140   : > { %v1155_v32 = vld [vmem:[#allocation2 + $0x68] sm:$0xff] }
 0x141   : > { %972 = vst.msk [vmem:[#allocation2 + $0x70] sm:$0xff] %vm394_vm4, %v952_v45  ;;  %v1175_v54 = vadd.f32 %v1155_v32, %v1124_v27 }
 0x142   : > { %v1466_v4 = vld [vmem:[#allocation2 + $0x60] sm:$0xff] }
 0x143   : > { %v1129_v58 = vpop.f32.mrf.mxu3  ;;  %1195 = vst.msk [vmem:[#allocation2 + $0x68] sm:$0xff] %vm394_vm4, %v1175_v54  ;;  %v1486_v9 = vadd.f32 %v1466_v4, %v4089_v1  ;;  %v4177_v36 = vpop.f32.mrf.mxu2  ;;  %v2389_v1 = vsel %vm804_vm2, %v2386_v29, %v2388_v2  ;;  %v2123_v29 = vshrl.u32 %v4150_v47, 16  ;;  %v2131_v54 = vshrl.u32 %v4197_v21, 16 }
 0x144   : > { %v658_v7 = vpop.f32.mrf.mxu1  ;;  %v4185_v18 = vpop.f32.mrf.mxu0 }
 0x145   : > { %1506 = vst.msk [vmem:[#allocation2 + $0x60] sm:$0xff] %vm394_vm4, %v1486_v9  ;;  %v704_v13 = vadd.f32 %v684_v57, %v658_v7  ;;  %v2125_v38 = vor.u32 %v2123_v29, %v2121_v61  ;;  %v4252_v61 = vld [vmem:[%s3655_s6 + $0x50] sm:$0xff]  ;;  %v4260_v9 = vld [vmem:[%s3655_s6 + $0x58] sm:$0xff] }
 0x146   : > { %v933_v19 = vld [vmem:[#allocation2 + $0x78] sm:$0xff] }
 0x147   : > { %v953_v8 = vadd.f32 %v933_v19, %v4079_v23  ;;  %724 = vst.msk [vmem:[#allocation2 + $0x80] sm:$0xff] %vm394_vm4, %v704_v13  ;;  %3242 = vmatmul.msk.bf16.gmra.mxu1 %vm300_vm1, %v1604_v5  ;;  %3395 = vmatmul.msk.bf16.gmra.mxu0 %vm300_vm1, %v2389_v1  ;;  %v2392_v19 = vrot.slane %v4260_v9, 1  ;;  %v1534_v29 = vld [vmem:[%s3655_s6 + $0x58] sm:$0x1] }
 0x148   : > { %3344 = vmatmul.msk.bf16.gmra.mxu3 %vm300_vm1, %v2122_v10  ;;  %v1156_v55 = vld [vmem:[#allocation2 + $0x70] sm:$0xff]  ;;  %3295 = vmatmul.msk.bf16.gmra.mxu2 %vm300_vm1, %v3469_v12  ;;  %v1607_v10 = vrot.slane %v4252_v61, 1  ;;  %v2133_v12 = vor.u32 %v2131_v54, %v2129_v39 }
 0x149   : > { %973 = vst.msk [vmem:[#allocation2 + $0x78] sm:$0xff] %vm394_vm4, %v953_v8  ;;  %v1176_v15 = vadd.f32 %v1156_v55, %v1127_v50  ;;  %v2130_v50 = vsel %vm491_vm3, %v2125_v38, %v2129_v39  ;;  %v2007_v8 = vld [vmem:[%s3655_s6 + $0x60] sm:$0x1]  ;;  %v1705_v54 = vld [vmem:[#allocation2 + $0x10] sm:$0xff] }
 0x14a   : > { %v1467_v6 = vld [vmem:[#allocation2 + $0x68] sm:$0xff] }
 0x14b   : > { %v1132_v23 = vpop.f32.mrf.mxu3  ;;  %1196 = vst.msk [vmem:[#allocation2 + $0x70] sm:$0xff] %vm394_vm4, %v1176_v15  ;;  %v1487_v49 = vadd.f32 %v1467_v6, %v4116_v20  ;;  %v4204_v22 = vpop.f32.mrf.mxu2  ;;  %v1703_v6 = vld [vmem:[#allocation2] sm:$0xff] }
 0x14c   : > { %v660_v24 = vpop.f32.mrf.mxu1  ;;  %v4212_v34 = vpop.f32.mrf.mxu0 }
 0x14d   : > { %1507 = vst.msk [vmem:[#allocation2 + $0x68] sm:$0xff] %vm394_vm4, %v1487_v49  ;;  %v705_v27 = vadd.f32 %v685_v26, %v660_v24  ;;  %v2051_v24 = vunpack.c.l.b16 %v2007_v8 }
 0x14e   : > { %v934_v14 = vld [vmem:[#allocation2 + $0x80] sm:$0xff] }
 0x14f   : > { %v954_v20 = vadd.f32 %v934_v14, %v4108_v11  ;;  %725 = vst.msk [vmem:[#allocation2 + $0x88] sm:$0xff] %vm394_vm4, %v705_v27 }
 0x150   : > { %v1157_v31 = vld [vmem:[#allocation2 + $0x78] sm:$0xff] }
 0x151   : > { %974 = vst.msk [vmem:[#allocation2 + $0x80] sm:$0xff] %vm394_vm4, %v954_v20  ;;  %v1177_v28 = vadd.f32 %v1157_v31, %v1129_v58  ;;  %v1578_v20 = vunpack.c.l.b16 %v1534_v29  ;;  %v1707_v29 = vld [vmem:[#allocation2 + $0x20] sm:$0xff] }
 0x152   : > { %v1468_v44 = vld [vmem:[#allocation2 + $0x70] sm:$0xff] }
 0x153   : > { %v1134_v25 = vpop.f32.mrf.mxu3  ;;  %1197 = vst.msk [vmem:[#allocation2 + $0x78] sm:$0xff] %vm394_vm4, %v1177_v28  ;;  %v1488_v47 = vadd.f32 %v1468_v44, %v4138_v42  ;;  %v4228_v17 = vpop.f32.mrf.mxu2  ;;  %v2391_v42 = vsel %vm804_vm2, %v2388_v2, %v2390_v43  ;;  %v2135_v2 = vshll.u32 %v4244_v37, 16  ;;  %v2319_v28 = vld [vmem:[%s3655_s6 + $0x60] sm:$0x1]  ;;  %v1704_v44 = vld [vmem:[#allocation2 + $0x8] sm:$0xff]  ;;  %s2940_s6 = sshll.u32 %s225_s5, 1 }
 0x154   : > { %v663_v11 = vpop.f32.mrf.mxu1  ;;  %v4231_v52 = vpop.f32.mrf.mxu0  ;;  %s227_s9 = scalar_lea.vmem %s4585_s3, %s2940_s6 }
 0x155   : > { %1508 = vst.msk [vmem:[#allocation2 + $0x70] sm:$0xff] %vm394_vm4, %v1488_v47  ;;  %v706_v51 = vadd.f32 %v686_v46, %v663_v11  ;;  %v2137_v13 = vrot.slane %v2135_v2, 1  ;;  %v2139_v47 = vshrl.u32 %v4244_v37, 16  ;;  %v2363_v46 = vunpack.c.l.b16 %v2319_v28  ;;  %v1708_v28 = vld [vmem:[#allocation2 + $0x28] sm:$0xff] }
 0x156   : > { %v935_v40 = vld [vmem:[#allocation2 + $0x88] sm:$0xff] }
 0x157   : > { %v955_v56 = vadd.f32 %v935_v40, %v4128_v63  ;;  %726 = vst.msk [vmem:[#allocation2 + $0x90] sm:$0xff] %vm394_vm4, %v706_v51  ;;  %3243 = vmatmul.msk.bf16.gmra.mxu1 %vm300_vm1, %v1606_v3  ;;  %3396 = vmatmul.msk.bf16.gmra.mxu0 %vm300_vm1, %v2391_v42  ;;  %v2138_v49 = vsel %vm491_vm3, %v2133_v12, %v2137_v13 }
 0x158   : > { %3345 = vmatmul.msk.bf16.gmra.mxu3 %vm300_vm1, %v2130_v50  ;;  %v1158_v53 = vld [vmem:[#allocation2 + $0x80] sm:$0xff]  ;;  %3296 = vmatmul.msk.bf16.gmra.mxu2 %vm300_vm1, %v3470_v41  ;;  %v2374_v42 = vpack.c.b16 %v2363_v46, %v2363_v46 }
 0x159   : > { %975 = vst.msk [vmem:[#allocation2 + $0x88] sm:$0xff] %vm394_vm4, %v955_v56  ;;  %v1178_v59 = vadd.f32 %v1158_v53, %v1132_v23  ;;  %v1608_v23 = vsel %vm804_vm2, %v1605_v35, %v1607_v10  ;;  %v2062_v35 = vpack.c.b16 %v2051_v24, %v2051_v24  ;;  %v3579_v56 = vmov 0  }
 0x15a   : > { %v1469_v45 = vld [vmem:[#allocation2 + $0x78] sm:$0xff]  ;;  %2789 = vst.msk [vmem:[%s4309_s30 + $0x50] sm:$0x1] %vm2788_vm5, %v3579_v56  ;;  %v2141_v53 = vor.u32 %v2139_v47, %v2137_v13 }
 0x15b   : > { %v1137_v63 = vpop.f32.mrf.mxu3  ;;  %1198 = vst.msk [vmem:[#allocation2 + $0x80] sm:$0xff] %vm394_vm4, %v1178_v59  ;;  %v1489_v32 = vadd.f32 %v1469_v45, %v4165_v60  ;;  %v4262_v57 = vpop.f32.mrf.mxu2  ;;  %v2143_v11 = vshll.u32 %v2062_v35, 16  ;;  %v2394_v45 = vrot.slane %v2374_v42, 1 }
 0x15c   : > { %v665_v62 = vpop.f32.mrf.mxu1  ;;  %v4257_v58 = vpop.f32.mrf.mxu0 }
 0x15d   : > { %1509 = vst.msk [vmem:[#allocation2 + $0x78] sm:$0xff] %vm394_vm4, %v1489_v32  ;;  %v707_v4 = vadd.f32 %v687_v0, %v665_v62  ;;  %v2145_v37 = vrot.slane %v2143_v11, 1 }
 0x15e   : > { %v936_v7 = vld [vmem:[#allocation2 + $0x90] sm:$0xff] }
 0x15f   : > { %v956_v60 = vadd.f32 %v936_v7, %v4157_v48  ;;  %727 = vst.msk [vmem:[#allocation2 + $0x98] sm:$0xff] %vm394_vm4, %v707_v4  ;;  %v2146_v4 = vsel %vm491_vm3, %v2141_v53, %v2145_v37 }
 0x160   : > { %v1159_v5 = vld [vmem:[#allocation2 + $0x88] sm:$0xff] }
 0x161   : > { %976 = vst.msk [vmem:[#allocation2 + $0x90] sm:$0xff] %vm394_vm4, %v956_v60  ;;  %v1179_v1 = vadd.f32 %v1159_v5, %v1134_v25  ;;  %v1589_v25 = vpack.c.b16 %v1578_v20, %v1578_v20  ;;  %v2395_v5 = vsel %vm804_vm2, %v2392_v19, %v2394_v45 }
 0x162   : > { %v1470_v55 = vld [vmem:[#allocation2 + $0x80] sm:$0xff] }
 0x163   : > { %v1139_v21 = vpop.f32.mrf.mxu3  ;;  %1199 = vst.msk [vmem:[#allocation2 + $0x88] sm:$0xff] %vm394_vm4, %v1179_v1  ;;  %v1490_v48 = vadd.f32 %v1470_v55, %v4185_v18  ;;  %v2393_v18 = vsel %vm804_vm2, %v2390_v43, %v2392_v19  ;;  %v4294_v31 = vpop.f32.mrf.mxu2  ;;  %v1609_v41 = vrot.slane %v1589_v25, 1 }
 0x164   : > { %v1653_v15 = vpop.f32.mrf.mxu1  ;;  %v4282_v30 = vpop.f32.mrf.mxu0 }
 0x165   : > { %1510 = vst.msk [vmem:[#allocation2 + $0x80] sm:$0xff] %vm394_vm4, %v1490_v48  ;;  %v1723_v26 = vadd.f32 %v1703_v6, %v1653_v15  ;;  %v1610_v2 = vsel %vm804_vm2, %v1607_v10, %v1609_v41  ;;  %v1709_v41 = vld [vmem:[#allocation2 + $0x30] sm:$0xff] }
 0x166   : > { %v937_v16 = vld [vmem:[#allocation2 + $0x98] sm:$0xff] }
 0x167   : > { %v957_v27 = vadd.f32 %v937_v16, %v4177_v36  ;;  %1743 = vst.msk [vmem:[#allocation2] sm:$0xff] %vm394_vm4, %v1723_v26  ;;  %3244 = vmatmul.msk.bf16.gmra.mxu1 %vm300_vm1, %v1608_v23  ;;  %3397 = vmatmul.msk.bf16.gmra.mxu0 %vm300_vm1, %v2393_v18 }
 0x168   : > { %3346 = vmatmul.msk.bf16.gmra.mxu3 %vm300_vm1, %v2138_v49  ;;  %v1160_v14 = vld [vmem:[#allocation2 + $0x90] sm:$0xff] }
 0x169   : > { %977 = vst.msk [vmem:[#allocation2 + $0x98] sm:$0xff] %vm394_vm4, %v957_v27  ;;  %v1180_v33 = vadd.f32 %v1160_v14, %v1137_v63 }
 0x16a   : > { %v1471_v38 = vld [vmem:[#allocation2 + $0x88] sm:$0xff] }
 0x16b   : > { %v2189_v36 = vpop.f32.mrf.mxu3  ;;  %1200 = vst.msk [vmem:[#allocation2 + $0x90] sm:$0xff] %vm394_vm4, %v1180_v33  ;;  %v1491_v39 = vadd.f32 %v1471_v38, %v4212_v34  ;;  %v4313_v32 = vpop.f32.mrf.mxu2 }
 0x16c   : > { %v1655_v43 = vpop.f32.mrf.mxu1  ;;  %v4302_v50 = vpop.f32.mrf.mxu0 }
 0x16d   : > { %1511 = vst.msk [vmem:[#allocation2 + $0x88] sm:$0xff] %vm394_vm4, %v1491_v39  ;;  %v1724_v3 = vadd.f32 %v1704_v44, %v1655_v43 }
 0x16e   : > { %v1927_v51 = vld [vmem:[#allocation2] sm:$0xff] }
 0x16f   : > { %v1947_v40 = vadd.f32 %v1927_v51, %v4204_v22  ;;  %1744 = vst.msk [vmem:[#allocation2 + $0x8] sm:$0xff] %vm394_vm4, %v1724_v3 }
 0x170   : > { %v1161_v34 = vld [vmem:[#allocation2 + $0x98] sm:$0xff] }
 0x171   : > { %1967 = vst.msk [vmem:[#allocation2] sm:$0xff] %vm394_vm4, %v1947_v40  ;;  %v1181_v59 = vadd.f32 %v1161_v34, %v1139_v21 }
 0x172   : > { %v1472_v22 = vld [vmem:[#allocation2 + $0x90] sm:$0xff] }
 0x173   : > { %v2191_v63 = vpop.f32.mrf.mxu3  ;;  %1201 = vst.msk [vmem:[#allocation2 + $0x98] sm:$0xff] %vm394_vm4, %v1181_v59  ;;  %v1492_v62 = vadd.f32 %v1472_v22, %v4231_v52  ;;  %v1889_v8 = vpop.f32.mrf.mxu2 }
 0x174   : > { %v1658_v0 = vpop.f32.mrf.mxu1  ;;  %v4322_v60 = vpop.f32.mrf.mxu0 }
 0x175   : > { %1512 = vst.msk [vmem:[#allocation2 + $0x90] sm:$0xff] %vm394_vm4, %v1492_v62  ;;  %v1725_v7 = vadd.f32 %v1705_v54, %v1658_v0 }
 0x176   : > { %v1928_v12 = vld [vmem:[#allocation2 + $0x8] sm:$0xff] }
 0x177   : > { %v1948_v52 = vadd.f32 %v1928_v12, %v4228_v17  ;;  %1745 = vst.msk [vmem:[#allocation2 + $0x10] sm:$0xff] %vm394_vm4, %v1725_v7  ;;  %3245 = vmatmul.msk.bf16.gmra.mxu1 %vm300_vm1, %v1610_v2  ;;  %3398 = vmatmul.msk.bf16.gmra.mxu0 %vm300_vm1, %v2395_v5  ;;  %v1706_v17 = vld [vmem:[#allocation2 + $0x18] sm:$0xff] }
 0x178   : > { %3347 = vmatmul.msk.bf16.gmra.mxu3 %vm300_vm1, %v2146_v4  ;;  %v2239_v61 = vld [vmem:[#allocation2] sm:$0xff] }
 0x179   : > { %1968 = vst.msk [vmem:[#allocation2 + $0x8] sm:$0xff] %vm394_vm4, %v1948_v52  ;;  %v2259_v10 = vadd.f32 %v2239_v61, %v2189_v36 }
 0x17a   : > { %v1473_v13 = vld [vmem:[#allocation2 + $0x98] sm:$0xff] }
 0x17b   : > { %v2194_v1 = vpop.f32.mrf.mxu3  ;;  %2279 = vst.msk [vmem:[#allocation2] sm:$0xff] %vm394_vm4, %v2259_v10  ;;  %v1493_v9 = vadd.f32 %v1473_v13, %v4257_v58  ;;  %v1892_v27 = vpop.f32.mrf.mxu2 }
 0x17c   : > { %v1660_v19 = vpop.f32.mrf.mxu1  ;;  %v4336_v21 = vpop.f32.mrf.mxu0 }
 0x17d   : > { %1513 = vst.msk [vmem:[#allocation2 + $0x98] sm:$0xff] %vm394_vm4, %v1493_v9  ;;  %v1726_v55 = vadd.f32 %v1706_v17, %v1660_v19 }
 0x17e   : > { %v1929_v48 = vld [vmem:[#allocation2 + $0x10] sm:$0xff] }
 0x17f   : > { %v1949_v15 = vadd.f32 %v1929_v48, %v4262_v57  ;;  %1746 = vst.msk [vmem:[#allocation2 + $0x18] sm:$0xff] %vm394_vm4, %v1726_v55 }
 0x180   : > { %v2240_v6 = vld [vmem:[#allocation2 + $0x8] sm:$0xff] }
 0x181   : > { %1969 = vst.msk [vmem:[#allocation2 + $0x10] sm:$0xff] %vm394_vm4, %v1949_v15  ;;  %v2260_v23 = vadd.f32 %v2240_v6, %v2191_v63  ;;  %v1711_v15 = vld [vmem:[#allocation2 + $0x40] sm:$0xff] }
 0x182   : > { %v2488_v49 = vld [vmem:[#allocation2] sm:$0xff] }
 0x183   : > { %v2196_v24 = vpop.f32.mrf.mxu3  ;;  %2280 = vst.msk [vmem:[#allocation2 + $0x8] sm:$0xff] %vm394_vm4, %v2260_v23  ;;  %v2508_v58 = vadd.f32 %v2488_v49, %v4282_v30  ;;  %v1894_v11 = vpop.f32.mrf.mxu2 }
 0x184   : > { %v1663_v26 = vpop.f32.mrf.mxu1  ;;  %v4346_v14 = vpop.f32.mrf.mxu0 }
 0x185   : > { %2528 = vst.msk [vmem:[#allocation2] sm:$0xff] %vm394_vm4, %v2508_v58  ;;  %v1727_v18 = vadd.f32 %v1707_v29, %v1663_v26 }
 0x186   : > { %v1930_v16 = vld [vmem:[#allocation2 + $0x18] sm:$0xff] }
 0x187   : > { %v1950_v57 = vadd.f32 %v1930_v16, %v4294_v31  ;;  %1747 = vst.msk [vmem:[#allocation2 + $0x20] sm:$0xff] %vm394_vm4, %v1727_v18 }
 0x188   : > { %v2241_v20 = vld [vmem:[#allocation2 + $0x10] sm:$0xff] }
 0x189   : > { %1970 = vst.msk [vmem:[#allocation2 + $0x18] sm:$0xff] %vm394_vm4, %v1950_v57  ;;  %v2261_v35 = vadd.f32 %v2241_v20, %v2194_v1 }
 0x18a   : > { %v2489_v33 = vld [vmem:[#allocation2 + $0x8] sm:$0xff] }
 0x18b   : > { %v2199_v30 = vpop.f32.mrf.mxu3  ;;  %2281 = vst.msk [vmem:[#allocation2 + $0x10] sm:$0xff] %vm394_vm4, %v2261_v35  ;;  %v2509_v38 = vadd.f32 %v2489_v33, %v4302_v50  ;;  %v4366_v0 = vpop.f32.mrf.mxu2 }
 0x18c   : > { %v2548_v36 = vld [vmem:[#allocation2] sm:$0xff]  ;;  %v1665_v39 = vpop.f32.mrf.mxu1  ;;  %v4357_v3 = vpop.f32.mrf.mxu0 }
 0x18d   : > { %v2568_v31 = vpack.c.bf16 %v2548_v36, %v2548_v36  ;;  %2529 = vst.msk [vmem:[#allocation2 + $0x8] sm:$0xff] %vm394_vm4, %v2509_v38  ;;  %v1728_v43 = vadd.f32 %v1708_v28, %v1665_v39 }
 0x18e   : > { %v1931_v44 = vld [vmem:[#allocation2 + $0x20] sm:$0xff] }
 0x18f   : > { %2768 = vst.msk [vmem:[%s4309_s30] sm:$0xf] %vm2767_vm6, %v2568_v31  ;;  %v1951_v25 = vadd.f32 %v1931_v44, %v4313_v32  ;;  %v2588_v32 = vlaneseq  ;;  %v1712_v44 = vld [vmem:[#allocation2 + $0x48] sm:$0xff] }
 0x190   : > { %v2242_v47 = vld [vmem:[#allocation2 + $0x18] sm:$0xff]  ;;  %1748 = vst.msk [vmem:[#allocation2 + $0x28] sm:$0xff] %vm394_vm4, %v1728_v43 }
 0x191   : > { %1971 = vst.msk [vmem:[#allocation2 + $0x20] sm:$0xff] %vm394_vm4, %v1951_v25  ;;  %v2262_v46 = vadd.f32 %v2242_v47, %v2196_v24  ;;  %v2589_v52 = vshrl.u32 %v2588_v32, 7 }
 0x192   : > { %v2490_v50 = vld [vmem:[#allocation2 + $0x10] sm:$0xff] }
 0x193   : > { %v2201_v51 = vpop.f32.mrf.mxu3  ;;  %2282 = vst.msk [vmem:[#allocation2 + $0x18] sm:$0xff] %vm394_vm4, %v2262_v46  ;;  %v2510_v42 = vadd.f32 %v2490_v50, %v4322_v60  ;;  %v1710_v60 = vld [vmem:[#allocation2 + $0x38] sm:$0xff]  ;;  %v4376_v1 = vadd.s32 8, %v2589_v52  ;;  %v1899_v6 = vpop.f32.mrf.mxu2 }
 0x194   : > { %v2549_v40 = vld [vmem:[#allocation2 + $0x8] sm:$0xff]  ;;  %v1668_v34 = vpop.f32.mrf.mxu1  ;;  %v4370_v2 = vpop.f32.mrf.mxu0 }
 0x195   : > { %v2569_v56 = vpack.c.bf16 %v2549_v40, %v2549_v40  ;;  %2530 = vst.msk [vmem:[#allocation2 + $0x10] sm:$0xff] %vm394_vm4, %v2510_v42  ;;  %v1729_v53 = vadd.f32 %v1709_v41, %v1668_v34  ;;  %vm2592_vm7 = vcmp.lt.s32.totalorder %v4376_v1, 14 }
 0x197   : > { %2769 = vst.msk [vmem:[%s4309_s30 + $0x4] sm:$0xf] %vm2767_vm6, %v2569_v56  ;;  %v1932_v37 = vld [vmem:[#allocation2 + $0x28] sm:$0xff] }
 0x198   : > { %v1952_v59 = vadd.f32 %v1932_v37, %v1889_v8  ;;  %v2243_v45 = vld [vmem:[#allocation2 + $0x20] sm:$0xff]  ;;  %1749 = vst.msk [vmem:[#allocation2 + $0x30] sm:$0xff] %vm394_vm4, %v1729_v53 }
 0x199   : > { %v2263_v22 = vadd.f32 %v2243_v45, %v2199_v30 }
 0x19a   : > { %1972 = vst.msk [vmem:[#allocation2 + $0x28] sm:$0xff] %vm394_vm4, %v1952_v59  ;;  %v2491_v63 = vld [vmem:[#allocation2 + $0x18] sm:$0xff] }
 0x19b   : > { %v2204_v62 = vpop.f32.mrf.mxu3  ;;  %2283 = vst.msk [vmem:[#allocation2 + $0x20] sm:$0xff] %vm394_vm4, %v2263_v22  ;;  %v2511_v54 = vadd.f32 %v2491_v63, %v4336_v21  ;;  %v1902_v46 = vpop.f32.mrf.mxu2 }
 0x19c   : > { %v2550_v4 = vld [vmem:[#allocation2 + $0x10] sm:$0xff]  ;;  %v1670_v7 = vpop.f32.mrf.mxu1  ;;  %v4382_v24 = vpop.f32.mrf.mxu0 }
 0x19d   : > { %v2570_v5 = vpack.c.bf16 %v2550_v4, %v2550_v4  ;;  %2531 = vst.msk [vmem:[#allocation2 + $0x18] sm:$0xff] %vm394_vm4, %v2511_v54  ;;  %v1730_v12 = vadd.f32 %v1710_v60, %v1670_v7 }
 0x19f   : > { %2770 = vst.msk [vmem:[%s4309_s30 + $0x8] sm:$0xf] %vm2767_vm6, %v2570_v5  ;;  %v1933_v61 = vld [vmem:[#allocation2 + $0x30] sm:$0xff]  ;;  %v2603_v55 = vunpack.c.l.bf16 %v2570_v5 }
 0x1a0   : > { %v1953_v10 = vadd.f32 %v1933_v61, %v1892_v27  ;;  %1750 = vst.msk [vmem:[#allocation2 + $0x38] sm:$0xff] %vm394_vm4, %v1730_v12 }
 0x1a1   : > { %v2244_v13 = vld [vmem:[#allocation2 + $0x28] sm:$0xff]  ;;  %v2700_v29 = vmul.f32 %v2603_v55, %v2603_v55  ;;  %v2656_v57 = vsel %vm394_vm4, %v2603_v55, 0.0 }
 0x1a2   : > { %1973 = vst.msk [vmem:[#allocation2 + $0x30] sm:$0xff] %vm394_vm4, %v1953_v10  ;;  %v2264_v9 = vadd.f32 %v2244_v13, %v2201_v51  ;;  %v2492_v19 = vld [vmem:[#allocation2 + $0x20] sm:$0xff] }
 0x1a3   : > { %v2206_v17 = vpop.f32.mrf.mxu3  ;;  %v2512_v8 = vadd.f32 %v2492_v19, %v4346_v14  ;;  %v2721_v36 = vsel %vm394_vm4, %v2700_v29, 0.0  ;;  %v1904_v12 = vpop.f32.mrf.mxu2 }
 0x1a4   : > { %v2551_v21 = vld [vmem:[#allocation2 + $0x18] sm:$0xff]  ;;  %2284 = vst.msk [vmem:[#allocation2 + $0x28] sm:$0xff] %vm394_vm4, %v2264_v9  ;;  %v1673_v48 = vpop.f32.mrf.mxu1  ;;  %v4400_v42 = vpop.f32.mrf.mxu0 }
 0x1a5   : > { %v2571_v23 = vpack.c.bf16 %v2551_v21, %v2551_v21  ;;  %2532 = vst.msk [vmem:[#allocation2 + $0x20] sm:$0xff] %vm394_vm4, %v2512_v8  ;;  %v1731_v49 = vadd.f32 %v1711_v15, %v1673_v48  ;;  %v1714_v48 = vld [vmem:[#allocation2 + $0x58] sm:$0xff] }
 0x1a7   : > { %v2604_v58 = vunpack.c.l.bf16 %v2571_v23  ;;  %2771 = vst.msk [vmem:[%s4309_s30 + $0xc] sm:$0xf] %vm2767_vm6, %v2571_v23  ;;  %v1934_v26 = vld [vmem:[#allocation2 + $0x38] sm:$0xff] }
 0x1a8   : > { %v1954_v18 = vadd.f32 %v1934_v26, %v1894_v11  ;;  %1751 = vst.msk [vmem:[#allocation2 + $0x40] sm:$0xff] %vm394_vm4, %v1731_v49 }
 0x1a9   : > { %v2636_v16 = vsel %vm2592_vm7, %v2604_v58, 0.0  ;;  %v2245_v27 = vld [vmem:[#allocation2 + $0x30] sm:$0xff] }
 0x1aa   : > { %v2658_v14 = vsel %vm394_vm4, %v2636_v16, 0.0  ;;  %v2701_v20 = vmul.f32 %v2636_v16, %v2636_v16  ;;  %1974 = vst.msk [vmem:[#allocation2 + $0x38] sm:$0xff] %vm394_vm4, %v1954_v18  ;;  %v2265_v35 = vadd.f32 %v2245_v27, %v2204_v62  ;;  %v1713_v62 = vld [vmem:[#allocation2 + $0x50] sm:$0xff] }
 0x1ab   : > { %v2209_v33 = vpop.f32.mrf.mxu3  ;;  %v2659_v30 = vadd.f32 %v2658_v14, %v2656_v57  ;;  %v2493_v38 = vld [vmem:[#allocation2 + $0x28] sm:$0xff]  ;;  %v1907_v14 = vpop.f32.mrf.mxu2 }
 0x1ac   : > { %v2723_v39 = vsel %vm394_vm4, %v2701_v20, 0.0  ;;  %v2552_v28 = vld [vmem:[#allocation2 + $0x20] sm:$0xff]  ;;  %2285 = vst.msk [vmem:[#allocation2 + $0x30] sm:$0xff] %vm394_vm4, %v2265_v35  ;;  %v2513_v31 = vadd.f32 %v2493_v38, %v4357_v3  ;;  %v1675_v43 = vpop.f32.mrf.mxu1  ;;  %v2460_v61 = vpop.f32.mrf.mxu0 }
 0x1ad   : > { %v2724_v25 = vadd.f32 %v2723_v39, %v2721_v36  ;;  %v2572_v47 = vpack.c.bf16 %v2552_v28, %v2552_v28  ;;  %v1732_v11 = vadd.f32 %v1712_v44, %v1675_v43  ;;  %v1715_v28 = vld [vmem:[#allocation2 + $0x60] sm:$0xff] }
 0x1ae   : > { %2533 = vst.msk [vmem:[#allocation2 + $0x28] sm:$0xff] %vm394_vm4, %v2513_v31 }
 0x1af   : > { %v2605_v50 = vunpack.c.l.bf16 %v2572_v47  ;;  %2772 = vst.msk [vmem:[%s4309_s30 + $0x10] sm:$0xf] %vm2767_vm6, %v2572_v47  ;;  %v1935_v51 = vld [vmem:[#allocation2 + $0x40] sm:$0xff] }
 0x1b0   : > { %v1955_v40 = vadd.f32 %v1935_v51, %v4366_v0  ;;  %1752 = vst.msk [vmem:[#allocation2 + $0x48] sm:$0xff] %vm394_vm4, %v1732_v11 }
 0x1b1   : > { %v2660_v3 = vsel %vm394_vm4, %v2605_v50, 0.0  ;;  %v2702_v34 = vmul.f32 %v2605_v50, %v2605_v50  ;;  %v2246_v41 = vld [vmem:[#allocation2 + $0x38] sm:$0xff] }
 0x1b2   : > { %v2661_v56 = vadd.f32 %v2660_v3, %v2659_v30  ;;  %1975 = vst.msk [vmem:[#allocation2 + $0x40] sm:$0xff] %vm394_vm4, %v1955_v40  ;;  %v2266_v53 = vadd.f32 %v2246_v41, %v2206_v17  ;;  %v1716_v3 = vld [vmem:[#allocation2 + $0x68] sm:$0xff] }
 0x1b3   : > { %v2211_v37 = vpop.f32.mrf.mxu3  ;;  %v2725_v59 = vsel %vm394_vm4, %v2702_v34, 0.0  ;;  %v2494_v45 = vld [vmem:[#allocation2 + $0x30] sm:$0xff]  ;;  %v1909_v34 = vpop.f32.mrf.mxu2 }
 0x1b4   : > { %v2726_v22 = vadd.f32 %v2725_v59, %v2724_v25  ;;  %2286 = vst.msk [vmem:[#allocation2 + $0x38] sm:$0xff] %vm394_vm4, %v2266_v53  ;;  %v2514_v63 = vadd.f32 %v2494_v45, %v4370_v2  ;;  %v1678_v32 = vpop.f32.mrf.mxu1  ;;  %v2463_v30 = vpop.f32.mrf.mxu0 }
 0x1b5   : > { %v2553_v0 = vld [vmem:[#allocation2 + $0x28] sm:$0xff]  ;;  %v1733_v54 = vadd.f32 %v1713_v62, %v1678_v32 }
 0x1b6   : > { %v2573_v4 = vpack.c.bf16 %v2553_v0, %v2553_v0  ;;  %2534 = vst.msk [vmem:[#allocation2 + $0x30] sm:$0xff] %vm394_vm4, %v2514_v63 }
 0x1b7   : > { %v1936_v7 = vld [vmem:[#allocation2 + $0x48] sm:$0xff]  ;;  %1753 = vst.msk [vmem:[#allocation2 + $0x50] sm:$0xff] %vm394_vm4, %v1733_v54 }
 0x1b8   : > { %v2606_v60 = vunpack.c.l.bf16 %v2573_v4  ;;  %2773 = vst.msk [vmem:[%s4309_s30 + $0x14] sm:$0xf] %vm2767_vm6, %v2573_v4  ;;  %v1956_v5 = vadd.f32 %v1936_v7, %v1899_v6  ;;  %v1717_v4 = vld [vmem:[#allocation2 + $0x70] sm:$0xff] }
 0x1b9   : > { %v2247_v52 = vld [vmem:[#allocation2 + $0x40] sm:$0xff] }
 0x1ba   : > { %v2638_v2 = vsel %vm2592_vm7, %v2606_v60, 0.0  ;;  %1976 = vst.msk [vmem:[#allocation2 + $0x48] sm:$0xff] %vm394_vm4, %v1956_v5  ;;  %v2267_v10 = vadd.f32 %v2247_v52, %v2209_v33 }
 0x1bb   : > { %v2214_v13 = vpop.f32.mrf.mxu3  ;;  %v2662_v9 = vsel %vm394_vm4, %v2638_v2, 0.0  ;;  %v2703_v19 = vmul.f32 %v2638_v2, %v2638_v2  ;;  %v2495_v17 = vld [vmem:[#allocation2 + $0x38] sm:$0xff]  ;;  %v1912_v52 = vpop.f32.mrf.mxu2 }
 0x1bc   : > { %v2663_v8 = vadd.f32 %v2662_v9, %v2661_v56  ;;  %2287 = vst.msk [vmem:[#allocation2 + $0x40] sm:$0xff] %vm394_vm4, %v2267_v10  ;;  %v2515_v55 = vadd.f32 %v2495_v17, %v4382_v24  ;;  %v1680_v21 = vpop.f32.mrf.mxu1 }
 0x1bd   : > { %v2727_v15 = vsel %vm394_vm4, %v2703_v19, 0.0  ;;  %v2554_v6 = vld [vmem:[#allocation2 + $0x30] sm:$0xff]  ;;  %v1734_v23 = vadd.f32 %v1714_v48, %v1680_v21  ;;  %v1718_v21 = vld [vmem:[#allocation2 + $0x78] sm:$0xff] }
 0x1be   : > { %v2728_v49 = vadd.f32 %v2727_v15, %v2726_v22  ;;  %v2574_v58 = vpack.c.bf16 %v2554_v6, %v2554_v6  ;;  %2535 = vst.msk [vmem:[#allocation2 + $0x38] sm:$0xff] %vm394_vm4, %v2515_v55  ;;  %v1937_v26 = vld [vmem:[#allocation2 + $0x50] sm:$0xff] }
 0x1bf   : > { %v1957_v29 = vadd.f32 %v1937_v26, %v1902_v46  ;;  %1754 = vst.msk [vmem:[#allocation2 + $0x58] sm:$0xff] %vm394_vm4, %v1734_v23 }
 0x1c0   : > { %v2607_v18 = vunpack.c.l.bf16 %v2574_v58  ;;  %2774 = vst.msk [vmem:[%s4309_s30 + $0x18] sm:$0xf] %vm2767_vm6, %v2574_v58 }
 0x1c1   : > { %1977 = vst.msk [vmem:[#allocation2 + $0x50] sm:$0xff] %vm394_vm4, %v1957_v29  ;;  %v2248_v24 = vld [vmem:[#allocation2 + $0x48] sm:$0xff] }
 0x1c2   : > { %v2664_v16 = vsel %vm394_vm4, %v2607_v18, 0.0  ;;  %v2704_v27 = vmul.f32 %v2607_v18, %v2607_v18  ;;  %v2268_v57 = vadd.f32 %v2248_v24, %v2211_v37  ;;  %v2465_v37 = vpop.f32.mrf.mxu0 }
 0x1c3   : > { %v4426_v20 = vadd.f32 %v2664_v16, %v2663_v8  ;;  %v2496_v35 = vld [vmem:[#allocation2 + $0x40] sm:$0xff]  ;;  %v2216_v33 = vpop.f32.mrf.mxu3  ;;  %v1914_v58 = vpop.f32.mrf.mxu2 }
 0x1c4   : > { %v2729_v38 = vsel %vm394_vm4, %v2704_v27, 0.0  ;;  %2288 = vst.msk [vmem:[#allocation2 + $0x48] sm:$0xff] %vm394_vm4, %v2268_v57  ;;  %v2516_v36 = vadd.f32 %v2496_v35, %v4400_v42  ;;  %v1683_v39 = vpop.f32.mrf.mxu1 }
 0x1c5   : > { %v4431_v31 = vadd.f32 %v2729_v38, %v2728_v49  ;;  %v2555_v43 = vld [vmem:[#allocation2 + $0x38] sm:$0xff]  ;;  %v1735_v44 = vadd.f32 %v1715_v28, %v1683_v39 }
 0x1c6   : > { %v4433_v25 = vpack.c.bf16 %v2555_v43, %v2555_v43  ;;  %2536 = vst.msk [vmem:[#allocation2 + $0x40] sm:$0xff] %vm394_vm4, %v2516_v36  ;;  %v1938_v47 = vld [vmem:[#allocation2 + $0x58] sm:$0xff] }
 0x1c7   : > { %v1958_v11 = vadd.f32 %v1938_v47, %v1904_v12  ;;  %1755 = vst.msk [vmem:[#allocation2 + $0x60] sm:$0xff] %vm394_vm4, %v1735_v44 }
 0x1c8   : > { %2775 = vst.msk [vmem:[%s4309_s30 + $0x1c] sm:$0xf] %vm2767_vm6, %v4433_v25  ;;  %v2249_v46 = vld [vmem:[#allocation2 + $0x50] sm:$0xff] }
 0x1c9   : > { %1978 = vst.msk [vmem:[#allocation2 + $0x58] sm:$0xff] %vm394_vm4, %v1958_v11  ;;  %v2269_v50 = vadd.f32 %v2249_v46, %v2214_v13 }
 0x1ca   : > { %v2468_v10 = vpop.f32.mrf.mxu0 }
 0x1cb   : > { %2289 = vst.msk [vmem:[#allocation2 + $0x50] sm:$0xff] %vm394_vm4, %v2269_v50  ;;  %v2497_v51 = vld [vmem:[#allocation2 + $0x48] sm:$0xff]  ;;  %v2219_v53 = vpop.f32.mrf.mxu3  ;;  %v1917_v43 = vpop.f32.mrf.mxu2 }
 0x1cc   : > { %v2517_v42 = vadd.f32 %v2497_v51, %v2460_v61  ;;  %v1685_v40 = vpop.f32.mrf.mxu1  ;;  %v1720_v51 = vld [vmem:[#allocation2 + $0x88] sm:$0xff] }
 0x1cd   : > { %v2556_v41 = vld [vmem:[#allocation2 + $0x40] sm:$0xff]  ;;  %v1736_v56 = vadd.f32 %v1716_v3, %v1685_v40 }
 0x1ce   : > { %v4442_v59 = vpack.c.bf16 %v2556_v41, %v2556_v41  ;;  %2537 = vst.msk [vmem:[#allocation2 + $0x48] sm:$0xff] %vm394_vm4, %v2517_v42  ;;  %v1939_v45 = vld [vmem:[#allocation2 + $0x60] sm:$0xff] }
 0x1cf   : > { %v1959_v22 = vadd.f32 %v1939_v45, %v1907_v14  ;;  %1756 = vst.msk [vmem:[#allocation2 + $0x68] sm:$0xff] %vm394_vm4, %v1736_v56  ;;  %v1719_v14 = vld [vmem:[#allocation2 + $0x80] sm:$0xff] }
 0x1d0   : > { %2776 = vst.msk [vmem:[%s4309_s30 + $0x20] sm:$0xf] %vm2767_vm6, %v4442_v59  ;;  %v2250_v63 = vld [vmem:[#allocation2 + $0x58] sm:$0xff] }
 0x1d1   : > { %1979 = vst.msk [vmem:[#allocation2 + $0x60] sm:$0xff] %vm394_vm4, %v1959_v22  ;;  %v2270_v32 = vadd.f32 %v2250_v63, %v2216_v33 }
 0x1d2   : > { %v2498_v62 = vld [vmem:[#allocation2 + $0x50] sm:$0xff]  ;;  %v2470_v18 = vpop.f32.mrf.mxu0 }
 0x1d3   : > { %2290 = vst.msk [vmem:[#allocation2 + $0x58] sm:$0xff] %vm394_vm4, %v2270_v32  ;;  %v2518_v0 = vadd.f32 %v2498_v62, %v2463_v30  ;;  %v2221_v2 = vpop.f32.mrf.mxu3  ;;  %v1919_v22 = vpop.f32.mrf.mxu2  ;;  %v1721_v32 = vld [vmem:[#allocation2 + $0x90] sm:$0xff] }
 0x1d4   : > { %v1688_v54 = vpop.f32.mrf.mxu1 }
 0x1d5   : > { %v2557_v7 = vld [vmem:[#allocation2 + $0x48] sm:$0xff]  ;;  %2538 = vst.msk [vmem:[#allocation2 + $0x50] sm:$0xff] %vm394_vm4, %v2518_v0  ;;  %v1737_v60 = vadd.f32 %v1717_v4, %v1688_v54 }
 0x1d6   : > { %v4452_v5 = vpack.c.bf16 %v2557_v7, %v2557_v7  ;;  %v1940_v12 = vld [vmem:[#allocation2 + $0x68] sm:$0xff] }
 0x1d7   : > { %v1960_v61 = vadd.f32 %v1940_v12, %v1909_v34  ;;  %1757 = vst.msk [vmem:[#allocation2 + $0x70] sm:$0xff] %vm394_vm4, %v1737_v60 }
 0x1d8   : > { %2777 = vst.msk [vmem:[%s4309_s30 + $0x24] sm:$0xf] %vm2767_vm6, %v4452_v5  ;;  %v2251_v13 = vld [vmem:[#allocation2 + $0x60] sm:$0xff] }
 0x1d9   : > { %1980 = vst.msk [vmem:[#allocation2 + $0x68] sm:$0xff] %vm394_vm4, %v1960_v61  ;;  %v2271_v9 = vadd.f32 %v2251_v13, %v2219_v53  ;;  %v2608_v61 = vunpack.c.l.bf16 %v4433_v25 }
 0x1da   : > { %v2499_v19 = vld [vmem:[#allocation2 + $0x58] sm:$0xff]  ;;  %v2473_v11 = vpop.f32.mrf.mxu0 }
 0x1db   : > { %2291 = vst.msk [vmem:[#allocation2 + $0x60] sm:$0xff] %vm394_vm4, %v2271_v9  ;;  %v2519_v17 = vadd.f32 %v2499_v19, %v2465_v37  ;;  %v2224_v29 = vpop.f32.mrf.mxu3  ;;  %v1722_v19 = vld [vmem:[#allocation2 + $0x98] sm:$0xff] }
 0x1dc   : > { %v2558_v8 = vld [vmem:[#allocation2 + $0x50] sm:$0xff]  ;;  %v1690_v55 = vpop.f32.mrf.mxu1 }
 0x1dd   : > { %v4460_v48 = vpack.c.bf16 %v2558_v8, %v2558_v8  ;;  %2539 = vst.msk [vmem:[#allocation2 + $0x58] sm:$0xff] %vm394_vm4, %v2519_v17  ;;  %v1738_v15 = vadd.f32 %v1718_v21, %v1690_v55  ;;  %v1922_v8 = vpop.f32.mrf.mxu2  ;;  %v2640_v21 = vsel %vm2592_vm7, %v2608_v61, 0.0 }
 0x1de   : > { %v1941_v6 = vld [vmem:[#allocation2 + $0x70] sm:$0xff] }
 0x1df   : > { %2778 = vst.msk [vmem:[%s4309_s30 + $0x28] sm:$0xf] %vm2767_vm6, %v4460_v48  ;;  %v1961_v23 = vadd.f32 %v1941_v6, %v1912_v52 }
 0x1e0   : > { %v2252_v49 = vld [vmem:[#allocation2 + $0x68] sm:$0xff]  ;;  %1758 = vst.msk [vmem:[#allocation2 + $0x78] sm:$0xff] %vm394_vm4, %v1738_v15 }
 0x1e1   : > { %1981 = vst.msk [vmem:[#allocation2 + $0x70] sm:$0xff] %vm394_vm4, %v1961_v23  ;;  %v2272_v26 = vadd.f32 %v2252_v49, %v2221_v2  ;;  %v2609_v23 = vunpack.c.l.bf16 %v4442_v59  ;;  %v2610_v49 = vunpack.c.l.bf16 %v4452_v5  ;;  %v2611_v5 = vunpack.c.l.bf16 %v4460_v48 }
 0x1e2   : > { %v2500_v24 = vld [vmem:[#allocation2 + $0x60] sm:$0xff]  ;;  %v2475_v54 = vpop.f32.mrf.mxu0 }
 0x1e3   : > { %2292 = vst.msk [vmem:[#allocation2 + $0x68] sm:$0xff] %vm394_vm4, %v2272_v26  ;;  %v2520_v16 = vadd.f32 %v2500_v24, %v2468_v10  ;;  %v2226_v47 = vpop.f32.mrf.mxu3  ;;  %v2666_v24 = vsel %vm394_vm4, %v2640_v21, 0.0 }
 0x1e4   : > { %v2559_v27 = vld [vmem:[#allocation2 + $0x58] sm:$0xff]  ;;  %v1693_v57 = vpop.f32.mrf.mxu1 }
 0x1e5   : > { %v4469_v35 = vpack.c.bf16 %v2559_v27, %v2559_v27  ;;  %2540 = vst.msk [vmem:[#allocation2 + $0x60] sm:$0xff] %vm394_vm4, %v2520_v16  ;;  %v1739_v33 = vadd.f32 %v1719_v14, %v1693_v57  ;;  %v2706_v27 = vmul.f32 %v2609_v23, %v2609_v23  ;;  %v2642_v57 = vsel %vm2592_vm7, %v2610_v49, 0.0 }
 0x1e7   : > { %2779 = vst.msk [vmem:[%s4309_s30 + $0x2c] sm:$0xf] %vm2767_vm6, %v4469_v35  ;;  %v1942_v30 = vld [vmem:[#allocation2 + $0x78] sm:$0xff]  ;;  %v2612_v14 = vunpack.c.l.bf16 %v4469_v35 }
 0x1e8   : > { %v1962_v38 = vadd.f32 %v1942_v30, %v1914_v58  ;;  %v2253_v36 = vld [vmem:[#allocation2 + $0x70] sm:$0xff]  ;;  %1759 = vst.msk [vmem:[#allocation2 + $0x80] sm:$0xff] %vm394_vm4, %v1739_v33 }
 0x1e9   : > { %v2273_v39 = vadd.f32 %v2253_v36, %v2224_v29  ;;  %v2705_v29 = vmul.f32 %v2640_v21, %v2640_v21  ;;  %v2667_v36 = vadd.f32 %v2666_v24, %v4426_v20  ;;  %v2670_v20 = vsel %vm394_vm4, %v2642_v57, 0.0 }
 0x1ea   : > { %1982 = vst.msk [vmem:[#allocation2 + $0x78] sm:$0xff] %vm394_vm4, %v1962_v38  ;;  %v2501_v28 = vld [vmem:[#allocation2 + $0x68] sm:$0xff]  ;;  %v2478_v6 = vpop.f32.mrf.mxu0 }
 0x1eb   : > { %2293 = vst.msk [vmem:[#allocation2 + $0x70] sm:$0xff] %vm394_vm4, %v2273_v39  ;;  %v2521_v44 = vadd.f32 %v2501_v28, %v2470_v18  ;;  %v2229_v0 = vpop.f32.mrf.mxu3  ;;  %v2731_v30 = vsel %vm394_vm4, %v2705_v29, 0.0  ;;  %v2668_v39 = vsel %vm394_vm4, %v2609_v23, 0.0  ;;  %v2707_v28 = vmul.f32 %v2642_v57, %v2642_v57 }
 0x1ec   : > { %v2560_v46 = vld [vmem:[#allocation2 + $0x60] sm:$0xff]  ;;  %v1695_v50 = vpop.f32.mrf.mxu1 }
 0x1ed   : > { %v4478_v42 = vpack.c.bf16 %v2560_v46, %v2560_v46  ;;  %2541 = vst.msk [vmem:[#allocation2 + $0x68] sm:$0xff] %vm394_vm4, %v2521_v44  ;;  %v1740_v40 = vadd.f32 %v1720_v51, %v1695_v50  ;;  %v2732_v50 = vadd.f32 %v2731_v30, %v4431_v31  ;;  %v2708_v51 = vmul.f32 %v2611_v5, %v2611_v5 }
 0x1ef   : > { %2780 = vst.msk [vmem:[%s4309_s30 + $0x30] sm:$0xf] %vm2767_vm6, %v4478_v42  ;;  %v1943_v3 = vld [vmem:[#allocation2 + $0x80] sm:$0xff] }
 0x1f0   : > { %v1963_v34 = vadd.f32 %v1943_v3, %v1917_v43  ;;  %1760 = vst.msk [vmem:[#allocation2 + $0x88] sm:$0xff] %vm394_vm4, %v1740_v40  ;;  %v1924_v43 = vpop.f32.mrf.mxu2  ;;  %v2613_v40 = vunpack.c.l.bf16 %v4478_v42  ;;  %v2737_v42 = vsel %vm394_vm4, %v2708_v51, 0.0 }
 0x1f1   : > { %v2254_v41 = vld [vmem:[#allocation2 + $0x78] sm:$0xff] }
 0x1f2   : > { %1983 = vst.msk [vmem:[#allocation2 + $0x80] sm:$0xff] %vm394_vm4, %v1963_v34  ;;  %v2274_v56 = vadd.f32 %v2254_v41, %v2226_v47  ;;  %v2502_v53 = vld [vmem:[#allocation2 + $0x70] sm:$0xff]  ;;  %v2733_v47 = vsel %vm394_vm4, %v2706_v27, 0.0  ;;  %v2480_v3 = vpop.f32.mrf.mxu0  ;;  %v2669_v41 = vadd.f32 %v2668_v39, %v2667_v36 }
 0x1f3   : > { %v2522_v37 = vadd.f32 %v2502_v53, %v2473_v11  ;;  %v2231_v15 = vpop.f32.mrf.mxu3  ;;  %v2644_v11 = vsel %vm2592_vm7, %v2612_v14, 0.0  ;;  %v2734_v53 = vadd.f32 %v2733_v47, %v2732_v50 }
 0x1f4   : > { %v2561_v45 = vld [vmem:[#allocation2 + $0x68] sm:$0xff]  ;;  %2294 = vst.msk [vmem:[#allocation2 + $0x78] sm:$0xff] %vm394_vm4, %v2274_v56  ;;  %v1698_v63 = vpop.f32.mrf.mxu1 }
 0x1f5   : > { %v4487_v62 = vpack.c.bf16 %v2561_v45, %v2561_v45  ;;  %2542 = vst.msk [vmem:[#allocation2 + $0x70] sm:$0xff] %vm394_vm4, %v2522_v37  ;;  %v1741_v4 = vadd.f32 %v1721_v32, %v1698_v63  ;;  %v2735_v37 = vsel %vm394_vm4, %v2707_v28, 0.0  ;;  %v2672_v45 = vsel %vm394_vm4, %v2611_v5, 0.0 }
 0x1f6   : > { %v2671_v32 = vadd.f32 %v2670_v20, %v2669_v41 }
 0x1f7   : > { %2781 = vst.msk [vmem:[%s4309_s30 + $0x34] sm:$0xf] %vm2767_vm6, %v4487_v62  ;;  %v1944_v7 = vld [vmem:[#allocation2 + $0x88] sm:$0xff]  ;;  %v2614_v48 = vunpack.c.l.bf16 %v4487_v62 }
 0x1f8   : > { %v1964_v60 = vadd.f32 %v1944_v7, %v1919_v22  ;;  %1761 = vst.msk [vmem:[#allocation2 + $0x90] sm:$0xff] %vm394_vm4, %v1741_v4  ;;  %v2709_v22 = vmul.f32 %v2644_v11, %v2644_v11  ;;  %v2710_v4 = vmul.f32 %v2613_v40, %v2613_v40 }
 0x1f9   : > { %v2255_v12 = vld [vmem:[#allocation2 + $0x80] sm:$0xff]  ;;  %v2646_v31 = vsel %vm2592_vm7, %v2614_v48, 0.0 }
 0x1fa   : > { %1984 = vst.msk [vmem:[#allocation2 + $0x88] sm:$0xff] %vm394_vm4, %v1964_v60  ;;  %v2275_v52 = vadd.f32 %v2255_v12, %v2229_v0  ;;  %v2736_v12 = vadd.f32 %v2735_v37, %v2734_v53  ;;  %v2483_v23 = vpop.f32.mrf.mxu0 }
 0x1fb   : > { %v2503_v2 = vld [vmem:[#allocation2 + $0x78] sm:$0xff]  ;;  %v2234_v35 = vpop.f32.mrf.mxu3 }
 0x1fc   : > { %v2562_v10 = vld [vmem:[#allocation2 + $0x70] sm:$0xff]  ;;  %2295 = vst.msk [vmem:[#allocation2 + $0x80] sm:$0xff] %vm394_vm4, %v2275_v52  ;;  %v2523_v13 = vadd.f32 %v2503_v2, %v2475_v54  ;;  %v1700_v9 = vpop.f32.mrf.mxu1  ;;  %v2674_v54 = vsel %vm394_vm4, %v2644_v11, 0.0  ;;  %v2673_v52 = vadd.f32 %v2672_v45, %v2671_v32  ;;  %v2739_v2 = vsel %vm394_vm4, %v2709_v22, 0.0 }
 0x1fd   : > { %v2582_v17 = vpack.c.bf16 %v2562_v10, %v2562_v10  ;;  %v1742_v55 = vadd.f32 %v1722_v19, %v1700_v9  ;;  %v2676_v10 = vsel %vm394_vm4, %v2613_v40, 0.0  ;;  %v2738_v9 = vadd.f32 %v2737_v42, %v2736_v12 }
 0x1fe   : > { %2543 = vst.msk [vmem:[#allocation2 + $0x78] sm:$0xff] %vm394_vm4, %v2523_v13  ;;  %v2711_v13 = vmul.f32 %v2646_v31, %v2646_v31  ;;  %v2675_v19 = vadd.f32 %v2674_v54, %v2673_v52 }
 0x1ff   : > { %2782 = vst.msk [vmem:[%s4309_s30 + $0x38] sm:$0xf] %vm2767_vm6, %v2582_v17  ;;  %v1945_v25 = vld [vmem:[#allocation2 + $0x90] sm:$0xff]  ;;  %v2615_v7 = vunpack.c.l.bf16 %v2582_v17  ;;  %v2741_v17 = vsel %vm394_vm4, %v2710_v4, 0.0  ;;  %v2740_v49 = vadd.f32 %v2739_v2, %v2738_v9 }
 0x200   : > { %v1965_v58 = vadd.f32 %v1945_v25, %v1922_v8  ;;  %1762 = vst.msk [vmem:[#allocation2 + $0x98] sm:$0xff] %vm394_vm4, %v1742_v55  ;;  %v2678_v55 = vsel %vm394_vm4, %v2646_v31, 0.0  ;;  %v2743_v29 = vsel %vm394_vm4, %v2711_v13, 0.0 }
 0x201   : > { %v2256_v26 = vld [vmem:[#allocation2 + $0x88] sm:$0xff]  ;;  %v2712_v21 = vmul.f32 %v2615_v7, %v2615_v7  ;;  %v2742_v27 = vadd.f32 %v2741_v17, %v2740_v49 }
 0x202   : > { %v2276_v18 = vadd.f32 %v2256_v26, %v2231_v15  ;;  %1985 = vst.msk [vmem:[#allocation2 + $0x90] sm:$0xff] %vm394_vm4, %v1965_v58  ;;  %v2677_v58 = vadd.f32 %v2676_v10, %v2675_v19  ;;  %v2485_v40 = vpop.f32.mrf.mxu0 }
 0x203   : > { %v2504_v16 = vld [vmem:[#allocation2 + $0x80] sm:$0xff] }
 0x204   : > { %2296 = vst.msk [vmem:[#allocation2 + $0x88] sm:$0xff] %vm394_vm4, %v2276_v18  ;;  %v2524_v59 = vadd.f32 %v2504_v16, %v2478_v6  ;;  %v2236_v6 = vpop.f32.mrf.mxu3  ;;  %v2680_v18 = vsel %vm394_vm4, %v2615_v7, 0.0  ;;  %v2679_v57 = vadd.f32 %v2678_v55, %v2677_v58 }
 0x205   : > { %v2563_v33 = vld [vmem:[#allocation2 + $0x78] sm:$0xff] }
 0x206   : > { %v2583_v38 = vpack.c.bf16 %v2563_v33, %v2563_v33  ;;  %2544 = vst.msk [vmem:[#allocation2 + $0x80] sm:$0xff] %vm394_vm4, %v2524_v59  ;;  %v2745_v59 = vsel %vm394_vm4, %v2712_v21, 0.0  ;;  %v2681_v36 = vadd.f32 %v2680_v18, %v2679_v57 }
 0x207   : > { %v1946_v44 = vld [vmem:[#allocation2 + $0x98] sm:$0xff] }
 0x208   : > { %2783 = vst.msk [vmem:[%s4309_s30 + $0x3c] sm:$0xf] %vm2767_vm6, %v2583_v38  ;;  %v1966_v46 = vadd.f32 %v1946_v44, %v1924_v43  ;;  %v2616_v62 = vunpack.c.l.bf16 %v2583_v38  ;;  %v2744_v38 = vadd.f32 %v2743_v29, %v2742_v27 }
 0x209   : > { %v2257_v34 = vld [vmem:[#allocation2 + $0x90] sm:$0xff] }
 0x20a   : > { %1986 = vst.msk [vmem:[#allocation2 + $0x98] sm:$0xff] %vm394_vm4, %v1966_v46  ;;  %v2277_v56 = vadd.f32 %v2257_v34, %v2234_v35  ;;  %v2648_v8 = vsel %vm2592_vm7, %v2616_v62, 0.0  ;;  %v2746_v44 = vadd.f32 %v2745_v59, %v2744_v38 }
 0x20b   : > { %v2505_v63 = vld [vmem:[#allocation2 + $0x88] sm:$0xff]  ;;  %v2713_v24 = vmul.f32 %v2648_v8, %v2648_v8  ;;  %v2682_v5 = vsel %vm394_vm4, %v2648_v8, 0.0 }
 0x20c   : > { %v2525_v0 = vadd.f32 %v2505_v63, %v2480_v3  ;;  %2297 = vst.msk [vmem:[#allocation2 + $0x90] sm:$0xff] %vm394_vm4, %v2277_v56  ;;  %v2683_v35 = vadd.f32 %v2682_v5, %v2681_v36 }
 0x20d   : > { %v2564_v60 = vld [vmem:[#allocation2 + $0x80] sm:$0xff]  ;;  %v2747_v28 = vsel %vm394_vm4, %v2713_v24, 0.0 }
 0x20e   : > { %v2584_v61 = vpack.c.bf16 %v2564_v60, %v2564_v60  ;;  %2545 = vst.msk [vmem:[#allocation2 + $0x88] sm:$0xff] %vm394_vm4, %v2525_v0  ;;  %v2748_v48 = vadd.f32 %v2747_v28, %v2746_v44 }
 0x210   : > { %2784 = vst.msk [vmem:[%s4309_s30 + $0x40] sm:$0xf] %vm2767_vm6, %v2584_v61  ;;  %v2617_v15 = vunpack.c.l.bf16 %v2584_v61 }
 0x211   : > { %v2258_v25 = vld [vmem:[#allocation2 + $0x98] sm:$0xff] }
 0x212   : > { %v2278_v26 = vadd.f32 %v2258_v25, %v2236_v6  ;;  %v2714_v33 = vmul.f32 %v2617_v15, %v2617_v15  ;;  %v2684_v43 = vsel %vm394_vm4, %v2617_v15, 0.0 }
 0x213   : > { %v2506_v16 = vld [vmem:[#allocation2 + $0x90] sm:$0xff]  ;;  %v2685_v46 = vadd.f32 %v2684_v43, %v2683_v35 }
 0x214   : > { %2298 = vst.msk [vmem:[#allocation2 + $0x98] sm:$0xff] %vm394_vm4, %v2278_v26  ;;  %v2526_v14 = vadd.f32 %v2506_v16, %v2483_v23  ;;  %v2749_v11 = vsel %vm394_vm4, %v2714_v33, 0.0 }
 0x215   : > { %v2565_v30 = vld [vmem:[#allocation2 + $0x88] sm:$0xff]  ;;  %v2750_v34 = vadd.f32 %v2749_v11, %v2748_v48 }
 0x216   : > { %v2585_v39 = vpack.c.bf16 %v2565_v30, %v2565_v30  ;;  %2546 = vst.msk [vmem:[#allocation2 + $0x90] sm:$0xff] %vm394_vm4, %v2526_v14 }
 0x218   : > { %v2618_v47 = vunpack.c.l.bf16 %v2585_v39  ;;  %2785 = vst.msk [vmem:[%s4309_s30 + $0x44] sm:$0xf] %vm2767_vm6, %v2585_v39 }
 0x21a   : > { %v2650_v50 = vsel %vm2592_vm7, %v2618_v47, 0.0 }
 0x21b   : > { %v2686_v20 = vsel %vm394_vm4, %v2650_v50, 0.0  ;;  %v2715_v51 = vmul.f32 %v2650_v50, %v2650_v50  ;;  %v2507_v3 = vld [vmem:[#allocation2 + $0x98] sm:$0xff] }
 0x21c   : > { %v2687_v41 = vadd.f32 %v2686_v20, %v2685_v46  ;;  %v2527_v56 = vadd.f32 %v2507_v3, %v2485_v40 }
 0x21d   : > { %v2751_v53 = vsel %vm394_vm4, %v2715_v51, 0.0  ;;  %v2566_v37 = vld [vmem:[#allocation2 + $0x90] sm:$0xff] }
 0x21e   : > { %v2692_v45 = vrot.slane %v2687_v41, 4  ;;  %v2752_v22 = vadd.f32 %v2751_v53, %v2750_v34  ;;  %v2586_v63 = vpack.c.bf16 %v2566_v37, %v2566_v37  ;;  %2547 = vst.msk [vmem:[#allocation2 + $0x98] sm:$0xff] %vm394_vm4, %v2527_v56 }
 0x220   : > { %v2693_v1 = vadd.f32 %v2692_v45, %v2687_v41  ;;  %v2757_v32 = vrot.slane %v2752_v22, 4  ;;  %2786 = vst.msk [vmem:[%s4309_s30 + $0x48] sm:$0xf] %vm2767_vm6, %v2586_v63 }
 0x222   : > { %v2694_v31 = vrot.slane %v2693_v1, 2  ;;  %v2758_v62 = vadd.f32 %v2757_v32, %v2752_v22 }
 0x224   : > { %v2695_v0 = vadd.f32 %v2694_v31, %v2693_v1  ;;  %v2759_v42 = vrot.slane %v2758_v62, 2 }
 0x225   : > { %v2567_v54 = vld [vmem:[#allocation2 + $0x98] sm:$0xff] }
 0x226   : > { %v2696_v4 = vrot.slane %v2695_v0, 1  ;;  %v2760_v7 = vadd.f32 %v2759_v42, %v2758_v62  ;;  %v2587_v60 = vpack.c.bf16 %v2567_v54, %v2567_v54 }
 0x228   : > { %v2761_v12 = vrot.slane %v2760_v7, 1  ;;  %2787 = vst.msk [vmem:[%s4309_s30 + $0x4c] sm:$0xf] %vm2767_vm6, %v2587_v60  ;;  %v2697_v52 = vadd.f32 %v2696_v4, %v2695_v0 }
 0x22a   : > { %v2762_v61 = vadd.f32 %v2761_v12, %v2760_v7 }
 0x22c   : > { %v2764_v2 = vsel %vm2763_vm8, %v2697_v52, %v2762_v61 }
 0x22d   : > { %2766 = vst.msk [vmem:[%s227_s9] sm:$0x3] %vm2765_vm9, %v2764_v2 }
 0x22e PF: > { %s14_s16 = sadd.s32 1, %s3577_s16   ;;  %s4586_s12 = smov %s3569_s14 }
 0x22f   : > { %p11_p7 = scmp.ge.s32.totalorder %s14_s16, 6   ;;  %s4587_s13 = smov %s3573_s15 }
 0x230   : > { %s4588_s14 = smov %s4591_s17  ;;  %s4589_s15 = smov %s4595_s18 }
 0x231   :  { %13 = sbr.rel (!%p11_p7) target bundleno = 3 (0x3), region = 78 }

// kernel: down_unet_2d_block.4
= control target key start
LH: loop header
LB: loop body
LE: loop exit
PB: predicated region body
PF: predicated region fallthrough
CT: control target
= control target key end

     0   :  { %s3447_s18 = smov 0   ;;  %s3449_s19 = smov 0   ;;  %s4262_s0 = inlined_call_operand.vmem [shape: bf16[2,2,162,8], index: 0, kind: input, shape index: {}]   ;;  %s4263_s1 = inlined_call_operand.vmem [shape: bf16[9,8,8], index: 1, kind: input, shape index: {}]   ;;  %s4264_s2 = inlined_call_operand.vmem [shape: f32[1,8], index: 2, kind: input, shape index: {}]   ;;  %s4265_s3 = inlined_call_operand.vmem [shape: f32[1,8], index: 3, kind: input, shape index: {}]   ;;  %s4266_s4 = inlined_call_operand.vmem [shape: bf16[2,2,128,8], index: 4, kind: output, shape index: {0}]   ;;  %s4267_s5 = inlined_call_operand.vmem [shape: f32[2,2,2,8], index: 5, kind: output, shape index: {1}]  }
   0x1   :  { %s3451_s20 = smov 0   ;;  %s3453_s21 = smov 0  }
   0x2   :  { %s3455_s22 = smov 0  }
   0x3 LB: > { %s25_s23 = sadd.s32 1, %s3407_s20  ;;  %s28_s24 = sadd.s32 1, %s3411_s21  ;;  %s3415_s22 = sphi %s3455_s22, %s16_s22   ;;  %s3411_s21 = sphi %s3453_s21, %s4295_s21   ;;  %s3407_s20 = sphi %s3451_s20, %s4294_s20   ;;  %s3403_s19 = sphi %s3449_s19, %s4293_s19   ;;  %s3399_s18 = sphi %s3447_s18, %s4292_s18  }
   0x4   : > { %p26_p0 = scmp.ge.s32.totalorder %s25_s23, 2  ;;  %p2827_p1 = scmp.ge.s32.totalorder %s3415_s22, 1 }
   0x5   : > { %p212_p2 = scmp.lt.s32.totalorder %s3415_s22, 5 }
   0x6   : > { %s4297_s23 = smov (%p26_p0, %s25_s23), 0  ;;  %s4299_s24 = smov (!%p26_p0, %s28_s24), %s3411_s21 }
   0x7   : > { %p213_p3 = pnand %p2827_p1, %p212_p2  ;;  %p30_p4 = scmp.ge.s32.totalorder %s4299_s24, 2 }
   0x8   : > { %p256_p5 = scmp.lt.s32.totalorder (!%p213_p3), %s3403_s19, 1  ;;  %p258_p6 = scmp.lt.s32.totalorder (!%p213_p3), %s3399_s18, 1 }
   0x9   : > { %s4301_s24 = smov (%p30_p4, %s4299_s24), 0  ;;  %216 = sbr.rel (%p213_p3) target bundleno = 516 (0x204), region = 36 }
   0xa   : > { %s2834_s27 = sshll.u32 (!%p213_p3), %s3399_s18, 3 }
   0xb   : > { %s2835_s9 = sadd.s32 (!%p213_p3), 4294967295, %s2834_s27 }
   0xc   : > { %s2836_s26 = sshll.u32 (!%p213_p3), %s2835_s9, 4 }
   0xe   : > { %v629_v0 = vld [vmem:[%s4263_s1] sm:$0xf]  ;;  %vm695_vm0 = vcmask 1043456   ;;  %v286_v1 = vlaneseq  ;;  %s4303_s19 = smov (!%p256_p5, %s3403_s19), 1  ;;  %s4305_s18 = smov (!%p258_p6, %s3399_s18), 1  ;;  %v3531_v20 = vstv %s2836_s26  ;;  %vm590_vm1 = vcmask 60416  }
   0xf   : > { %v697_v2 = vsel %vm695_vm0, %v629_v0, 0  ;;  %v2877_v4 = vld [vmem:[%s4263_s1 + $0x4] sm:$0xf]  ;;  %v2918_v5 = vld [vmem:[%s4263_s1 + $0x8] sm:$0xf]  ;;  %s3332_s7 = smul.u32 42, %s4303_s19 }
  0x10   : > { %3328 = vmatpush.bf16.msra.mxu1 %v697_v2  ;;  %3329 = vmatpush.bf16.msra.mxu2 %v697_v2  ;;  %v3490_v3 = vshrl.u32 %v286_v1, 7  ;;  %s3331_s8 = smul.u32 21, %s4305_s18  ;;  %v920_v6 = vsel %vm695_vm0, %v2877_v4, 0  ;;  %v1124_v7 = vsel %vm695_vm0, %v2918_v5, 0  ;;  %v2959_v10 = vld [vmem:[%s4263_s1 + $0xc] sm:$0xf] }
  0x11   : > { %3330 = vmatpush.bf16.msra.mxu3 %v697_v2  ;;  %706 = vmatpush.bf16.msra.mxu0 %v697_v2  ;;  %v3510_v11 = vld [vmem:[%s4264_s2] ss:$0 sm:$0xff]  ;;  %v1306_v15 = vsel %vm695_vm0, %v2959_v10, 0  ;;  %s2830_s26 = sshll.u32 %s4303_s19, 5 }
  0x12   : > { %s262_s10 = sadd.s32 %s3332_s7, %s3331_s8  ;;  %v291_v8 = vadd.s32 32, %v3490_v3  ;;  %v292_v9 = vadd.s32 40, %v3490_v3  ;;  %v295_v12 = vadd.s32 64, %v3490_v3  ;;  %v296_v13 = vadd.s32 72, %v3490_v3  ;;  %v3549_v30 = vld [vmem:[%s4265_s3] ss:$0 sm:$0xff] }
  0x13   : > { %s2828_s13 = sshll.u32 %s262_s10, 2  ;;  %v299_v14 = vadd.s32 96, %v3490_v3  ;;  %v300_v16 = vadd.s32 104, %v3490_v3  ;;  %v3523_v17 = vadd.s32 48, %v3490_v3  ;;  %v3526_v18 = vadd.s32 56, %v3490_v3  ;;  %s2832_s7 = sshll.u32 %s4303_s19, 1 }
  0x14   : > { %929 = vmatpush.bf16.msrb.mxu1 %v920_v6  ;;  %1133 = vmatpush.bf16.msrb.mxu2 %v1124_v7  ;;  %s3519_s25 = scalar_lea.vmem %s4262_s0, %s2828_s13  ;;  %v3529_v19 = vadd.s32 80, %v3490_v3  ;;  %v3536_v23 = vadd.s32 88, %v3490_v3  ;;  %v3539_v24 = vadd.s32 8, %v3490_v3  ;;  %v3542_v25 = vadd.s32 112, %v3490_v3  ;;  %s279_s8 = sadd.s32 %s2832_s7, %s4305_s18 }
  0x15   : > { %1315 = vmatpush.bf16.msrb.mxu3 %v1306_v15  ;;  %v3320_v21 = vld [vmem:[%s3519_s25 + $0x10] sm:$0xff]   ;;  %v3322_v22 = vld [vmem:[%s3519_s25 + $0x20] sm:$0xff]   ;;  %v313_v26 = vadd.s32 %v3531_v20, %v291_v8  ;;  %v314_v27 = vadd.s32 %v3531_v20, %v292_v9  ;;  %v317_v31 = vadd.s32 %v3531_v20, %v295_v12  ;;  %v318_v32 = vadd.s32 %v3531_v20, %v296_v13  ;;  %v3321_v59 = vld [vmem:[%s3519_s25 + $0x18] sm:$0xff]   ;;  %s2833_s9 = sshll.u32 %s279_s8, 1 }
  0x16   : > { %v3289_v28 = vunpack.c.l.bf16 %v3320_v21  ;;  %v3290_v29 = vunpack.c.h.bf16 %v3320_v21  ;;  %v3297_v33 = vunpack.c.l.bf16 %v3322_v22  ;;  %v3298_v34 = vunpack.c.h.bf16 %v3322_v22  ;;  %v3324_v37 = vld [vmem:[%s3519_s25 + $0x30] sm:$0xff]   ;;  %v3323_v21 = vld [vmem:[%s3519_s25 + $0x28] sm:$0xff]   ;;  %v3325_v46 = vld [vmem:[%s3519_s25 + $0x38] sm:$0xff]   ;;  %s281_s12 = scalar_lea.vmem %s4267_s5, %s2833_s9 }
  0x17   : > { %vm334_vm2 = vcmp.ge.s32.totalorder %v313_v26, 0  ;;  %vm335_vm3 = vcmp.ge.s32.totalorder %v314_v27, 0  ;;  %vm355_vm4 = vcmp.lt.s32.totalorder %v313_v26, 256  ;;  %vm356_vm5 = vcmp.lt.s32.totalorder %v314_v27, 256  ;;  %v3280_v26 = vld [vmem:[%s3519_s25] sm:$0xff]  }
  0x18   : > { %v443_v35 = vmul.f32 %v3510_v11, %v3289_v28  ;;  %v444_v36 = vmul.f32 %v3510_v11, %v3290_v29  ;;  %vm338_vm6 = vcmp.ge.s32.totalorder %v317_v31, 0  ;;  %vm339_vm7 = vcmp.ge.s32.totalorder %v318_v32, 0  ;;  %vm3556_vm8 = vmand %vm334_vm2, %vm355_vm4 }
  0x19   : > { %vm359_vm9 = vcmp.lt.s32.totalorder %v317_v31, 256  ;;  %vm360_vm10 = vcmp.lt.s32.totalorder %v318_v32, 256  ;;  %v447_v39 = vmul.f32 %v3510_v11, %v3297_v33  ;;  %v448_v40 = vmul.f32 %v3510_v11, %v3298_v34  ;;  %vm3562_vm11 = vmand %vm335_vm3, %vm356_vm5 }
  0x1a   : > { %v468_v42 = vadd.f32 %v3549_v30, %v443_v35  ;;  %v469_v43 = vadd.f32 %v3549_v30, %v444_v36  ;;  %v321_v44 = vadd.s32 %v3531_v20, %v299_v14  ;;  %v322_v45 = vadd.s32 %v3531_v20, %v300_v16  ;;  %vm3570_vm12 = vmand %vm338_vm6, %vm359_vm9 }
  0x1b   : > { %v472_v47 = vadd.f32 %v3549_v30, %v447_v39  ;;  %v473_v48 = vadd.f32 %v3549_v30, %v448_v40  ;;  %v3305_v49 = vunpack.c.l.bf16 %v3324_v37  ;;  %v3306_v50 = vunpack.c.h.bf16 %v3324_v37  ;;  %vm381_vm13 = vmand %vm339_vm7, %vm360_vm10 }
  0x1c   : > { %v489_v51 = vmax.f32 %v468_v42, 0.0  ;;  %v490_v52 = vmax.f32 %v469_v43, 0.0  ;;  %vm342_vm14 = vcmp.ge.s32.totalorder %v321_v44, 0  ;;  %vm343_vm15 = vcmp.ge.s32.totalorder %v322_v45, 0 }
  0x1d   : > { %v493_v53 = vmax.f32 %v472_v47, 0.0  ;;  %v494_v54 = vmax.f32 %v473_v48, 0.0  ;;  %vm363_vm2 = vcmp.lt.s32.totalorder %v321_v44, 256  ;;  %vm364_vm3 = vcmp.lt.s32.totalorder %v322_v45, 256 }
  0x1e   : > { %v552_v55 = vsel %vm3556_vm8, %v489_v51, 0.0  ;;  %v553_v56 = vsel %vm3562_vm11, %v490_v52, 0.0  ;;  %v451_v57 = vmul.f32 %v3510_v11, %v3305_v49  ;;  %v452_v58 = vmul.f32 %v3510_v11, %v3306_v50  ;;  %vm3588_vm5 = vmand %vm342_vm14, %vm363_vm2 }
  0x1f   : > { %v573_v60 = vpack.c.bf16 %v552_v55, %v552_v55  ;;  %v574_v61 = vpack.c.bf16 %v553_v56, %v553_v56  ;;  %v556_v62 = vsel %vm3570_vm12, %v493_v53, 0.0  ;;  %v557_v63 = vsel %vm381_vm13, %v494_v54, 0.0  ;;  %vm3597_vm6 = vmand %vm343_vm15, %vm364_vm3 }
  0x20   : > { %vm670_vm4 = vcmask 64512   ;;  %v577_v0 = vpack.c.bf16 %v556_v62, %v556_v62  ;;  %v578_v1 = vpack.c.bf16 %v557_v63, %v557_v63  ;;  %v476_v4 = vadd.f32 %v3549_v30, %v451_v57  ;;  %v3000_v63 = vld [vmem:[%s4263_s1 + $0x10] sm:$0xf] }
  0x21   : > { %v477_v5 = vadd.f32 %v3549_v30, %v452_v58  ;;  %595 = vst.msk [vmem:[#allocation3 + $0x10] sm:$0xf] %vm590_vm1, %v573_v60  ;;  %v315_v7 = vadd.s32 %v3531_v20, %v3523_v17  ;;  %v316_v8 = vadd.s32 %v3531_v20, %v3526_v18  ;;  %v3293_v9 = vunpack.c.l.bf16 %v3321_v59 }
  0x22   : > { %v3294_v10 = vunpack.c.h.bf16 %v3321_v59  ;;  %596 = vst.msk [vmem:[#allocation3 + $0x14] sm:$0xf] %vm590_vm1, %v574_v61  ;;  %v497_v12 = vmax.f32 %v476_v4, 0.0  ;;  %v319_v14 = vadd.s32 %v3531_v20, %v3529_v19  ;;  %v320_v15 = vadd.s32 %v3531_v20, %v3536_v23  ;;  %v3319_v4 = vld [vmem:[%s3519_s25 + $0x8] sm:$0xff]  }
  0x23   : > { %v498_v13 = vmax.f32 %v477_v5, 0.0  ;;  %599 = vst.msk [vmem:[#allocation3 + $0x20] sm:$0xf] %vm590_vm1, %v577_v0  ;;  %vm336_vm7 = vcmp.ge.s32.totalorder %v315_v7, 0  ;;  %vm337_vm8 = vcmp.ge.s32.totalorder %v316_v8, 0  ;;  %vm357_vm9 = vcmp.lt.s32.totalorder %v315_v7, 256 }
  0x24   : > { %vm358_vm10 = vcmp.lt.s32.totalorder %v316_v8, 256  ;;  %600 = vst.msk [vmem:[#allocation3 + $0x24] sm:$0xf] %vm590_vm1, %v578_v1  ;;  %v560_v16 = vsel %vm3588_vm5, %v497_v12, 0.0  ;;  %v445_v18 = vmul.f32 %v3510_v11, %v3293_v9  ;;  %v446_v19 = vmul.f32 %v3510_v11, %v3294_v10  ;;  %vm3622_vm12 = vmand %vm336_vm7, %vm357_vm9 }
  0x25   : > { %v561_v17 = vsel %vm3597_vm6, %v498_v13, 0.0  ;;  %v581_v22 = vpack.c.bf16 %v560_v16, %v560_v16  ;;  %vm340_vm11 = vcmp.ge.s32.totalorder %v319_v14, 0  ;;  %v302_v27 = vadd.s32 120, %v3490_v3  ;;  %vm3631_vm15 = vmand %vm337_vm8, %vm358_vm10 }
  0x26   : > { %v582_v23 = vpack.c.bf16 %v561_v17, %v561_v17  ;;  %v470_v29 = vadd.f32 %v3549_v30, %v445_v18  ;;  %v471_v31 = vadd.f32 %v3549_v30, %v446_v19  ;;  %vm341_vm13 = vcmp.ge.s32.totalorder %v320_v15, 0 }
  0x27   : > { %vm361_vm14 = vcmp.lt.s32.totalorder %v319_v14, 256  ;;  %603 = vst.msk [vmem:[#allocation3 + $0x30] sm:$0xf] %vm590_vm1, %v581_v22  ;;  %v3301_v33 = vunpack.c.l.bf16 %v3323_v21  ;;  %v3302_v34 = vunpack.c.h.bf16 %v3323_v21  ;;  %v309_v35 = vadd.s32 %v3531_v20, %v3490_v3 }
  0x28   : > { %v310_v36 = vadd.s32 %v3531_v20, %v3539_v24  ;;  %604 = vst.msk [vmem:[#allocation3 + $0x34] sm:$0xf] %vm590_vm1, %v582_v23  ;;  %v491_v37 = vmax.f32 %v470_v29, 0.0  ;;  %v492_v38 = vmax.f32 %v471_v31, 0.0  ;;  %v3281_v39 = vunpack.c.l.bf16 %v3280_v26  ;;  %vm3650_vm7 = vmand %vm340_vm11, %vm361_vm14  ;;  %v3041_v31 = vld [vmem:[%s4263_s1 + $0x14] sm:$0xf] }
  0x29   : > { %v3282_v40 = vunpack.c.h.bf16 %v3280_v26  ;;  %v3209_v41 = vld [vmem:[#allocation3 + $0x10] sm:$0xff]  ;;  %vm362_vm2 = vcmp.lt.s32.totalorder %v320_v15, 256  ;;  %v449_v42 = vmul.f32 %v3510_v11, %v3301_v33  ;;  %v450_v43 = vmul.f32 %v3510_v11, %v3302_v34  ;;  %v3082_v34 = vld [vmem:[%s4263_s1 + $0x18] sm:$0xf] }
  0x2a   : > { %vm330_vm3 = vcmp.ge.s32.totalorder %v309_v35, 0  ;;  %v554_v44 = vsel %vm3622_vm12, %v491_v37, 0.0  ;;  %v555_v45 = vsel %vm3631_vm15, %v492_v38, 0.0  ;;  %vm331_vm5 = vcmp.ge.s32.totalorder %v310_v36, 0  ;;  %2871 = vmatmul.msk.bf16.vlgmr.msra.gmra.mxu1 %vm670_vm4, %v3209_v41  ;;  %vm3658_vm8 = vmand %vm341_vm13, %vm362_vm2 }
  0x2b   : > { %vm351_vm6 = vcmp.lt.s32.totalorder %v309_v35, 256  ;;  %v3211_v47 = vld [vmem:[#allocation3 + $0x20] sm:$0xff]  ;;  %v575_v48 = vpack.c.bf16 %v554_v44, %v554_v44  ;;  %v576_v49 = vpack.c.bf16 %v555_v45, %v555_v45  ;;  %v474_v51 = vadd.f32 %v3549_v30, %v449_v42 }
  0x2c   : > { %v475_v52 = vadd.f32 %v3549_v30, %v450_v43  ;;  %vm352_vm9 = vcmp.lt.s32.totalorder %v310_v36, 256  ;;  %v439_v54 = vmul.f32 %v3510_v11, %v3281_v39  ;;  %v440_v55 = vmul.f32 %v3510_v11, %v3282_v40  ;;  %2873 = vmatmul.msk.bf16.vlgmr.msra.gmra.mxu2 %vm670_vm4, %v3211_v47  ;;  %vm3672_vm10 = vmand %vm330_vm3, %vm351_vm6  ;;  %v3123_v40 = vld [vmem:[%s4263_s1 + $0x1c] sm:$0xf] }
  0x2d   : > { %v323_v56 = vadd.s32 %v3531_v20, %v3542_v25  ;;  %597 = vst.msk [vmem:[#allocation3 + $0x18] sm:$0xf] %vm590_vm1, %v575_v48  ;;  %v495_v57 = vmax.f32 %v474_v51, 0.0  ;;  %v324_v59 = vadd.s32 %v3531_v20, %v302_v27  ;;  %v3309_v60 = vunpack.c.l.bf16 %v3325_v46  ;;  %vm373_vm13 = vmand %vm331_vm5, %vm352_vm9 }
  0x2e   : > { %v496_v58 = vmax.f32 %v475_v52, 0.0  ;;  %598 = vst.msk [vmem:[#allocation3 + $0x1c] sm:$0xf] %vm590_vm1, %v576_v49  ;;  %v464_v25 = vadd.f32 %v3549_v30, %v439_v54  ;;  %v465_v62 = vadd.f32 %v3549_v30, %v440_v55  ;;  %v3310_v9 = vunpack.c.h.bf16 %v3325_v46 }
  0x2f   : > { %vm344_vm11 = vcmp.ge.s32.totalorder %v323_v56, 0  ;;  %vm365_vm12 = vcmp.lt.s32.totalorder %v323_v56, 256  ;;  %v3213_v0 = vld [vmem:[#allocation3 + $0x30] sm:$0xff]  ;;  %v558_v1 = vsel %vm3650_vm7, %v495_v57, 0.0  ;;  %vm345_vm14 = vcmp.ge.s32.totalorder %v324_v59, 0 }
  0x30   : > { %v559_v2 = vsel %vm3658_vm8, %v496_v58, 0.0  ;;  %vm366_vm15 = vcmp.lt.s32.totalorder %v324_v59, 256  ;;  %v579_v5 = vpack.c.bf16 %v558_v1, %v558_v1  ;;  %v485_v7 = vmax.f32 %v464_v25, 0.0  ;;  %2875 = vmatmul.msk.bf16.vlgmr.msra.gmra.mxu3 %vm670_vm4, %v3213_v0  ;;  %vm3701_vm2 = vmand %vm344_vm11, %vm365_vm12  ;;  %v3164_v0 = vld [vmem:[%s4263_s1 + $0x20] sm:$0xf] }
  0x31   : > { %v580_v6 = vpack.c.bf16 %v559_v2, %v559_v2  ;;  %v486_v8 = vmax.f32 %v465_v62, 0.0  ;;  %v453_v10 = vmul.f32 %v3510_v11, %v3309_v60  ;;  %v1560_v12 = vsel %vm695_vm0, %v3000_v63, 0  ;;  %vm387_vm3 = vmand %vm345_vm14, %vm366_vm15 }
  0x32   : > { %v289_v13 = vadd.s32 16, %v3490_v3  ;;  %601 = vst.msk [vmem:[#allocation3 + $0x28] sm:$0xf] %vm590_vm1, %v579_v5  ;;  %v548_v14 = vsel %vm3672_vm10, %v485_v7, 0.0  ;;  %1569 = vmatpush.bf16.msrb.mxu0 %v1560_v12  ;;  %v290_v16 = vadd.s32 24, %v3490_v3  ;;  %v3285_v17 = vunpack.c.l.bf16 %v3319_v4 }
  0x33   : > { %v549_v15 = vsel %vm373_vm13, %v486_v8, 0.0  ;;  %602 = vst.msk [vmem:[#allocation3 + $0x2c] sm:$0xf] %vm590_vm1, %v580_v6  ;;  %v569_v18 = vpack.c.bf16 %v548_v14, %v548_v14  ;;  %v454_v21 = vmul.f32 %v3510_v11, %v3310_v9  ;;  %v478_v22 = vadd.f32 %v3549_v30, %v453_v10 }
  0x34   : > { %v570_v19 = vpack.c.bf16 %v549_v15, %v549_v15  ;;  %v311_v26 = vadd.s32 %v3531_v20, %v289_v13  ;;  %v312_v27 = vadd.s32 %v3531_v20, %v290_v16  ;;  %v3286_v28 = vunpack.c.h.bf16 %v3319_v4  ;;  %v3217_v15 = vld [vmem:[#allocation3 + $0x10] sm:$0xff] }
  0x35   : > { %v441_v29 = vmul.f32 %v3510_v11, %v3285_v17  ;;  %591 = vst.msk [vmem:[#allocation3] sm:$0xf] %vm590_vm1, %v569_v18  ;;  %v479_v32 = vadd.f32 %v3549_v30, %v454_v21  ;;  %v499_v33 = vmax.f32 %v478_v22, 0.0  ;;  %v3210_v35 = vld [vmem:[#allocation3 + $0x18] sm:$0xff]  ;;  %v1763_v43 = vsel %vm695_vm0, %v3041_v31, 0  ;;  %v3240_v16 = vld [vmem:[#allocation3 + $0x10] sm:$0xff] }
  0x36   : > { %592 = vst.msk [vmem:[#allocation3 + $0x4] sm:$0xf] %vm590_vm1, %v570_v19  ;;  %vm332_vm5 = vcmp.ge.s32.totalorder %v311_v26, 0  ;;  %vm333_vm6 = vcmp.ge.s32.totalorder %v312_v27, 0  ;;  %vm353_vm7 = vcmp.lt.s32.totalorder %v311_v26, 256  ;;  %vm354_vm8 = vcmp.lt.s32.totalorder %v312_v27, 256  ;;  %1772 = vmatpush.bf16.msra.mxu1 %v1763_v43 }
  0x37   : > { %v500_v36 = vmax.f32 %v479_v32, 0.0  ;;  %v562_v37 = vsel %vm3701_vm2, %v499_v33, 0.0  ;;  %v442_v38 = vmul.f32 %v3510_v11, %v3286_v28  ;;  %v466_v39 = vadd.f32 %v3549_v30, %v441_v29  ;;  %vm3726_vm9 = vmand %vm332_vm5, %vm353_vm7  ;;  %v3225_v19 = vld [vmem:[#allocation3 + $0x10] sm:$0xff] }
  0x38   : > { %v583_v41 = vpack.c.bf16 %v562_v37, %v562_v37  ;;  %v1945_v44 = vsel %vm695_vm0, %v3082_v34, 0  ;;  %v2199_v48 = vsel %vm695_vm0, %v3123_v40, 0  ;;  %vm375_vm10 = vmand %vm333_vm6, %vm354_vm8  ;;  %v2402_v1 = vsel %vm695_vm0, %v3164_v0, 0  ;;  %v3218_v37 = vld [vmem:[#allocation3 + $0x18] sm:$0xff] }
  0x39   : > { %v563_v45 = vsel %vm387_vm3, %v500_v36, 0.0  ;;  %v467_v46 = vadd.f32 %v3549_v30, %v442_v38  ;;  %v487_v47 = vmax.f32 %v466_v39, 0.0  ;;  %1954 = vmatpush.bf16.msra.mxu2 %v1945_v44  ;;  %2208 = vmatpush.bf16.msra.mxu3 %v2199_v48  ;;  %vm1081_vm11 = vcmask 1046528   ;;  %v3241_v38 = vld [vmem:[#allocation3 + $0x18] sm:$0xff]  ;;  %v3232_v39 = vld [vmem:[#allocation3 + $0x10] sm:$0xff] }
  0x3a   : > { %v3212_v49 = vld [vmem:[#allocation3 + $0x28] sm:$0xff]  ;;  %v584_v50 = vpack.c.bf16 %v563_v45, %v563_v45  ;;  %605 = vst.msk [vmem:[#allocation3 + $0x38] sm:$0xf] %vm590_vm1, %v583_v41  ;;  %2872 = vmatmul.msk.bf16.gmra.mxu1 %vm670_vm4, %v3210_v35  ;;  %vm826_vm12 = vsmask.f32 7424  ;;  %v843_v22 = vshll.u32 %v3217_v15, 16 }
  0x3b   : > { %v488_v51 = vmax.f32 %v467_v46, 0.0  ;;  %v550_v52 = vsel %vm3726_vm9, %v487_v47, 0.0  ;;  %v1475_v27 = vshll.u32 %v3240_v16, 16  ;;  %v1085_v28 = vrot.slane %v3225_v19, 1  ;;  %v3226_v40 = vld [vmem:[#allocation3 + $0x18] sm:$0xff] }
  0x3c   : > { %606 = vst.msk [vmem:[#allocation3 + $0x3c] sm:$0xf] %vm590_vm1, %v584_v50  ;;  %v571_v53 = vpack.c.bf16 %v550_v52, %v550_v52  ;;  %2874 = vmatmul.msk.bf16.gmra.mxu2 %vm670_vm4, %v3212_v49  ;;  %v2921_v58 = vld [vmem:[#allocation3] sm:$0xe]  ;;  %v845_v31 = vrot.slane %v843_v22, 1  ;;  %v847_v41 = vshrl.u32 %v3217_v15, 16 }
  0x3d   : > { %v3207_v54 = vld [vmem:[#allocation3] sm:$0xff]  ;;  %v551_v55 = vsel %vm375_vm10, %v488_v51, 0.0  ;;  %v1477_v33 = vrot.slane %v1475_v27, 1  ;;  %v851_v42 = vshll.u32 %v3218_v37, 16  ;;  %v1479_v43 = vshrl.u32 %v3240_v16, 16 }
  0x3e   : > { %v3215_v56 = vld [vmem:[#allocation3] sm:$0xff]  ;;  %v572_v57 = vpack.c.bf16 %v551_v55, %v551_v55  ;;  %593 = vst.msk [vmem:[#allocation3 + $0x8] sm:$0xf] %vm590_vm1, %v571_v53  ;;  %2869 = vmatmul.msk.bf16.vlgmr.msra.gmra.mxu0 %vm670_vm4, %v3207_v54  ;;  %v1483_v44 = vshll.u32 %v3241_v38, 16  ;;  %v1087_v45 = vrot.slane %v3226_v40, 1  ;;  %v849_v46 = vor.u32 %v847_v41, %v845_v31  ;;  %v3233_v55 = vld [vmem:[#allocation3 + $0x18] sm:$0xff] }
  0x3f   : > { %v3223_v59 = vld [vmem:[#allocation3] sm:$0xf0]  ;;  %v830_v60 = vshll.u32 %v3215_v56, 16  ;;  %v828_v62 = vshrl.u32 %v3215_v56, 16  ;;  %2411 = vmatpush.bf16.msra.mxu0 %v2402_v1  ;;  %v853_v47 = vrot.slane %v851_v42, 1  ;;  %v1481_v48 = vor.u32 %v1479_v43, %v1477_v33  ;;  %v3235_v42 = vld [vmem:[#allocation3 + $0x28] sm:$0xff] }
  0x40   : > { %594 = vst.msk [vmem:[#allocation3 + $0xc] sm:$0xf] %vm590_vm1, %v572_v57  ;;  %v2922_v25 = vor.u32 %v3223_v59, %v2921_v58  ;;  %v1485_v49 = vrot.slane %v1483_v44, 1  ;;  %v1088_v50 = vsel %vm1081_vm11, %v1085_v28, %v1087_v45  ;;  %v3219_v53 = vld [vmem:[#allocation3 + $0x20] sm:$0xff]  ;;  %v855_v57 = vshrl.u32 %v3218_v37, 16  ;;  %v3229_v43 = vld [vmem:[#allocation3 + $0x30] sm:$0xff] }
  0x41   : > { %v832_v63 = vrot.slane %v830_v60, 1  ;;  %v854_v51 = vsel %vm826_vm12, %v849_v46, %v853_v47  ;;  %v3242_v54 = vld [vmem:[#allocation3 + $0x20] sm:$0xff]  ;;  %v859_v58 = vshll.u32 %v3219_v53, 16  ;;  %v1487_v59 = vshrl.u32 %v3241_v38, 16  ;;  %v3221_v38 = vld [vmem:[#allocation3 + $0x30] sm:$0xff] }
  0x42   : > { %v1082_v5 = vrot.slane %v2922_v25, 1  ;;  %v1486_v52 = vsel %vm826_vm12, %v1481_v48, %v1485_v49  ;;  %v3227_v56 = vld [vmem:[#allocation3 + $0x20] sm:$0xff]  ;;  %v1491_v60 = vshll.u32 %v3242_v54, 16  ;;  %v857_v25 = vor.u32 %v855_v57, %v853_v47 }
  0x43   : > { %v3214_v61 = vld [vmem:[#allocation3 + $0x38] sm:$0xff]  ;;  %v833_v6 = vor.u32 %v832_v63, %v828_v62  ;;  %v861_v62 = vrot.slane %v859_v58, 1  ;;  %v1489_v63 = vor.u32 %v1487_v59, %v1485_v49  ;;  %v303_v16 = vadd.s32 128, %v3490_v3 }
  0x44   : > { %2876 = vmatmul.msk.bf16.gmra.mxu3 %vm670_vm4, %v3214_v61  ;;  %v1089_v61 = vrot.slane %v3227_v56, 1  ;;  %v1493_v0 = vrot.slane %v1491_v60, 1  ;;  %v3796_v56 = vld [vmem:[%s3519_s25 + $0x48] sm:$0xff]   ;;  %v305_v60 = vadd.s32 144, %v3490_v3 }
  0x45   : > { %v325_v22 = vadd.s32 %v3531_v20, %v303_v16  ;;  %v3317_v57 = vunpack.c.l.bf16 %v3796_v56 }
  0x46   : > { %v1090_v1 = vsel %vm1081_vm11, %v1087_v45, %v1089_v61  ;;  %v875_v45 = vshll.u32 %v3221_v38, 16 }
  0x47   : > { %v3216_v2 = vld [vmem:[#allocation3 + $0x8] sm:$0xff]  ;;  %vm346_vm0 = vcmp.ge.s32.totalorder %v325_v22, 0  ;;  %vm367_vm13 = vcmp.lt.s32.totalorder %v325_v22, 256 }
  0x48   : > { %v3224_v4 = vld [vmem:[#allocation3 + $0x8] sm:$0xff]  ;;  %v835_v7 = vshll.u32 %v3216_v2, 16  ;;  %v839_v21 = vshrl.u32 %v3216_v2, 16  ;;  %v862_v2 = vsel %vm826_vm12, %v857_v25, %v861_v62  ;;  %vm388_vm14 = vmand %vm346_vm0, %vm367_vm13 }
  0x49   : > { %v1083_v8 = vrot.slane %v3224_v4, 1  ;;  %v3208_v12 = vld [vmem:[#allocation3 + $0x8] sm:$0xff]  ;;  %v1494_v4 = vsel %vm826_vm12, %v1489_v63, %v1493_v0 }
  0x4a   : > { %v837_v9 = vrot.slane %v835_v7, 1  ;;  %v3239_v13 = vld [vmem:[#allocation3 + $0x8] sm:$0xff]  ;;  %v3234_v7 = vld [vmem:[#allocation3 + $0x20] sm:$0xff] }
  0x4b   : > { %v1084_v10 = vsel %vm1081_vm11, %v1082_v5, %v1083_v8  ;;  %v1470_v17 = vshll.u32 %v3239_v13, 16  ;;  %v3231_v18 = vld [vmem:[#allocation3 + $0x8] sm:$0xff]  ;;  %v1468_v23 = vshrl.u32 %v3239_v13, 16  ;;  %v1086_v34 = vsel %vm1081_vm11, %v1083_v8, %v1085_v28 }
  0x4c   : > { %v838_v14 = vsel %vm826_vm12, %v833_v6, %v837_v9  ;;  %2951 = vmatmul.msk.bf16.vlgmr.msrb.gmra.mxu2 %vm670_vm4, %v1084_v10  ;;  %v841_v29 = vor.u32 %v839_v21, %v837_v9  ;;  %v3220_v5 = vld [vmem:[#allocation3 + $0x28] sm:$0xff]  ;;  %v3326_v9 = vld [vmem:[%s3519_s25 + $0x40] sm:$0xff]   ;;  %v863_v10 = vshrl.u32 %v3219_v53, 16  ;;  %v877_v53 = vrot.slane %v875_v45, 1 }
  0x4d   : > { %2910 = vmatmul.msk.bf16.vlgmr.msrb.gmra.mxu1 %vm670_vm4, %v838_v14  ;;  %v1472_v26 = vrot.slane %v1470_v17, 1  ;;  %v3243_v6 = vld [vmem:[#allocation3 + $0x28] sm:$0xff]  ;;  %v3313_v13 = vunpack.c.l.bf16 %v3326_v9  ;;  %v1495_v14 = vshrl.u32 %v3242_v54, 16  ;;  %v871_v44 = vshrl.u32 %v3220_v5, 16 }
  0x4e   : > { %2870 = vmatmul.msk.bf16.gmra.mxu0 %vm670_vm4, %v3208_v12  ;;  %v846_v35 = vsel %vm826_vm12, %v841_v29, %v845_v31  ;;  %v3228_v8 = vld [vmem:[#allocation3 + $0x28] sm:$0xff]  ;;  %v867_v12 = vshll.u32 %v3220_v5, 16  ;;  %v1499_v15 = vshll.u32 %v3243_v6, 16  ;;  %v865_v19 = vor.u32 %v863_v10, %v861_v62  ;;  %v3230_v5 = vld [vmem:[#allocation3 + $0x38] sm:$0xff] }
  0x4f   : > { %v1473_v32 = vor.u32 %v1472_v26, %v1468_v23  ;;  %v455_v17 = vmul.f32 %v3510_v11, %v3313_v13  ;;  %v1497_v26 = vor.u32 %v1495_v14, %v1493_v0  ;;  %v1503_v47 = vshrl.u32 %v3243_v6, 16  ;;  %v3222_v0 = vld [vmem:[#allocation3 + $0x38] sm:$0xff] }
  0x50   : > { %v869_v21 = vrot.slane %v867_v12, 1  ;;  %v1501_v27 = vrot.slane %v1499_v15, 1  ;;  %v327_v62 = vadd.s32 %v3531_v20, %v305_v60  ;;  %v3263_v60 = vld [vmem:[#allocation3 + $0x10] sm:$0xff] }
  0x51   : > { %v1478_v36 = vsel %vm826_vm12, %v1473_v32, %v1477_v33  ;;  %v480_v23 = vadd.f32 %v3549_v30, %v455_v17 }
  0x52   : > { %v870_v31 = vsel %vm826_vm12, %v865_v19, %v869_v21  ;;  %v1502_v33 = vsel %vm826_vm12, %v1497_v26, %v1501_v27  ;;  %v1505_v54 = vor.u32 %v1503_v47, %v1501_v27  ;;  %vm348_vm5 = vcmp.ge.s32.totalorder %v327_v62, 0 }
  0x53   : > { %v501_v28 = vmax.f32 %v480_v23, 0.0  ;;  %vm369_vm6 = vcmp.lt.s32.totalorder %v327_v62, 256 }
  0x54   : > { %2992 = vmatmul.msk.bf16.vlgmr.msrb.gmra.mxu3 %vm670_vm4, %v3231_v18  ;;  %v1091_v18 = vrot.slane %v3228_v8, 1  ;;  %vm390_vm7 = vmand %vm348_vm5, %vm369_vm6  ;;  %v883_v8 = vshll.u32 %v3222_v0, 16 }
  0x55   : > { %v564_v32 = vsel %vm388_vm14, %v501_v28, 0.0 }
  0x56   : > { %v1092_v29 = vsel %vm1081_vm11, %v1089_v61, %v1091_v18  ;;  %v457_v61 = vmul.f32 %v3510_v11, %v3317_v57  ;;  %v885_v13 = vrot.slane %v883_v8, 1  ;;  %v3247_v57 = vld [vmem:[#allocation3 + $0x8] sm:$0xf0] }
  0x58   : > { %v482_v63 = vadd.f32 %v3549_v30, %v457_v61  ;;  %v3834_v61 = vld [vmem:[#allocation3 + $0x10] sm:$0xff] }
  0x5c   : > { %2952 = vmatmul.msk.bf16.gmra.mxu2 %vm670_vm4, %v1086_v34  ;;  %v585_v34 = vpack.c.bf16 %v564_v32, %v564_v32  ;;  %v3237_v32 = vld [vmem:[#allocation3 + $0x38] sm:$0xff] }
  0x5d   : > { %2911 = vmatmul.msk.bf16.gmra.mxu1 %vm670_vm4, %v846_v35  ;;  %v3314_v35 = vunpack.c.h.bf16 %v3326_v9 }
  0x5e   : > { %3033 = vmatmul.msk.bf16.vlgmr.msrb.gmra.mxu0 %vm670_vm4, %v1478_v36  ;;  %607 = vst.msk [vmem:[#allocation3 + $0x40] sm:$0xf] %vm590_vm1, %v585_v34  ;;  %v304_v36 = vadd.s32 136, %v3490_v3  ;;  %v887_v34 = vshrl.u32 %v3222_v0, 16 }
  0x5f   : > { %v456_v37 = vmul.f32 %v3510_v11, %v3314_v35 }
  0x60   : > { %v326_v40 = vadd.s32 %v3531_v20, %v304_v36 }
  0x61   : > { %v481_v41 = vadd.f32 %v3549_v30, %v456_v37  ;;  %v1095_v30 = vrot.slane %v3230_v5, 1 }
  0x62   : > { %vm347_vm15 = vcmp.ge.s32.totalorder %v326_v40, 0  ;;  %vm368_vm2 = vcmp.lt.s32.totalorder %v326_v40, 256  ;;  %v889_v40 = vor.u32 %v887_v34, %v885_v13 }
  0x63   : > { %vm389_vm3 = vmand %vm347_vm15, %vm368_vm2  ;;  %v502_v46 = vmax.f32 %v481_v41, 0.0  ;;  %vm611_vm15 = vcmask 57344  }
  0x64   : > { %2993 = vmatmul.msk.bf16.gmra.mxu3 %vm670_vm4, %v3232_v39  ;;  %v3244_v39 = vld [vmem:[#allocation3 + $0x30] sm:$0xff] }
  0x65   : > { %v1507_v48 = vshll.u32 %v3244_v39, 16  ;;  %v565_v49 = vsel %vm389_vm3, %v502_v46, 0.0  ;;  %v1511_v9 = vshrl.u32 %v3244_v39, 16  ;;  %v780_v17 = vld [vmem:[#allocation3 + $0x40] sm:$0x1] }
  0x66   : > { %v1035_v22 = vld [vmem:[#allocation3 + $0x40] sm:$0x1] }
  0x67   : > { %v1071_v26 = vunpack.c.l.b16 %v1035_v22 }
  0x6c   : > { %2953 = vmatmul.msk.bf16.gmra.mxu2 %vm670_vm4, %v1088_v50  ;;  %v1093_v50 = vrot.slane %v3229_v43, 1 }
  0x6d   : > { %2912 = vmatmul.msk.bf16.gmra.mxu1 %vm670_vm4, %v854_v51  ;;  %v586_v51 = vpack.c.bf16 %v565_v49, %v565_v49 }
  0x6e   : > { %3034 = vmatmul.msk.bf16.gmra.mxu0 %vm670_vm4, %v1486_v52  ;;  %v873_v52 = vor.u32 %v871_v44, %v869_v21  ;;  %v1094_v58 = vsel %vm1081_vm11, %v1091_v18, %v1093_v50  ;;  %v1096_v18 = vsel %vm1081_vm11, %v1093_v50, %v1095_v30  ;;  %v816_v21 = vunpack.c.l.b16 %v780_v17 }
  0x6f   : > { %608 = vst.msk [vmem:[#allocation3 + $0x44] sm:$0xf] %vm590_vm1, %v586_v51 }
  0x70   : > { %v878_v59 = vsel %vm826_vm12, %v873_v52, %v877_v53  ;;  %v825_v27 = vpack.c.b16 %v816_v21, %v816_v21 }
  0x72   : > { %v891_v35 = vshll.u32 %v825_v27, 16  ;;  %v3271_v27 = vld [vmem:[#allocation3 + $0x10] sm:$0xf0] }
  0x74   : > { %2994 = vmatmul.msk.bf16.gmra.mxu3 %vm670_vm4, %v3233_v55  ;;  %v1509_v55 = vrot.slane %v1507_v48, 1  ;;  %v893_v41 = vrot.slane %v891_v35, 1  ;;  %v3855_v35 = vld [vmem:[#allocation3 + $0x18] sm:$0xff] }
  0x76   : > { %v1510_v25 = vsel %vm826_vm12, %v1505_v54, %v1509_v55  ;;  %v1513_v15 = vor.u32 %v1511_v9, %v1509_v55  ;;  %v894_v48 = vsel %vm826_vm12, %v889_v40, %v893_v41  ;;  %v3044_v55 = vld [vmem:[#allocation3 + $0x8] sm:$0xe] }
  0x7c   : > { %2954 = vmatmul.msk.bf16.gmra.mxu2 %vm670_vm4, %v1090_v1  ;;  %v503_v1 = vmax.f32 %v482_v63, 0.0 }
  0x7d   : > { %2913 = vmatmul.msk.bf16.gmra.mxu1 %vm670_vm4, %v862_v2  ;;  %v3245_v2 = vld [vmem:[#allocation3 + $0x38] sm:$0xff] }
  0x7e   : > { %3035 = vmatmul.msk.bf16.gmra.mxu0 %vm670_vm4, %v1494_v4  ;;  %v3236_v4 = vld [vmem:[#allocation3 + $0x30] sm:$0xff]  ;;  %v566_v11 = vsel %vm390_vm7, %v503_v1, 0.0  ;;  %v1515_v10 = vshll.u32 %v3245_v2, 16  ;;  %v1519_v37 = vshrl.u32 %v3245_v2, 16  ;;  %v3838_v1 = vld [vmem:[#allocation3 + $0x18] sm:$0xff]  ;;  %v2109_v2 = vshll.u32 %v3263_v60, 16 }
  0x7f   : > { %v587_v6 = vpack.c.bf16 %v566_v11, %v566_v11  ;;  %v1722_v11 = vrot.slane %v3834_v61, 1 }
  0x80   : > { %v1517_v16 = vrot.slane %v1515_v10, 1  ;;  %v3255_v10 = vld [vmem:[#allocation3 + $0x10] sm:$0xff] }
  0x81   : > { %609 = vst.msk [vmem:[#allocation3 + $0x48] sm:$0xf] %vm590_vm1, %v587_v6 }
  0x82   : > { %v1518_v23 = vsel %vm826_vm12, %v1513_v15, %v1517_v16  ;;  %v1521_v44 = vor.u32 %v1519_v37, %v1517_v16 }
  0x84   : > { %2995 = vmatmul.msk.bf16.gmra.mxu3 %vm670_vm4, %v3234_v7  ;;  %v879_v7 = vshrl.u32 %v3221_v38, 16 }
  0x86   : > { %v881_v12 = vor.u32 %v879_v7, %v877_v53 }
  0x88   : > { %v886_v19 = vsel %vm826_vm12, %v881_v12, %v885_v13  ;;  %v1421_v46 = vld [vmem:[#allocation3 + $0x48] sm:$0x1]  ;;  %v2111_v12 = vrot.slane %v2109_v2, 1  ;;  %v2114_v13 = vshll.u32 %v3838_v1, 16 }
  0x89   : > { %v1457_v52 = vunpack.c.l.b16 %v1421_v46  ;;  %v3256_v46 = vld [vmem:[#allocation3 + $0x18] sm:$0xff] }
  0x8a   : > { %v2116_v21 = vrot.slane %v2114_v13, 1 }
  0x8c   : > { %2955 = vmatmul.msk.bf16.gmra.mxu2 %vm670_vm4, %v1092_v29 }
  0x8d   : > { %2914 = vmatmul.msk.bf16.gmra.mxu1 %vm670_vm4, %v870_v31  ;;  %v3246_v31 = vld [vmem:[#allocation3 + $0x40] sm:$0xff] }
  0x8e   : > { %3036 = vmatmul.msk.bf16.gmra.mxu0 %vm670_vm4, %v1502_v33  ;;  %v1080_v33 = vpack.c.b16 %v1071_v26, %v1071_v26  ;;  %v1523_v38 = vshll.u32 %v3246_v31, 16  ;;  %v1527_v63 = vshrl.u32 %v3246_v31, 16  ;;  %v3167_v26 = vld [vmem:[#allocation3 + $0x10] sm:$0xe] }
  0x90   : > { %v1097_v39 = vrot.slane %v1080_v33, 1  ;;  %v1525_v45 = vrot.slane %v1523_v38, 1 }
  0x92   : > { %v1098_v47 = vsel %vm1081_vm11, %v1095_v30, %v1097_v39  ;;  %v1526_v51 = vsel %vm826_vm12, %v1521_v44, %v1525_v45  ;;  %v1529_v7 = vor.u32 %v1527_v63, %v1525_v45  ;;  %v2107_v30 = vshrl.u32 %v3263_v60, 16  ;;  %v3860_v39 = vld [vmem:[#allocation3 + $0x20] sm:$0xff] }
  0x93   : > { %v2361_v44 = vrot.slane %v3855_v35, 1 }
  0x94   : > { %2996 = vmatmul.msk.bf16.gmra.mxu3 %vm670_vm4, %v3235_v42 }
  0x9c   : > { %2956 = vmatmul.msk.bf16.gmra.mxu2 %vm670_vm4, %v1094_v58  ;;  %v1466_v58 = vpack.c.b16 %v1457_v52, %v1457_v52 }
  0x9d   : > { %2915 = vmatmul.msk.bf16.gmra.mxu1 %vm670_vm4, %v878_v59  ;;  %v3238_v59 = vld [vmem:[#allocation3 + $0x40] sm:$0xff] }
  0x9e   : > { %3037 = vmatmul.msk.bf16.gmra.mxu0 %vm670_vm4, %v1510_v25  ;;  %v3045_v25 = vor.u32 %v3247_v57, %v3044_v55  ;;  %v1531_v0 = vshll.u32 %v1466_v58, 16 }
  0xa0   : > { %v1533_v8 = vrot.slane %v1531_v0, 1 }
  0xa4   : > { %2997 = vmatmul.msk.bf16.gmra.mxu3 %vm670_vm4, %v3236_v4  ;;  %v1721_v4 = vrot.slane %v3045_v25, 1 }
  0xa6   : > { %v1723_v15 = vsel %vm1081_vm11, %v1721_v4, %v1722_v11 }
  0xa7   : > { %v718_v14 = vpop.f32.mrf.mxu1 }
  0xa8   : > { %752 = vst.msk [vmem:[#allocation2 + $0x20] sm:$0xff] %vm670_vm4, %v718_v14 }
  0xac   : > { %2957 = vmatmul.msk.bf16.gmra.mxu2 %vm670_vm4, %v1096_v18  ;;  %v1534_v18 = vsel %vm826_vm12, %v1529_v7, %v1533_v8  ;;  %v3882_v7 = vld [vmem:[#allocation3 + $0x28] sm:$0xff] }
  0xad   : > { %2916 = vmatmul.msk.bf16.gmra.mxu1 %vm670_vm4, %v886_v19  ;;  %v2112_v19 = vor.u32 %v2111_v12, %v2107_v30 }
  0xae   : > { %3038 = vmatmul.msk.bf16.gmra.mxu0 %vm670_vm4, %v1518_v23 }
  0xaf   : > { %v728_v28 = vpop.f32.mrf.mxu2  ;;  %v720_v29 = vpop.f32.mrf.mxu1 }
  0xb0   : > { %756 = vst.msk [vmem:[#allocation2 + $0x40] sm:$0xff] %vm670_vm4, %v728_v28  ;;  %v2117_v28 = vsel %vm826_vm12, %v2112_v19, %v2116_v21 }
  0xb1   : > { %753 = vst.msk [vmem:[#allocation2 + $0x28] sm:$0xff] %vm670_vm4, %v720_v29 }
  0xb3   : > { %v738_v36 = vpop.f32.mrf.mxu3 }
  0xb4   : > { %2998 = vmatmul.msk.bf16.gmra.mxu3 %vm670_vm4, %v3237_v32  ;;  %760 = vst.msk [vmem:[#allocation2 + $0x60] sm:$0xff] %vm670_vm4, %v738_v36  ;;  %v3853_v32 = vld [vmem:[#allocation3 + $0x18] sm:$0xff]  ;;  %v3168_v36 = vor.u32 %v3271_v27, %v3167_v26 }
  0xb5   : > { %v1724_v40 = vrot.slane %v3853_v32, 1 }
  0xb7   : > { %v730_v42 = vpop.f32.mrf.mxu2  ;;  %v723_v43 = vpop.f32.mrf.mxu1 }
  0xb8   : > { %757 = vst.msk [vmem:[#allocation2 + $0x48] sm:$0xff] %vm670_vm4, %v730_v42 }
  0xb9   : > { %754 = vst.msk [vmem:[#allocation2 + $0x30] sm:$0xff] %vm670_vm4, %v723_v43  ;;  %v2360_v43 = vrot.slane %v3168_v36, 1 }
  0xbb   : > { %v740_v49 = vpop.f32.mrf.mxu3  ;;  %v708_v50 = vpop.f32.mrf.mxu0 }
  0xbc   : > { %2958 = vmatmul.msk.bf16.gmra.mxu2 %vm670_vm4, %v1098_v47  ;;  %761 = vst.msk [vmem:[#allocation2 + $0x68] sm:$0xff] %vm670_vm4, %v740_v49  ;;  %v2118_v47 = vshrl.u32 %v3838_v1, 16  ;;  %v3876_v1 = vld [vmem:[#allocation3 + $0x20] sm:$0xff] }
  0xbd   : > { %2917 = vmatmul.msk.bf16.gmra.mxu1 %vm670_vm4, %v894_v48  ;;  %748 = vst.msk [vmem:[#allocation2] sm:$0xff] %vm670_vm4, %v708_v50  ;;  %v2122_v48 = vshll.u32 %v3860_v39, 16  ;;  %v1725_v50 = vsel %vm1081_vm11, %v1722_v11, %v1724_v40  ;;  %v3878_v11 = vld [vmem:[#allocation3 + $0x20] sm:$0xff] }
  0xbe   : > { %3039 = vmatmul.msk.bf16.gmra.mxu0 %vm670_vm4, %v1526_v51  ;;  %v2120_v57 = vor.u32 %v2118_v47, %v2116_v21  ;;  %v2363_v13 = vrot.slane %v3878_v11, 1  ;;  %v975_v21 = vld [vmem:[#allocation2 + $0x20] sm:$0xff] }
  0xbf   : > { %v733_v53 = vpop.f32.mrf.mxu2  ;;  %v725_v54 = vpop.f32.mrf.mxu1  ;;  %v2124_v58 = vrot.slane %v2122_v48, 1  ;;  %v3911_v48 = vld [vmem:[#allocation3 + $0x30] sm:$0xff] }
  0xc0   : > { %758 = vst.msk [vmem:[#allocation2 + $0x50] sm:$0xff] %vm670_vm4, %v733_v53  ;;  %v2362_v53 = vsel %vm1081_vm11, %v2360_v43, %v2361_v44  ;;  %v2364_v27 = vsel %vm1081_vm11, %v2361_v44, %v2363_v13 }
  0xc1   : > { %755 = vst.msk [vmem:[#allocation2 + $0x38] sm:$0xff] %vm670_vm4, %v725_v54 }
  0xc3   : > { %v710_v62 = vpop.f32.mrf.mxu0 }
  0xc4   : > { %2999 = vmatmul.msk.bf16.gmra.mxu3 %vm670_vm4, %v3238_v59  ;;  %749 = vst.msk [vmem:[#allocation2 + $0x8] sm:$0xff] %vm670_vm4, %v710_v62  ;;  %v971_v9 = vld [vmem:[#allocation2] sm:$0xff]  ;;  %v2125_v62 = vsel %vm826_vm12, %v2120_v57, %v2124_v58  ;;  %v3258_v57 = vld [vmem:[#allocation3 + $0x28] sm:$0xff] }
  0xc7   : > { %v743_v5 = vpop.f32.mrf.mxu3  ;;  %v735_v6 = vpop.f32.mrf.mxu2 }
  0xc8   : > { %762 = vst.msk [vmem:[#allocation2 + $0x70] sm:$0xff] %vm670_vm4, %v743_v5 }
  0xc9   : > { %759 = vst.msk [vmem:[#allocation2 + $0x58] sm:$0xff] %vm670_vm4, %v735_v6 }
  0xca   : > { %v931_v14 = vpop.f32.mrf.mxu1 }
  0xcb   : > { %v987_v16 = vadd.f32 %v971_v9, %v931_v14  ;;  %v713_v17 = vpop.f32.mrf.mxu0  ;;  %v972_v31 = vld [vmem:[#allocation2 + $0x8] sm:$0xff]  ;;  %v1726_v9 = vrot.slane %v3876_v1, 1 }
  0xcc   : > { %3115 = vmatmul.msk.bf16.vlgmr.msra.gmra.mxu2 %vm670_vm4, %v3255_v10  ;;  %750 = vst.msk [vmem:[#allocation2 + $0x10] sm:$0xff] %vm670_vm4, %v713_v17  ;;  %v2126_v17 = vshrl.u32 %v3860_v39, 16 }
  0xcd   : > { %1003 = vst.msk [vmem:[#allocation2] sm:$0xff] %vm670_vm4, %v987_v16  ;;  %3074 = vmatmul.msk.bf16.vlgmr.msra.gmra.mxu1 %vm670_vm4, %v1723_v15  ;;  %v3257_v15 = vld [vmem:[#allocation3 + $0x20] sm:$0xff] }
  0xce   : > { %3040 = vmatmul.msk.bf16.gmra.mxu0 %vm670_vm4, %v1534_v18  ;;  %v2130_v18 = vshll.u32 %v3882_v7, 16 }
  0xcf   : > { %v745_v22 = vpop.f32.mrf.mxu3  ;;  %v1135_v23 = vpop.f32.mrf.mxu2 }
  0xd0   : > { %763 = vst.msk [vmem:[#allocation2 + $0x78] sm:$0xff] %vm670_vm4, %v745_v22  ;;  %v1727_v22 = vsel %vm1081_vm11, %v1724_v40, %v1726_v9  ;;  %v2132_v32 = vrot.slane %v2130_v18, 1 }
  0xd2   : > { %v933_v29 = vpop.f32.mrf.mxu1 }
  0xd3   : > { %v988_v33 = vadd.f32 %v972_v31, %v933_v29  ;;  %v715_v34 = vpop.f32.mrf.mxu0  ;;  %v973_v45 = vld [vmem:[#allocation2 + $0x10] sm:$0xff]  ;;  %v2128_v31 = vor.u32 %v2126_v17, %v2124_v58  ;;  %v2134_v58 = vshrl.u32 %v3882_v7, 16  ;;  %v306_v7 = vadd.s32 152, %v3490_v3 }
  0xd4   : > { %v1175_v37 = vld [vmem:[#allocation2] sm:$0xff]  ;;  %3156 = vmatmul.msk.bf16.vlgmr.msra.gmra.mxu3 %vm670_vm4, %v2117_v28  ;;  %751 = vst.msk [vmem:[#allocation2 + $0x18] sm:$0xff] %vm670_vm4, %v715_v34 }
  0xd5   : > { %v1191_v38 = vadd.f32 %v1175_v37, %v1135_v23  ;;  %1004 = vst.msk [vmem:[#allocation2 + $0x8] sm:$0xff] %vm670_vm4, %v988_v33  ;;  %v2133_v39 = vsel %vm826_vm12, %v2128_v31, %v2132_v32 }
  0xd7   : > { %1207 = vst.msk [vmem:[#allocation2] sm:$0xff] %vm670_vm4, %v1191_v38  ;;  %v1317_v41 = vpop.f32.mrf.mxu3  ;;  %v1137_v42 = vpop.f32.mrf.mxu2 }
  0xda   : > { %v936_v49 = vpop.f32.mrf.mxu1 }
  0xdb   : > { %v989_v51 = vadd.f32 %v973_v45, %v936_v49  ;;  %v1571_v52 = vpop.f32.mrf.mxu0  ;;  %v974_v0 = vld [vmem:[#allocation2 + $0x18] sm:$0xff]  ;;  %v3907_v45 = vld [vmem:[#allocation3 + $0x28] sm:$0xff] }
  0xdc   : > { %v1176_v54 = vld [vmem:[#allocation2 + $0x8] sm:$0xff]  ;;  %3116 = vmatmul.msk.bf16.gmra.mxu2 %vm670_vm4, %v3256_v46 }
  0xdd   : > { %v1192_v55 = vadd.f32 %v1176_v54, %v1137_v42  ;;  %1005 = vst.msk [vmem:[#allocation2 + $0x10] sm:$0xff] %vm670_vm4, %v989_v51  ;;  %3075 = vmatmul.msk.bf16.gmra.mxu1 %vm670_vm4, %v1725_v50  ;;  %v3904_v42 = vld [vmem:[#allocation3 + $0x28] sm:$0xff]  ;;  %v2365_v54 = vrot.slane %v3907_v45, 1 }
  0xde   : > { %v1357_v59 = vld [vmem:[#allocation2] sm:$0xff]  ;;  %3197 = vmatmul.msk.bf16.vlgmr.msra.gmra.mxu0 %vm670_vm4, %v2362_v53  ;;  %v1728_v50 = vrot.slane %v3904_v42, 1 }
  0xdf   : > { %v1373_v60 = vadd.f32 %v1357_v59, %v1317_v41  ;;  %1208 = vst.msk [vmem:[#allocation2 + $0x8] sm:$0xff] %vm670_vm4, %v1192_v55  ;;  %v1319_v61 = vpop.f32.mrf.mxu3  ;;  %v1140_v25 = vpop.f32.mrf.mxu2  ;;  %v976_v41 = vld [vmem:[#allocation2 + $0x28] sm:$0xff]  ;;  %v3318_v59 = vunpack.c.h.bf16 %v3796_v56  ;;  %v2366_v56 = vsel %vm1081_vm11, %v2363_v13, %v2365_v54  ;;  %v328_v13 = vadd.s32 %v3531_v20, %v306_v7  ;;  %v3987_v7 = vld [vmem:[#allocation3 + $0x38] sm:$0xff] }
  0xe1   : > { %1389 = vst.msk [vmem:[#allocation2] sm:$0xff] %vm670_vm4, %v1373_v60  ;;  %vm349_vm8 = vcmp.ge.s32.totalorder %v328_v13, 0  ;;  %vm370_vm9 = vcmp.lt.s32.totalorder %v328_v13, 256  ;;  %v3994_v13 = vld [vmem:[#allocation3 + $0x40] sm:$0xff] }
  0xe2   : > { %v938_v63 = vpop.f32.mrf.mxu1  ;;  %vm391_vm10 = vmand %vm349_vm8, %vm370_vm9 }
  0xe3   : > { %v990_v2 = vadd.f32 %v974_v0, %v938_v63  ;;  %v1573_v4 = vpop.f32.mrf.mxu0  ;;  %v1729_v63 = vsel %vm1081_vm11, %v1726_v9, %v1728_v50 }
  0xe4   : > { %v1177_v5 = vld [vmem:[#allocation2 + $0x10] sm:$0xff]  ;;  %3157 = vmatmul.msk.bf16.gmra.mxu3 %vm670_vm4, %v2125_v62 }
  0xe5   : > { %v1193_v6 = vadd.f32 %v1177_v5, %v1140_v25  ;;  %1006 = vst.msk [vmem:[#allocation2 + $0x18] sm:$0xff] %vm670_vm4, %v990_v2  ;;  %v977_v62 = vld [vmem:[#allocation2 + $0x30] sm:$0xff]  ;;  %v2136_v5 = vor.u32 %v2134_v58, %v2132_v32 }
  0xe6   : > { %v1358_v8 = vld [vmem:[#allocation2 + $0x8] sm:$0xff] }
  0xe7   : > { %v1374_v10 = vadd.f32 %v1358_v8, %v1319_v61  ;;  %1209 = vst.msk [vmem:[#allocation2 + $0x10] sm:$0xff] %vm670_vm4, %v1193_v6  ;;  %v1322_v30 = vpop.f32.mrf.mxu3  ;;  %v1142_v12 = vpop.f32.mrf.mxu2  ;;  %v2138_v61 = vshll.u32 %v3911_v48, 16  ;;  %v3375_v8 = vld [vmem:[%s4264_s2] ss:$0 sm:$0xff] }
  0xe8   : > { %v1611_v14 = vld [vmem:[#allocation2] sm:$0xff]  ;;  %v458_v11 = vmul.f32 %v3375_v8, %v3318_v59 }
  0xe9   : > { %1390 = vst.msk [vmem:[#allocation2 + $0x8] sm:$0xff] %vm670_vm4, %v1374_v10  ;;  %v1627_v16 = vadd.f32 %v1611_v14, %v1571_v52  ;;  %v3934_v1 = vrot.slane %v2138_v61, 1 }
  0xea   : > { %v941_v19 = vpop.f32.mrf.mxu1 }
  0xeb   : > { %1643 = vst.msk [vmem:[#allocation2] sm:$0xff] %vm670_vm4, %v1627_v16  ;;  %v991_v23 = vadd.f32 %v975_v21, %v941_v19  ;;  %v1576_v26 = vpop.f32.mrf.mxu0  ;;  %v2141_v18 = vsel %vm826_vm12, %v2136_v5, %v3934_v1  ;;  %v978_v21 = vld [vmem:[#allocation2 + $0x38] sm:$0xff] }
  0xec   : > { %v1178_v28 = vld [vmem:[#allocation2 + $0x18] sm:$0xff]  ;;  %3117 = vmatmul.msk.bf16.gmra.mxu2 %vm670_vm4, %v3257_v15  ;;  %v3376_v15 = vld [vmem:[%s4265_s3] ss:$0 sm:$0xff] }
  0xed   : > { %v1194_v29 = vadd.f32 %v1178_v28, %v1142_v12  ;;  %1007 = vst.msk [vmem:[#allocation2 + $0x20] sm:$0xff] %vm670_vm4, %v991_v23  ;;  %3076 = vmatmul.msk.bf16.gmra.mxu1 %vm670_vm4, %v1727_v22  ;;  %v483_v16 = vadd.f32 %v3376_v15, %v458_v11  ;;  %v3949_v22 = vld [vmem:[#allocation3 + $0x30] sm:$0xff] }
  0xee   : > { %v1359_v33 = vld [vmem:[#allocation2 + $0x10] sm:$0xff]  ;;  %3198 = vmatmul.msk.bf16.gmra.mxu0 %vm670_vm4, %v2364_v27 }
  0xef   : > { %v1375_v34 = vadd.f32 %v1359_v33, %v1322_v30  ;;  %1210 = vst.msk [vmem:[#allocation2 + $0x18] sm:$0xff] %vm670_vm4, %v1194_v29  ;;  %v1324_v35 = vpop.f32.mrf.mxu3  ;;  %v1145_v36 = vpop.f32.mrf.mxu2  ;;  %v504_v23 = vmax.f32 %v483_v16, 0.0  ;;  %v3952_v28 = vld [vmem:[#allocation3 + $0x30] sm:$0xff]  ;;  %v3956_v33 = vld [vmem:[#allocation3 + $0x38] sm:$0xff] }
  0xf0   : > { %v1612_v37 = vld [vmem:[#allocation2 + $0x8] sm:$0xff] }
  0xf1   : > { %1391 = vst.msk [vmem:[#allocation2 + $0x10] sm:$0xff] %vm670_vm4, %v1375_v34  ;;  %v1628_v38 = vadd.f32 %v1612_v37, %v1573_v4  ;;  %v567_v31 = vsel %vm391_vm10, %v504_v23, 0.0  ;;  %v3260_v23 = vld [vmem:[#allocation3 + $0x38] sm:$0xff] }
  0xf2   : > { %v943_v40 = vpop.f32.mrf.mxu1  ;;  %v588_v34 = vpack.c.bf16 %v567_v31, %v567_v31 }
  0xf3   : > { %1644 = vst.msk [vmem:[#allocation2 + $0x8] sm:$0xff] %vm670_vm4, %v1628_v38  ;;  %v992_v43 = vadd.f32 %v976_v41, %v943_v40  ;;  %v1578_v44 = vpop.f32.mrf.mxu0  ;;  %v2367_v40 = vrot.slane %v3952_v28, 1  ;;  %v413_v41 = vld [vmem:[%s3519_s25 + $0x50] sm:$0x1]  ;;  %s2829_s25 = sshll.u32 %s4305_s18, 4 }
  0xf4   : > { %v1179_v46 = vld [vmem:[#allocation2 + $0x20] sm:$0xff]  ;;  %3158 = vmatmul.msk.bf16.gmra.mxu3 %vm670_vm4, %v2133_v39  ;;  %610 = vst.msk [vmem:[#allocation3 + $0x4c] sm:$0xf] %vm590_vm1, %v588_v34  ;;  %s271_s27 = sadd.s32 %s2830_s26, %s2829_s25 }
  0xf5   : > { %v1195_v47 = vadd.f32 %v1179_v46, %v1145_v36  ;;  %1008 = vst.msk [vmem:[#allocation2 + $0x28] sm:$0xff] %vm670_vm4, %v992_v43  ;;  %v1730_v36 = vrot.slane %v3949_v22, 1  ;;  %v434_v46 = vunpack.c.l.bf16 %v413_v41  ;;  %s2831_s28 = sshll.u32 %s271_s27, 2 }
  0xf6   : > { %v1360_v49 = vld [vmem:[#allocation2 + $0x18] sm:$0xff]  ;;  %s4108_s6 = scalar_lea.vmem %s4266_s4, %s2831_s28 }
  0xf7   : > { %v1376_v51 = vadd.f32 %v1360_v49, %v1324_v35  ;;  %1211 = vst.msk [vmem:[#allocation2 + $0x20] sm:$0xff] %vm670_vm4, %v1195_v47  ;;  %v1327_v52 = vpop.f32.mrf.mxu3  ;;  %v1147_v53 = vpop.f32.mrf.mxu2  ;;  %v2142_v49 = vshrl.u32 %v3911_v48, 16  ;;  %v459_v58 = vmul.f32 %v3375_v8, %v434_v46  ;;  %v2368_v48 = vsel %vm1081_vm11, %v2365_v54, %v2367_v40 }
  0xf8   : > { %v1613_v55 = vld [vmem:[#allocation2 + $0x10] sm:$0xff] }
  0xf9   : > { %1392 = vst.msk [vmem:[#allocation2 + $0x18] sm:$0xff] %vm670_vm4, %v1376_v51  ;;  %v1629_v60 = vadd.f32 %v1613_v55, %v1576_v26  ;;  %v2146_v51 = vshll.u32 %v3956_v33, 16  ;;  %v1731_v55 = vsel %vm1081_vm11, %v1728_v50, %v1730_v36 }
  0xfa   : > { %v946_v25 = vpop.f32.mrf.mxu1 }
  0xfb   : > { %1645 = vst.msk [vmem:[#allocation2 + $0x10] sm:$0xff] %vm670_vm4, %v1629_v60  ;;  %v993_v0 = vadd.f32 %v977_v62, %v946_v25  ;;  %v1581_v2 = vpop.f32.mrf.mxu0  ;;  %v484_v25 = vadd.f32 %v3376_v15, %v459_v58  ;;  %v2148_v62 = vrot.slane %v2146_v51, 1  ;;  %v1732_v15 = vrot.slane %v3987_v7, 1  ;;  %v982_v51 = vld [vmem:[#allocation2 + $0x58] sm:$0xff] }
  0xfc   : > { %v1180_v4 = vld [vmem:[#allocation2 + $0x28] sm:$0xff]  ;;  %3118 = vmatmul.msk.bf16.gmra.mxu2 %vm670_vm4, %v3258_v57  ;;  %v307_v57 = vadd.s32 160, %v3490_v3  ;;  %v2144_v3 = vor.u32 %v2142_v49, %v3934_v1 }
  0xfd   : > { %v1196_v6 = vadd.f32 %v1180_v4, %v1147_v53  ;;  %1009 = vst.msk [vmem:[#allocation2 + $0x30] sm:$0xff] %vm670_vm4, %v993_v0  ;;  %3077 = vmatmul.msk.bf16.gmra.mxu1 %vm670_vm4, %v1729_v63  ;;  %v979_v53 = vld [vmem:[#allocation2 + $0x40] sm:$0xff]  ;;  %v505_v45 = vmax.f32 %v484_v25, 0.0  ;;  %v980_v1 = vld [vmem:[#allocation2 + $0x48] sm:$0xff]  ;;  %v1733_v34 = vsel %vm1081_vm11, %v1730_v36, %v1732_v15 }
  0xfe   : > { %v1361_v9 = vld [vmem:[#allocation2 + $0x20] sm:$0xff]  ;;  %3199 = vmatmul.msk.bf16.gmra.mxu0 %vm670_vm4, %v2366_v56  ;;  %v329_v42 = vadd.s32 %v3531_v20, %v307_v57  ;;  %v2149_v5 = vsel %vm826_vm12, %v2144_v3, %v2148_v62 }
  0xff   : > { %v1377_v10 = vadd.f32 %v1361_v9, %v1327_v52  ;;  %1212 = vst.msk [vmem:[#allocation2 + $0x28] sm:$0xff] %vm670_vm4, %v1196_v6  ;;  %v1329_v30 = vpop.f32.mrf.mxu3  ;;  %v1150_v12 = vpop.f32.mrf.mxu2  ;;  %v4023_v57 = vld [vmem:[#allocation3 + $0x40] sm:$0xff] }
 0x100   : > { %v1614_v14 = vld [vmem:[#allocation2 + $0x18] sm:$0xff]  ;;  %vm350_vm0 = vcmp.ge.s32.totalorder %v329_v42, 0  ;;  %vm371_vm13 = vcmp.lt.s32.totalorder %v329_v42, 256  ;;  %v2371_v3 = vrot.slane %v4023_v57, 1 }
 0x101   : > { %1393 = vst.msk [vmem:[#allocation2 + $0x20] sm:$0xff] %vm670_vm4, %v1377_v10  ;;  %v1630_v17 = vadd.f32 %v1614_v14, %v1578_v44  ;;  %v3259_v44 = vld [vmem:[#allocation3 + $0x30] sm:$0xff]  ;;  %vm392_vm14 = vmand %vm350_vm0, %vm371_vm13  ;;  %v3990_v10 = vld [vmem:[#allocation3 + $0x38] sm:$0xff] }
 0x102   : > { %v948_v19 = vpop.f32.mrf.mxu1  ;;  %v568_v56 = vsel %vm392_vm14, %v505_v45, 0.0 }
 0x103   : > { %1646 = vst.msk [vmem:[#allocation2 + $0x18] sm:$0xff] %vm670_vm4, %v1630_v17  ;;  %v994_v26 = vadd.f32 %v978_v21, %v948_v19  ;;  %v1583_v27 = vpop.f32.mrf.mxu0  ;;  %v589_v8 = vpack.c.bf16 %v568_v56, %v568_v56  ;;  %v2369_v19 = vrot.slane %v3990_v10, 1 }
 0x104   : > { %v1181_v29 = vld [vmem:[#allocation2 + $0x30] sm:$0xff]  ;;  %3159 = vmatmul.msk.bf16.gmra.mxu3 %vm670_vm4, %v2141_v18 }
 0x105   : > { %v1197_v32 = vadd.f32 %v1181_v29, %v1150_v12  ;;  %1010 = vst.msk [vmem:[#allocation2 + $0x38] sm:$0xff] %vm670_vm4, %v994_v26  ;;  %v2154_v29 = vshll.u32 %v3994_v13, 16 }
 0x106   : > { %v1362_v35 = vld [vmem:[#allocation2 + $0x28] sm:$0xff]  ;;  %612 = vst.msk [vmem:[#allocation3 + $0x50] sm:$0x1] %vm611_vm15, %v589_v8 }
 0x107   : > { %v1378_v37 = vadd.f32 %v1362_v35, %v1329_v30  ;;  %1213 = vst.msk [vmem:[#allocation2 + $0x30] sm:$0xff] %vm670_vm4, %v1197_v32  ;;  %v1332_v38 = vpop.f32.mrf.mxu3  ;;  %v1152_v39 = vpop.f32.mrf.mxu2  ;;  %v981_v32 = vld [vmem:[#allocation2 + $0x50] sm:$0xff]  ;;  %v2156_v36 = vrot.slane %v2154_v29, 1 }
 0x108   : > { %v1615_v43 = vld [vmem:[#allocation2 + $0x20] sm:$0xff] }
 0x109   : > { %1394 = vst.msk [vmem:[#allocation2 + $0x28] sm:$0xff] %vm670_vm4, %v1378_v37  ;;  %v1631_v47 = vadd.f32 %v1615_v43, %v1581_v2 }
 0x10a   : > { %v951_v52 = vpop.f32.mrf.mxu1 }
 0x10b   : > { %1647 = vst.msk [vmem:[#allocation2 + $0x20] sm:$0xff] %vm670_vm4, %v1631_v47  ;;  %v995_v59 = vadd.f32 %v979_v53, %v951_v52  ;;  %v1586_v60 = vpop.f32.mrf.mxu0  ;;  %v4020_v52 = vld [vmem:[#allocation3 + $0x40] sm:$0xff] }
 0x10c   : > { %v1182_v61 = vld [vmem:[#allocation2 + $0x38] sm:$0xff]  ;;  %3119 = vmatmul.msk.bf16.gmra.mxu2 %vm670_vm4, %v3259_v44 }
 0x10d   : > { %v1198_v50 = vadd.f32 %v1182_v61, %v1152_v39  ;;  %1011 = vst.msk [vmem:[#allocation2 + $0x40] sm:$0xff] %vm670_vm4, %v995_v59  ;;  %3078 = vmatmul.msk.bf16.gmra.mxu1 %vm670_vm4, %v1731_v55  ;;  %v1734_v61 = vrot.slane %v4020_v52, 1 }
 0x10e   : > { %v1363_v63 = vld [vmem:[#allocation2 + $0x30] sm:$0xff]  ;;  %3200 = vmatmul.msk.bf16.gmra.mxu0 %vm670_vm4, %v2368_v48 }
 0x10f   : > { %v1379_v54 = vadd.f32 %v1363_v63, %v1332_v38  ;;  %1214 = vst.msk [vmem:[#allocation2 + $0x38] sm:$0xff] %vm670_vm4, %v1198_v50  ;;  %v1334_v0 = vpop.f32.mrf.mxu3  ;;  %v1155_v20 = vpop.f32.mrf.mxu2  ;;  %v3261_v63 = vld [vmem:[#allocation3 + $0x40] sm:$0xff]  ;;  %v1735_v56 = vsel %vm1081_vm11, %v1732_v15, %v1734_v61 }
 0x110   : > { %v1616_v2 = vld [vmem:[#allocation2 + $0x28] sm:$0xff] }
 0x111   : > { %1395 = vst.msk [vmem:[#allocation2 + $0x30] sm:$0xff] %vm670_vm4, %v1379_v54  ;;  %v1632_v4 = vadd.f32 %v1616_v2, %v1583_v27  ;;  %v2150_v27 = vshrl.u32 %v3956_v33, 16  ;;  %v2370_v33 = vsel %vm1081_vm11, %v2367_v40, %v2369_v19  ;;  %v2158_v54 = vshrl.u32 %v3994_v13, 16  ;;  %v983_v2 = vld [vmem:[#allocation2 + $0x60] sm:$0xff]  ;;  %v2060_v13 = vld [vmem:[#allocation3 + $0x50] sm:$0x1] }
 0x112   : > { %v953_v6 = vpop.f32.mrf.mxu1 }
 0x113   : > { %1648 = vst.msk [vmem:[#allocation2 + $0x28] sm:$0xff] %vm670_vm4, %v1632_v4  ;;  %v996_v11 = vadd.f32 %v980_v1, %v953_v6  ;;  %v1588_v9 = vpop.f32.mrf.mxu0  ;;  %v2152_v22 = vor.u32 %v2150_v27, %v2148_v62  ;;  %v2372_v6 = vsel %vm1081_vm11, %v2369_v19, %v2371_v3  ;;  %v1675_v1 = vld [vmem:[#allocation3 + $0x48] sm:$0x1]  ;;  %v2160_v7 = vor.u32 %v2158_v54, %v2156_v36  ;;  %v986_v54 = vld [vmem:[#allocation2 + $0x78] sm:$0xff] }
 0x114   : > { %v1183_v30 = vld [vmem:[#allocation2 + $0x40] sm:$0xff]  ;;  %3160 = vmatmul.msk.bf16.gmra.mxu3 %vm670_vm4, %v2149_v5  ;;  %v2096_v19 = vunpack.c.l.b16 %v2060_v13 }
 0x115   : > { %v1199_v12 = vadd.f32 %v1183_v30, %v1155_v20  ;;  %1012 = vst.msk [vmem:[#allocation2 + $0x48] sm:$0xff] %vm670_vm4, %v996_v11  ;;  %v2157_v47 = vsel %vm826_vm12, %v2152_v22, %v2156_v36 }
 0x116   : > { %v1364_v14 = vld [vmem:[#allocation2 + $0x38] sm:$0xff] }
 0x117   : > { %v1380_v16 = vadd.f32 %v1364_v14, %v1334_v0  ;;  %1215 = vst.msk [vmem:[#allocation2 + $0x40] sm:$0xff] %vm670_vm4, %v1199_v12  ;;  %v1337_v17 = vpop.f32.mrf.mxu3  ;;  %v1157_v18 = vpop.f32.mrf.mxu2  ;;  %v1711_v12 = vunpack.c.l.b16 %v1675_v1 }
 0x118   : > { %v1617_v21 = vld [vmem:[#allocation2 + $0x30] sm:$0xff] }
 0x119   : > { %1396 = vst.msk [vmem:[#allocation2 + $0x38] sm:$0xff] %vm670_vm4, %v1380_v16  ;;  %v1633_v26 = vadd.f32 %v1617_v21, %v1586_v60  ;;  %v4027_v60 = vld [vmem:[#allocation3 + $0x48] sm:$0xff] }
 0x11a   : > { %v956_v31 = vpop.f32.mrf.mxu1  ;;  %v2162_v0 = vshll.u32 %v4027_v60, 16 }
 0x11b   : > { %1649 = vst.msk [vmem:[#allocation2 + $0x30] sm:$0xff] %vm670_vm4, %v1633_v26  ;;  %v997_v35 = vadd.f32 %v981_v32, %v956_v31  ;;  %v1591_v37 = vpop.f32.mrf.mxu0  ;;  %v1720_v26 = vpack.c.b16 %v1711_v12, %v1711_v12  ;;  %v4054_v31 = vld [vmem:[#allocation3 + $0x48] sm:$0xff]  ;;  %v1814_v12 = vld [vmem:[#allocation2] sm:$0xff] }
 0x11c   : > { %v1184_v38 = vld [vmem:[#allocation2 + $0x48] sm:$0xff]  ;;  %3120 = vmatmul.msk.bf16.gmra.mxu2 %vm670_vm4, %v3260_v23  ;;  %v2373_v36 = vrot.slane %v4054_v31, 1 }
 0x11d   : > { %v1200_v39 = vadd.f32 %v1184_v38, %v1157_v18  ;;  %1013 = vst.msk [vmem:[#allocation2 + $0x50] sm:$0xff] %vm670_vm4, %v997_v35  ;;  %3079 = vmatmul.msk.bf16.gmra.mxu1 %vm670_vm4, %v1733_v34  ;;  %v984_v23 = vld [vmem:[#allocation2 + $0x68] sm:$0xff]  ;;  %v2105_v35 = vpack.c.b16 %v2096_v19, %v2096_v19 }
 0x11e   : > { %v1365_v41 = vld [vmem:[#allocation2 + $0x40] sm:$0xff]  ;;  %3201 = vmatmul.msk.bf16.gmra.mxu0 %vm670_vm4, %v2370_v33  ;;  %v1736_v33 = vrot.slane %v1720_v26, 1 }
 0x11f   : > { %v1381_v43 = vadd.f32 %v1365_v41, %v1337_v17  ;;  %1216 = vst.msk [vmem:[#allocation2 + $0x48] sm:$0xff] %vm670_vm4, %v1200_v39  ;;  %v1339_v44 = vpop.f32.mrf.mxu3  ;;  %v1160_v28 = vpop.f32.mrf.mxu2 }
 0x120   : > { %v1618_v46 = vld [vmem:[#allocation2 + $0x38] sm:$0xff] }
 0x121   : > { %1397 = vst.msk [vmem:[#allocation2 + $0x40] sm:$0xff] %vm670_vm4, %v1381_v43  ;;  %v1634_v40 = vadd.f32 %v1618_v46, %v1588_v9  ;;  %v2164_v9 = vrot.slane %v2162_v0, 1  ;;  %v3262_v43 = vld [vmem:[#allocation3 + $0x48] sm:$0xff]  ;;  %v2170_v46 = vshll.u32 %v2105_v35, 16 }
 0x122   : > { %v958_v49 = vpop.f32.mrf.mxu1 }
 0x123   : > { %1650 = vst.msk [vmem:[#allocation2 + $0x38] sm:$0xff] %vm670_vm4, %v1634_v40  ;;  %v998_v53 = vadd.f32 %v982_v51, %v958_v49  ;;  %v1593_v55 = vpop.f32.mrf.mxu0  ;;  %v2165_v18 = vsel %vm826_vm12, %v2160_v7, %v2164_v9  ;;  %v1737_v49 = vsel %vm1081_vm11, %v1734_v61, %v1736_v33 }
 0x124   : > { %v1185_v58 = vld [vmem:[#allocation2 + $0x50] sm:$0xff]  ;;  %3161 = vmatmul.msk.bf16.gmra.mxu3 %vm670_vm4, %v2157_v47 }
 0x125   : > { %v1201_v59 = vadd.f32 %v1185_v58, %v1160_v28  ;;  %1014 = vst.msk [vmem:[#allocation2 + $0x58] sm:$0xff] %vm670_vm4, %v998_v53  ;;  %v2166_v28 = vshrl.u32 %v4027_v60, 16  ;;  %v985_v47 = vld [vmem:[#allocation2 + $0x70] sm:$0xff] }
 0x126   : > { %v1366_v48 = vld [vmem:[#allocation2 + $0x48] sm:$0xff] }
 0x127   : > { %v1382_v42 = vadd.f32 %v1366_v48, %v1339_v44  ;;  %1217 = vst.msk [vmem:[#allocation2 + $0x50] sm:$0xff] %vm670_vm4, %v1201_v59  ;;  %v1342_v25 = vpop.f32.mrf.mxu3  ;;  %v1162_v50 = vpop.f32.mrf.mxu2  ;;  %v2314_v59 = vld [vmem:[#allocation3 + $0x50] sm:$0x1]  ;;  %v2168_v52 = vor.u32 %v2166_v28, %v2164_v9  ;;  %v2172_v48 = vrot.slane %v2170_v46, 1 }
 0x128   : > { %v1619_v62 = vld [vmem:[#allocation2 + $0x40] sm:$0xff] }
 0x129   : > { %1398 = vst.msk [vmem:[#allocation2 + $0x48] sm:$0xff] %vm670_vm4, %v1382_v42  ;;  %v1635_v45 = vadd.f32 %v1619_v62, %v1591_v37 }
 0x12a   : > { %v961_v20 = vpop.f32.mrf.mxu1 }
 0x12b   : > { %1651 = vst.msk [vmem:[#allocation2 + $0x40] sm:$0xff] %vm670_vm4, %v1635_v45  ;;  %v999_v4 = vadd.f32 %v983_v2, %v961_v20  ;;  %v1596_v5 = vpop.f32.mrf.mxu0 }
 0x12c   : > { %v1186_v8 = vld [vmem:[#allocation2 + $0x58] sm:$0xff]  ;;  %3121 = vmatmul.msk.bf16.gmra.mxu2 %vm670_vm4, %v3261_v63  ;;  %v2173_v63 = vsel %vm826_vm12, %v2168_v52, %v2172_v48 }
 0x12d   : > { %v1202_v11 = vadd.f32 %v1186_v8, %v1162_v50  ;;  %1015 = vst.msk [vmem:[#allocation2 + $0x60] sm:$0xff] %vm670_vm4, %v999_v4  ;;  %3080 = vmatmul.msk.bf16.gmra.mxu1 %vm670_vm4, %v1735_v56  ;;  %v2350_v50 = vunpack.c.l.b16 %v2314_v59 }
 0x12e   : > { %v1367_v30 = vld [vmem:[#allocation2 + $0x50] sm:$0xff]  ;;  %3202 = vmatmul.msk.bf16.gmra.mxu0 %vm670_vm4, %v2372_v6 }
 0x12f   : > { %v1383_v14 = vadd.f32 %v1367_v30, %v1342_v25  ;;  %1218 = vst.msk [vmem:[#allocation2 + $0x58] sm:$0xff] %vm670_vm4, %v1202_v11  ;;  %v1344_v10 = vpop.f32.mrf.mxu3  ;;  %v1165_v15 = vpop.f32.mrf.mxu2  ;;  %v2359_v2 = vpack.c.b16 %v2350_v50, %v2350_v50 }
 0x130   : > { %v1620_v16 = vld [vmem:[#allocation2 + $0x48] sm:$0xff] }
 0x131   : > { %1399 = vst.msk [vmem:[#allocation2 + $0x50] sm:$0xff] %vm670_vm4, %v1383_v14  ;;  %v1636_v17 = vadd.f32 %v1620_v16, %v1593_v55  ;;  %v2374_v55 = vsel %vm1081_vm11, %v2371_v3, %v2373_v36  ;;  %v2375_v11 = vrot.slane %v2359_v2, 1 }
 0x132   : > { %v963_v21 = vpop.f32.mrf.mxu1 }
 0x133   : > { %1652 = vst.msk [vmem:[#allocation2 + $0x48] sm:$0xff] %vm670_vm4, %v1636_v17  ;;  %v1000_v27 = vadd.f32 %v984_v23, %v963_v21  ;;  %v1598_v29 = vpop.f32.mrf.mxu0 }
 0x134   : > { %v1187_v32 = vld [vmem:[#allocation2 + $0x60] sm:$0xff]  ;;  %3162 = vmatmul.msk.bf16.gmra.mxu3 %vm670_vm4, %v2165_v18 }
 0x135   : > { %v1203_v34 = vadd.f32 %v1187_v32, %v1165_v15  ;;  %1016 = vst.msk [vmem:[#allocation2 + $0x68] sm:$0xff] %vm670_vm4, %v1000_v27 }
 0x136   : > { %v1368_v37 = vld [vmem:[#allocation2 + $0x58] sm:$0xff] }
 0x137   : > { %v1384_v38 = vadd.f32 %v1368_v37, %v1344_v10  ;;  %1219 = vst.msk [vmem:[#allocation2 + $0x60] sm:$0xff] %vm670_vm4, %v1203_v34  ;;  %v1347_v39 = vpop.f32.mrf.mxu3  ;;  %v1167_v22 = vpop.f32.mrf.mxu2  ;;  %v2376_v10 = vsel %vm1081_vm11, %v2373_v36, %v2375_v11  ;;  %vm2534_vm11 = vcmp.lt.s32.totalorder %v3539_v24, 12 }
 0x138   : > { %v1621_v41 = vld [vmem:[#allocation2 + $0x50] sm:$0xff] }
 0x139   : > { %1400 = vst.msk [vmem:[#allocation2 + $0x58] sm:$0xff] %vm670_vm4, %v1384_v38  ;;  %v1637_v44 = vadd.f32 %v1621_v41, %v1596_v5 }
 0x13a   : > { %v966_v40 = vpop.f32.mrf.mxu1 }
 0x13b   : > { %1653 = vst.msk [vmem:[#allocation2 + $0x50] sm:$0xff] %vm670_vm4, %v1637_v44  ;;  %v1001_v51 = vadd.f32 %v985_v47, %v966_v40  ;;  %v1601_v53 = vpop.f32.mrf.mxu0 }
 0x13c   : > { %v1188_v58 = vld [vmem:[#allocation2 + $0x68] sm:$0xff]  ;;  %3122 = vmatmul.msk.bf16.gmra.mxu2 %vm670_vm4, %v3262_v43  ;;  %v1816_v43 = vld [vmem:[#allocation2 + $0x10] sm:$0xff] }
 0x13d   : > { %v1204_v60 = vadd.f32 %v1188_v58, %v1167_v22  ;;  %1017 = vst.msk [vmem:[#allocation2 + $0x70] sm:$0xff] %vm670_vm4, %v1001_v51  ;;  %3081 = vmatmul.msk.bf16.gmra.mxu1 %vm670_vm4, %v1737_v49 }
 0x13e   : > { %v1369_v61 = vld [vmem:[#allocation2 + $0x60] sm:$0xff]  ;;  %3203 = vmatmul.msk.bf16.gmra.mxu0 %vm670_vm4, %v2374_v55 }
 0x13f   : > { %v1385_v42 = vadd.f32 %v1369_v61, %v1347_v39  ;;  %1220 = vst.msk [vmem:[#allocation2 + $0x68] sm:$0xff] %vm670_vm4, %v1204_v60  ;;  %v1349_v57 = vpop.f32.mrf.mxu3  ;;  %v1170_v25 = vpop.f32.mrf.mxu2  ;;  %v1817_v60 = vld [vmem:[#allocation2 + $0x18] sm:$0xff] }
 0x140   : > { %v1622_v3 = vld [vmem:[#allocation2 + $0x58] sm:$0xff] }
 0x141   : > { %1401 = vst.msk [vmem:[#allocation2 + $0x60] sm:$0xff] %vm670_vm4, %v1385_v42  ;;  %v1638_v62 = vadd.f32 %v1622_v3, %v1598_v29  ;;  %v1815_v29 = vld [vmem:[#allocation2 + $0x8] sm:$0xff] }
 0x142   : > { %v968_v45 = vpop.f32.mrf.mxu1 }
 0x143   : > { %1654 = vst.msk [vmem:[#allocation2 + $0x58] sm:$0xff] %vm670_vm4, %v1638_v62  ;;  %v1002_v0 = vadd.f32 %v986_v54, %v968_v45  ;;  %v1603_v20 = vpop.f32.mrf.mxu0  ;;  %v1818_v54 = vld [vmem:[#allocation2 + $0x20] sm:$0xff] }
 0x144   : > { %v1189_v56 = vld [vmem:[#allocation2 + $0x70] sm:$0xff]  ;;  %3163 = vmatmul.msk.bf16.gmra.mxu3 %vm670_vm4, %v2173_v63 }
 0x145   : > { %v1205_v4 = vadd.f32 %v1189_v56, %v1170_v25  ;;  %1018 = vst.msk [vmem:[#allocation2 + $0x78] sm:$0xff] %vm670_vm4, %v1002_v0 }
 0x146   : > { %v1370_v5 = vld [vmem:[#allocation2 + $0x68] sm:$0xff] }
 0x147   : > { %v1386_v6 = vadd.f32 %v1370_v5, %v1349_v57  ;;  %1221 = vst.msk [vmem:[#allocation2 + $0x70] sm:$0xff] %vm670_vm4, %v1205_v4  ;;  %v1352_v1 = vpop.f32.mrf.mxu3  ;;  %v1172_v8 = vpop.f32.mrf.mxu2 }
 0x148   : > { %v1623_v7 = vld [vmem:[#allocation2 + $0x60] sm:$0xff] }
 0x149   : > { %1402 = vst.msk [vmem:[#allocation2 + $0x68] sm:$0xff] %vm670_vm4, %v1386_v6  ;;  %v1639_v9 = vadd.f32 %v1623_v7, %v1601_v53 }
 0x14a   : > { %v1774_v30 = vpop.f32.mrf.mxu1 }
 0x14b   : > { %1655 = vst.msk [vmem:[#allocation2 + $0x60] sm:$0xff] %vm670_vm4, %v1639_v9  ;;  %v1830_v13 = vadd.f32 %v1814_v12, %v1774_v30  ;;  %v1606_v14 = vpop.f32.mrf.mxu0  ;;  %v1819_v30 = vld [vmem:[#allocation2 + $0x28] sm:$0xff] }
 0x14c   : > { %v1190_v15 = vld [vmem:[#allocation2 + $0x78] sm:$0xff] }
 0x14d   : > { %v1206_v16 = vadd.f32 %v1190_v15, %v1172_v8  ;;  %1846 = vst.msk [vmem:[#allocation2] sm:$0xff] %vm670_vm4, %v1830_v13 }
 0x14e   : > { %v1371_v17 = vld [vmem:[#allocation2 + $0x70] sm:$0xff]  ;;  %3204 = vmatmul.msk.bf16.gmra.mxu0 %vm670_vm4, %v2376_v10 }
 0x14f   : > { %v1387_v18 = vadd.f32 %v1371_v17, %v1352_v1  ;;  %1222 = vst.msk [vmem:[#allocation2 + $0x78] sm:$0xff] %vm670_vm4, %v1206_v16  ;;  %v1354_v19 = vpop.f32.mrf.mxu3  ;;  %v1956_v21 = vpop.f32.mrf.mxu2 }
 0x150   : > { %v1624_v23 = vld [vmem:[#allocation2 + $0x68] sm:$0xff] }
 0x151   : > { %1403 = vst.msk [vmem:[#allocation2 + $0x70] sm:$0xff] %vm670_vm4, %v1387_v18  ;;  %v1640_v26 = vadd.f32 %v1624_v23, %v1603_v20 }
 0x152   : > { %v1776_v27 = vpop.f32.mrf.mxu1 }
 0x153   : > { %1656 = vst.msk [vmem:[#allocation2 + $0x68] sm:$0xff] %vm670_vm4, %v1640_v26  ;;  %v1831_v31 = vadd.f32 %v1815_v29, %v1776_v27  ;;  %v1608_v32 = vpop.f32.mrf.mxu0 }
 0x154   : > { %v1996_v34 = vld [vmem:[#allocation2] sm:$0xff] }
 0x155   : > { %v2012_v35 = vadd.f32 %v1996_v34, %v1956_v21  ;;  %1847 = vst.msk [vmem:[#allocation2 + $0x8] sm:$0xff] %vm670_vm4, %v1831_v31  ;;  %v1820_v31 = vld [vmem:[#allocation2 + $0x30] sm:$0xff] }
 0x156   : > { %v1372_v37 = vld [vmem:[#allocation2 + $0x78] sm:$0xff] }
 0x157   : > { %v1388_v33 = vadd.f32 %v1372_v37, %v1354_v19  ;;  %2028 = vst.msk [vmem:[#allocation2] sm:$0xff] %vm670_vm4, %v2012_v35  ;;  %v2210_v38 = vpop.f32.mrf.mxu3  ;;  %v1958_v39 = vpop.f32.mrf.mxu2 }
 0x158   : > { %v1625_v22 = vld [vmem:[#allocation2 + $0x70] sm:$0xff] }
 0x159   : > { %1404 = vst.msk [vmem:[#allocation2 + $0x78] sm:$0xff] %vm670_vm4, %v1388_v33  ;;  %v1641_v36 = vadd.f32 %v1625_v22, %v1606_v14 }
 0x15a   : > { %v1779_v41 = vpop.f32.mrf.mxu1 }
 0x15b   : > { %1657 = vst.msk [vmem:[#allocation2 + $0x70] sm:$0xff] %vm670_vm4, %v1641_v36  ;;  %v1832_v44 = vadd.f32 %v1816_v43, %v1779_v41  ;;  %v2413_v28 = vpop.f32.mrf.mxu0 }
 0x15c   : > { %v1997_v46 = vld [vmem:[#allocation2 + $0x8] sm:$0xff] }
 0x15d   : > { %v2013_v40 = vadd.f32 %v1997_v46, %v1958_v39  ;;  %1848 = vst.msk [vmem:[#allocation2 + $0x10] sm:$0xff] %vm670_vm4, %v1832_v44 }
 0x15e   : > { %v2250_v47 = vld [vmem:[#allocation2] sm:$0xff] }
 0x15f   : > { %v2266_v49 = vadd.f32 %v2250_v47, %v2210_v38  ;;  %2029 = vst.msk [vmem:[#allocation2 + $0x8] sm:$0xff] %vm670_vm4, %v2013_v40  ;;  %v2212_v51 = vpop.f32.mrf.mxu3  ;;  %v1961_v53 = vpop.f32.mrf.mxu2 }
 0x160   : > { %v1626_v55 = vld [vmem:[#allocation2 + $0x78] sm:$0xff] }
 0x161   : > { %2282 = vst.msk [vmem:[#allocation2] sm:$0xff] %vm670_vm4, %v2266_v49  ;;  %v1642_v58 = vadd.f32 %v1626_v55, %v1608_v32 }
 0x162   : > { %v1781_v59 = vpop.f32.mrf.mxu1 }
 0x163   : > { %1658 = vst.msk [vmem:[#allocation2 + $0x78] sm:$0xff] %vm670_vm4, %v1642_v58  ;;  %v1833_v52 = vadd.f32 %v1817_v60, %v1781_v59  ;;  %v2415_v48 = vpop.f32.mrf.mxu0  ;;  %v1821_v60 = vld [vmem:[#allocation2 + $0x38] sm:$0xff] }
 0x164   : > { %v1998_v61 = vld [vmem:[#allocation2 + $0x10] sm:$0xff] }
 0x165   : > { %v2014_v42 = vadd.f32 %v1998_v61, %v1961_v53  ;;  %1849 = vst.msk [vmem:[#allocation2 + $0x18] sm:$0xff] %vm670_vm4, %v1833_v52 }
 0x166   : > { %v2251_v57 = vld [vmem:[#allocation2 + $0x8] sm:$0xff] }
 0x167   : > { %v2267_v25 = vadd.f32 %v2251_v57, %v2212_v51  ;;  %2030 = vst.msk [vmem:[#allocation2 + $0x10] sm:$0xff] %vm670_vm4, %v2014_v42  ;;  %v2215_v50 = vpop.f32.mrf.mxu3  ;;  %v1963_v3 = vpop.f32.mrf.mxu2 }
 0x168   : > { %v2453_v62 = vld [vmem:[#allocation2] sm:$0xff] }
 0x169   : > { %2283 = vst.msk [vmem:[#allocation2 + $0x8] sm:$0xff] %vm670_vm4, %v2267_v25  ;;  %v2469_v63 = vadd.f32 %v2453_v62, %v2413_v28 }
 0x16a   : > { %v1784_v45 = vpop.f32.mrf.mxu1 }
 0x16b   : > { %2485 = vst.msk [vmem:[#allocation2] sm:$0xff] %vm670_vm4, %v2469_v63  ;;  %v1834_v0 = vadd.f32 %v1818_v54, %v1784_v45  ;;  %v2418_v20 = vpop.f32.mrf.mxu0 }
 0x16c   : > { %v1999_v2 = vld [vmem:[#allocation2 + $0x18] sm:$0xff] }
 0x16d   : > { %v2015_v56 = vadd.f32 %v1999_v2, %v1963_v3  ;;  %1850 = vst.msk [vmem:[#allocation2 + $0x20] sm:$0xff] %vm670_vm4, %v1834_v0 }
 0x16e   : > { %v2252_v4 = vld [vmem:[#allocation2 + $0x10] sm:$0xff] }
 0x16f   : > { %v2268_v5 = vadd.f32 %v2252_v4, %v2215_v50  ;;  %2031 = vst.msk [vmem:[#allocation2 + $0x18] sm:$0xff] %vm670_vm4, %v2015_v56  ;;  %v2217_v6 = vpop.f32.mrf.mxu3  ;;  %v1966_v1 = vpop.f32.mrf.mxu2 }
 0x170   : > { %v2454_v8 = vld [vmem:[#allocation2 + $0x8] sm:$0xff] }
 0x171   : > { %2284 = vst.msk [vmem:[#allocation2 + $0x10] sm:$0xff] %vm670_vm4, %v2268_v5  ;;  %v2470_v11 = vadd.f32 %v2454_v8, %v2415_v48  ;;  %v1822_v8 = vld [vmem:[#allocation2 + $0x40] sm:$0xff] }
 0x172   : > { %v2501_v7 = vld [vmem:[#allocation2] sm:$0xff]  ;;  %v1786_v9 = vpop.f32.mrf.mxu1 }
 0x173   : > { %v2517_v12 = vpack.c.bf16 %v2501_v7, %v2501_v7  ;;  %2486 = vst.msk [vmem:[#allocation2 + $0x8] sm:$0xff] %vm670_vm4, %v2470_v11  ;;  %v1835_v13 = vadd.f32 %v1819_v30, %v1786_v9  ;;  %v2420_v14 = vpop.f32.mrf.mxu0 }
 0x174   : > { %v2000_v10 = vld [vmem:[#allocation2 + $0x20] sm:$0xff] }
 0x175   : > { %2665 = vst.msk [vmem:[%s4108_s6] sm:$0xf] %vm590_vm1, %v2517_v12  ;;  %v2016_v15 = vadd.f32 %v2000_v10, %v1966_v1  ;;  %v2535_v26 = vunpack.c.l.bf16 %v2517_v12 }
 0x176   : > { %v2253_v16 = vld [vmem:[#allocation2 + $0x18] sm:$0xff]  ;;  %1851 = vst.msk [vmem:[#allocation2 + $0x28] sm:$0xff] %vm670_vm4, %v1835_v13 }
 0x177   : > { %v2269_v17 = vadd.f32 %v2253_v16, %v2217_v6  ;;  %2032 = vst.msk [vmem:[#allocation2 + $0x20] sm:$0xff] %vm670_vm4, %v2016_v15  ;;  %v2220_v18 = vpop.f32.mrf.mxu3  ;;  %v1968_v19 = vpop.f32.mrf.mxu2  ;;  %v2608_v38 = vmul.f32 %v2535_v26, %v2535_v26  ;;  %v2571_v28 = vsel %vm670_vm4, %v2535_v26, 0.0 }
 0x178   : > { %v2455_v21 = vld [vmem:[#allocation2 + $0x10] sm:$0xff] }
 0x179   : > { %2285 = vst.msk [vmem:[#allocation2 + $0x18] sm:$0xff] %vm670_vm4, %v2269_v17  ;;  %v2471_v23 = vadd.f32 %v2455_v21, %v2418_v20  ;;  %v2624_v53 = vsel %vm670_vm4, %v2608_v38, 0.0 }
 0x17a   : > { %v2502_v27 = vld [vmem:[#allocation2 + $0x8] sm:$0xff]  ;;  %v1789_v29 = vpop.f32.mrf.mxu1 }
 0x17b   : > { %v2518_v32 = vpack.c.bf16 %v2502_v27, %v2502_v27  ;;  %2487 = vst.msk [vmem:[#allocation2 + $0x10] sm:$0xff] %vm670_vm4, %v2471_v23  ;;  %v1836_v34 = vadd.f32 %v1820_v31, %v1789_v29  ;;  %v2423_v35 = vpop.f32.mrf.mxu0 }
 0x17d   : > { %v2536_v37 = vunpack.c.l.bf16 %v2518_v32  ;;  %2666 = vst.msk [vmem:[%s4108_s6 + $0x4] sm:$0xf] %vm590_vm1, %v2518_v32  ;;  %v2001_v33 = vld [vmem:[#allocation2 + $0x28] sm:$0xff] }
 0x17e   : > { %v2254_v39 = vld [vmem:[#allocation2 + $0x20] sm:$0xff]  ;;  %v2017_v22 = vadd.f32 %v2001_v33, %v1968_v19  ;;  %1852 = vst.msk [vmem:[#allocation2 + $0x30] sm:$0xff] %vm670_vm4, %v1836_v34  ;;  %v1823_v32 = vld [vmem:[#allocation2 + $0x48] sm:$0xff] }
 0x17f   : > { %v2556_v36 = vsel %vm2534_vm11, %v2536_v37, 0.0  ;;  %v2270_v41 = vadd.f32 %v2254_v39, %v2220_v18  ;;  %v2222_v43 = vpop.f32.mrf.mxu3  ;;  %v1971_v44 = vpop.f32.mrf.mxu2 }
 0x180   : > { %v2572_v46 = vsel %vm670_vm4, %v2556_v36, 0.0  ;;  %v2609_v40 = vmul.f32 %v2556_v36, %v2556_v36  ;;  %2033 = vst.msk [vmem:[#allocation2 + $0x28] sm:$0xff] %vm670_vm4, %v2017_v22  ;;  %v2456_v47 = vld [vmem:[#allocation2 + $0x18] sm:$0xff] }
 0x181   : > { %v2573_v49 = vadd.f32 %v2572_v46, %v2571_v28  ;;  %2286 = vst.msk [vmem:[#allocation2 + $0x20] sm:$0xff] %vm670_vm4, %v2270_v41  ;;  %v2472_v51 = vadd.f32 %v2456_v47, %v2420_v14 }
 0x182   : > { %v2625_v55 = vsel %vm670_vm4, %v2609_v40, 0.0  ;;  %v2503_v58 = vld [vmem:[#allocation2 + $0x10] sm:$0xff]  ;;  %v1791_v59 = vpop.f32.mrf.mxu1 }
 0x183   : > { %v2626_v52 = vadd.f32 %v2625_v55, %v2624_v53  ;;  %v2519_v48 = vpack.c.bf16 %v2503_v58, %v2503_v58  ;;  %2488 = vst.msk [vmem:[#allocation2 + $0x18] sm:$0xff] %vm670_vm4, %v2472_v51  ;;  %v1837_v61 = vadd.f32 %v1821_v60, %v1791_v59  ;;  %v2425_v42 = vpop.f32.mrf.mxu0  ;;  %v1824_v58 = vld [vmem:[#allocation2 + $0x50] sm:$0xff] }
 0x185   : > { %v2537_v57 = vunpack.c.l.bf16 %v2519_v48  ;;  %2667 = vst.msk [vmem:[%s4108_s6 + $0x8] sm:$0xf] %vm590_vm1, %v2519_v48  ;;  %v2002_v25 = vld [vmem:[#allocation2 + $0x30] sm:$0xff] }
 0x186   : > { %v2018_v50 = vadd.f32 %v2002_v25, %v1971_v44  ;;  %1853 = vst.msk [vmem:[#allocation2 + $0x38] sm:$0xff] %vm670_vm4, %v1837_v61 }
 0x187   : > { %v2574_v3 = vsel %vm670_vm4, %v2537_v57, 0.0  ;;  %v2610_v62 = vmul.f32 %v2537_v57, %v2537_v57  ;;  %v2255_v63 = vld [vmem:[#allocation2 + $0x28] sm:$0xff]  ;;  %v2225_v45 = vpop.f32.mrf.mxu3  ;;  %v1973_v54 = vpop.f32.mrf.mxu2 }
 0x188   : > { %v2575_v0 = vadd.f32 %v2574_v3, %v2573_v49  ;;  %v2271_v20 = vadd.f32 %v2255_v63, %v2222_v43  ;;  %2034 = vst.msk [vmem:[#allocation2 + $0x30] sm:$0xff] %vm670_vm4, %v2018_v50  ;;  %v2457_v2 = vld [vmem:[#allocation2 + $0x20] sm:$0xff] }
 0x189   : > { %v2627_v56 = vsel %vm670_vm4, %v2610_v62, 0.0  ;;  %v2473_v4 = vadd.f32 %v2457_v2, %v2423_v35 }
 0x18a   : > { %v2628_v5 = vadd.f32 %v2627_v56, %v2626_v52  ;;  %v2504_v6 = vld [vmem:[#allocation2 + $0x18] sm:$0xff]  ;;  %2287 = vst.msk [vmem:[#allocation2 + $0x28] sm:$0xff] %vm670_vm4, %v2271_v20  ;;  %v1794_v1 = vpop.f32.mrf.mxu1 }
 0x18b   : > { %v2520_v11 = vpack.c.bf16 %v2504_v6, %v2504_v6  ;;  %2489 = vst.msk [vmem:[#allocation2 + $0x20] sm:$0xff] %vm670_vm4, %v2473_v4  ;;  %v1838_v7 = vadd.f32 %v1822_v8, %v1794_v1  ;;  %v2428_v9 = vpop.f32.mrf.mxu0  ;;  %v1825_v4 = vld [vmem:[#allocation2 + $0x58] sm:$0xff] }
 0x18d   : > { %v2538_v30 = vunpack.c.l.bf16 %v2520_v11  ;;  %2668 = vst.msk [vmem:[%s4108_s6 + $0xc] sm:$0xf] %vm590_vm1, %v2520_v11  ;;  %v2003_v12 = vld [vmem:[#allocation2 + $0x38] sm:$0xff] }
 0x18e   : > { %v2019_v13 = vadd.f32 %v2003_v12, %v1973_v54  ;;  %1854 = vst.msk [vmem:[#allocation2 + $0x40] sm:$0xff] %vm670_vm4, %v1838_v7 }
 0x18f   : > { %v2558_v14 = vsel %vm2534_vm11, %v2538_v30, 0.0  ;;  %v2256_v10 = vld [vmem:[#allocation2 + $0x30] sm:$0xff]  ;;  %v2227_v15 = vpop.f32.mrf.mxu3  ;;  %v1976_v16 = vpop.f32.mrf.mxu2 }
 0x190   : > { %v2576_v17 = vsel %vm670_vm4, %v2558_v14, 0.0  ;;  %v2611_v18 = vmul.f32 %v2558_v14, %v2558_v14  ;;  %v2272_v19 = vadd.f32 %v2256_v10, %v2225_v45  ;;  %2035 = vst.msk [vmem:[#allocation2 + $0x38] sm:$0xff] %vm670_vm4, %v2019_v13 }
 0x191   : > { %v2577_v21 = vadd.f32 %v2576_v17, %v2575_v0  ;;  %v2458_v23 = vld [vmem:[#allocation2 + $0x28] sm:$0xff] }
 0x192   : > { %v2629_v26 = vsel %vm670_vm4, %v2611_v18, 0.0  ;;  %v2505_v27 = vld [vmem:[#allocation2 + $0x20] sm:$0xff]  ;;  %2288 = vst.msk [vmem:[#allocation2 + $0x30] sm:$0xff] %vm670_vm4, %v2272_v19  ;;  %v2474_v29 = vadd.f32 %v2458_v23, %v2425_v42  ;;  %v1796_v31 = vpop.f32.mrf.mxu1 }
 0x193   : > { %v2630_v34 = vadd.f32 %v2629_v26, %v2628_v5  ;;  %v2521_v35 = vpack.c.bf16 %v2505_v27, %v2505_v27  ;;  %v1839_v37 = vadd.f32 %v1823_v32, %v1796_v31  ;;  %v2430_v33 = vpop.f32.mrf.mxu0  ;;  %v1826_v19 = vld [vmem:[#allocation2 + $0x60] sm:$0xff] }
 0x194   : > { %2490 = vst.msk [vmem:[#allocation2 + $0x28] sm:$0xff] %vm670_vm4, %v2474_v29 }
 0x195   : > { %v2539_v38 = vunpack.c.l.bf16 %v2521_v35  ;;  %2669 = vst.msk [vmem:[%s4108_s6 + $0x10] sm:$0xf] %vm590_vm1, %v2521_v35  ;;  %v2004_v39 = vld [vmem:[#allocation2 + $0x40] sm:$0xff] }
 0x196   : > { %v2020_v22 = vadd.f32 %v2004_v39, %v1976_v16  ;;  %1855 = vst.msk [vmem:[#allocation2 + $0x48] sm:$0xff] %vm670_vm4, %v1839_v37 }
 0x197   : > { %v2578_v36 = vsel %vm670_vm4, %v2539_v38, 0.0  ;;  %v2612_v41 = vmul.f32 %v2539_v38, %v2539_v38  ;;  %v2257_v43 = vld [vmem:[#allocation2 + $0x38] sm:$0xff]  ;;  %v2230_v44 = vpop.f32.mrf.mxu3  ;;  %v1978_v28 = vpop.f32.mrf.mxu2 }
 0x198   : > { %v2579_v46 = vadd.f32 %v2578_v36, %v2577_v21  ;;  %v2273_v40 = vadd.f32 %v2257_v43, %v2227_v15  ;;  %2036 = vst.msk [vmem:[#allocation2 + $0x40] sm:$0xff] %vm670_vm4, %v2020_v22 }
 0x199   : > { %v2631_v47 = vsel %vm670_vm4, %v2612_v41, 0.0  ;;  %v2459_v49 = vld [vmem:[#allocation2 + $0x30] sm:$0xff] }
 0x19a   : > { %v2632_v51 = vadd.f32 %v2631_v47, %v2630_v34  ;;  %2289 = vst.msk [vmem:[#allocation2 + $0x38] sm:$0xff] %vm670_vm4, %v2273_v40  ;;  %v2475_v53 = vadd.f32 %v2459_v49, %v2428_v9  ;;  %v1799_v55 = vpop.f32.mrf.mxu1 }
 0x19b   : > { %v2506_v59 = vld [vmem:[#allocation2 + $0x28] sm:$0xff]  ;;  %v1840_v60 = vadd.f32 %v1824_v58, %v1799_v55  ;;  %v2433_v52 = vpop.f32.mrf.mxu0 }
 0x19c   : > { %v2522_v48 = vpack.c.bf16 %v2506_v59, %v2506_v59  ;;  %2491 = vst.msk [vmem:[#allocation2 + $0x30] sm:$0xff] %vm670_vm4, %v2475_v53 }
 0x19d   : > { %v2005_v61 = vld [vmem:[#allocation2 + $0x48] sm:$0xff]  ;;  %1856 = vst.msk [vmem:[#allocation2 + $0x50] sm:$0xff] %vm670_vm4, %v1840_v60 }
 0x19e   : > { %v2540_v42 = vunpack.c.l.bf16 %v2522_v48  ;;  %2670 = vst.msk [vmem:[%s4108_s6 + $0x14] sm:$0xf] %vm590_vm1, %v2522_v48  ;;  %v2021_v57 = vadd.f32 %v2005_v61, %v1978_v28 }
 0x19f   : > { %v2258_v25 = vld [vmem:[#allocation2 + $0x40] sm:$0xff]  ;;  %v2232_v50 = vpop.f32.mrf.mxu3  ;;  %v1981_v3 = vpop.f32.mrf.mxu2 }
 0x1a0   : > { %v2560_v62 = vsel %vm2534_vm11, %v2540_v42, 0.0  ;;  %v2274_v63 = vadd.f32 %v2258_v25, %v2230_v44  ;;  %2037 = vst.msk [vmem:[#allocation2 + $0x48] sm:$0xff] %vm670_vm4, %v2021_v57 }
 0x1a1   : > { %v2580_v45 = vsel %vm670_vm4, %v2560_v62, 0.0  ;;  %v2613_v54 = vmul.f32 %v2560_v62, %v2560_v62  ;;  %v2460_v0 = vld [vmem:[#allocation2 + $0x38] sm:$0xff] }
 0x1a2   : > { %v2581_v20 = vadd.f32 %v2580_v45, %v2579_v46  ;;  %2290 = vst.msk [vmem:[#allocation2 + $0x40] sm:$0xff] %vm670_vm4, %v2274_v63  ;;  %v2476_v2 = vadd.f32 %v2460_v0, %v2430_v33  ;;  %v1801_v56 = vpop.f32.mrf.mxu1 }
 0x1a3   : > { %v2633_v5 = vsel %vm670_vm4, %v2613_v54, 0.0  ;;  %v2507_v6 = vld [vmem:[#allocation2 + $0x30] sm:$0xff]  ;;  %v1841_v1 = vadd.f32 %v1825_v4, %v1801_v56  ;;  %v2435_v9 = vpop.f32.mrf.mxu0 }
 0x1a4   : > { %v2634_v8 = vadd.f32 %v2633_v5, %v2632_v51  ;;  %v2523_v11 = vpack.c.bf16 %v2507_v6, %v2507_v6  ;;  %2492 = vst.msk [vmem:[#allocation2 + $0x38] sm:$0xff] %vm670_vm4, %v2476_v2  ;;  %v2006_v7 = vld [vmem:[#allocation2 + $0x50] sm:$0xff]  ;;  %v1827_v51 = vld [vmem:[#allocation2 + $0x68] sm:$0xff] }
 0x1a5   : > { %v2022_v30 = vadd.f32 %v2006_v7, %v1981_v3  ;;  %1857 = vst.msk [vmem:[#allocation2 + $0x58] sm:$0xff] %vm670_vm4, %v1841_v1  ;;  %v1828_v54 = vld [vmem:[#allocation2 + $0x70] sm:$0xff] }
 0x1a6   : > { %2671 = vst.msk [vmem:[%s4108_s6 + $0x18] sm:$0xf] %vm590_vm1, %v2523_v11  ;;  %v2541_v12 = vunpack.c.l.bf16 %v2523_v11 }
 0x1a7   : > { %v2259_v13 = vld [vmem:[#allocation2 + $0x48] sm:$0xff]  ;;  %2038 = vst.msk [vmem:[#allocation2 + $0x50] sm:$0xff] %vm670_vm4, %v2022_v30  ;;  %v2235_v14 = vpop.f32.mrf.mxu3  ;;  %v1983_v10 = vpop.f32.mrf.mxu2 }
 0x1a8   : > { %v2275_v15 = vadd.f32 %v2259_v13, %v2232_v50  ;;  %v2614_v21 = vmul.f32 %v2541_v12, %v2541_v12  ;;  %v2582_v31 = vsel %vm670_vm4, %v2541_v12, 0.0 }
 0x1a9   : > { %v2461_v16 = vld [vmem:[#allocation2 + $0x40] sm:$0xff]  ;;  %v2583_v36 = vadd.f32 %v2582_v31, %v2581_v20 }
 0x1aa   : > { %2291 = vst.msk [vmem:[#allocation2 + $0x48] sm:$0xff] %vm670_vm4, %v2275_v15  ;;  %v2477_v17 = vadd.f32 %v2461_v16, %v2433_v52  ;;  %v1804_v18 = vpop.f32.mrf.mxu1  ;;  %v2635_v33 = vsel %vm670_vm4, %v2614_v21, 0.0  ;;  %v1829_v21 = vld [vmem:[#allocation2 + $0x78] sm:$0xff] }
 0x1ab   : > { %v2508_v23 = vld [vmem:[#allocation2 + $0x38] sm:$0xff]  ;;  %v1842_v26 = vadd.f32 %v1826_v19, %v1804_v18  ;;  %v2438_v37 = vpop.f32.mrf.mxu0  ;;  %v2636_v46 = vadd.f32 %v2635_v33, %v2634_v8 }
 0x1ac   : > { %v2524_v27 = vpack.c.bf16 %v2508_v23, %v2508_v23  ;;  %2493 = vst.msk [vmem:[#allocation2 + $0x40] sm:$0xff] %vm670_vm4, %v2477_v17  ;;  %v2007_v29 = vld [vmem:[#allocation2 + $0x58] sm:$0xff] }
 0x1ad   : > { %v2023_v32 = vadd.f32 %v2007_v29, %v1983_v10  ;;  %1858 = vst.msk [vmem:[#allocation2 + $0x60] sm:$0xff] %vm670_vm4, %v1842_v26 }
 0x1ae   : > { %v2542_v34 = vunpack.c.l.bf16 %v2524_v27  ;;  %2672 = vst.msk [vmem:[%s4108_s6 + $0x1c] sm:$0xf] %vm590_vm1, %v2524_v27  ;;  %v2260_v35 = vld [vmem:[#allocation2 + $0x50] sm:$0xff] }
 0x1af   : > { %v2276_v38 = vadd.f32 %v2260_v35, %v2235_v14  ;;  %2039 = vst.msk [vmem:[#allocation2 + $0x58] sm:$0xff] %vm670_vm4, %v2023_v32  ;;  %v2237_v39 = vpop.f32.mrf.mxu3  ;;  %v1986_v22 = vpop.f32.mrf.mxu2 }
 0x1b0   : > { %v2562_v41 = vsel %vm2534_vm11, %v2542_v34, 0.0 }
 0x1b1   : > { %v2584_v43 = vsel %vm670_vm4, %v2562_v41, 0.0  ;;  %v2615_v44 = vmul.f32 %v2562_v41, %v2562_v41  ;;  %2292 = vst.msk [vmem:[#allocation2 + $0x50] sm:$0xff] %vm670_vm4, %v2276_v38  ;;  %v2462_v28 = vld [vmem:[#allocation2 + $0x48] sm:$0xff] }
 0x1b2   : > { %v2585_v40 = vadd.f32 %v2584_v43, %v2583_v36  ;;  %v2478_v47 = vadd.f32 %v2462_v28, %v2435_v9  ;;  %v1806_v49 = vpop.f32.mrf.mxu1 }
 0x1b3   : > { %v2637_v53 = vsel %vm670_vm4, %v2615_v44, 0.0  ;;  %v2509_v55 = vld [vmem:[#allocation2 + $0x40] sm:$0xff]  ;;  %v1843_v58 = vadd.f32 %v1827_v51, %v1806_v49  ;;  %v2440_v50 = vpop.f32.mrf.mxu0 }
 0x1b4   : > { %v2638_v59 = vadd.f32 %v2637_v53, %v2636_v46  ;;  %v2525_v60 = vpack.c.bf16 %v2509_v55, %v2509_v55  ;;  %2494 = vst.msk [vmem:[#allocation2 + $0x48] sm:$0xff] %vm670_vm4, %v2478_v47  ;;  %v2008_v52 = vld [vmem:[#allocation2 + $0x60] sm:$0xff] }
 0x1b5   : > { %v2024_v48 = vadd.f32 %v2008_v52, %v1986_v22  ;;  %1859 = vst.msk [vmem:[#allocation2 + $0x68] sm:$0xff] %vm670_vm4, %v1843_v58 }
 0x1b6   : > { %2673 = vst.msk [vmem:[%s4108_s6 + $0x20] sm:$0xf] %vm590_vm1, %v2525_v60  ;;  %v2261_v61 = vld [vmem:[#allocation2 + $0x58] sm:$0xff]  ;;  %v2543_v42 = vunpack.c.l.bf16 %v2525_v60 }
 0x1b7   : > { %v2277_v57 = vadd.f32 %v2261_v61, %v2237_v39  ;;  %2040 = vst.msk [vmem:[#allocation2 + $0x60] sm:$0xff] %vm670_vm4, %v2024_v48  ;;  %v2240_v62 = vpop.f32.mrf.mxu3  ;;  %v1988_v63 = vpop.f32.mrf.mxu2 }
 0x1b8   : > { %v2463_v25 = vld [vmem:[#allocation2 + $0x50] sm:$0xff]  ;;  %v2616_v0 = vmul.f32 %v2543_v42, %v2543_v42  ;;  %v2586_v5 = vsel %vm670_vm4, %v2543_v42, 0.0 }
 0x1b9   : > { %2293 = vst.msk [vmem:[#allocation2 + $0x58] sm:$0xff] %vm670_vm4, %v2277_v57  ;;  %v2479_v3 = vadd.f32 %v2463_v25, %v2438_v37  ;;  %v2587_v9 = vadd.f32 %v2586_v5, %v2585_v40 }
 0x1ba   : > { %v1809_v45 = vpop.f32.mrf.mxu1  ;;  %v2639_v11 = vsel %vm670_vm4, %v2616_v0, 0.0 }
 0x1bb   : > { %v2510_v20 = vld [vmem:[#allocation2 + $0x48] sm:$0xff]  ;;  %2495 = vst.msk [vmem:[#allocation2 + $0x50] sm:$0xff] %vm670_vm4, %v2479_v3  ;;  %v1844_v2 = vadd.f32 %v1828_v54, %v1809_v45  ;;  %v2640_v15 = vadd.f32 %v2639_v11, %v2638_v59  ;;  %v2443_v18 = vpop.f32.mrf.mxu0 }
 0x1bc   : > { %v2526_v56 = vpack.c.bf16 %v2510_v20, %v2510_v20  ;;  %v2009_v4 = vld [vmem:[#allocation2 + $0x68] sm:$0xff] }
 0x1bd   : > { %v2025_v6 = vadd.f32 %v2009_v4, %v1988_v63  ;;  %1860 = vst.msk [vmem:[#allocation2 + $0x70] sm:$0xff] %vm670_vm4, %v1844_v2 }
 0x1be   : > { %v2544_v1 = vunpack.c.l.bf16 %v2526_v56  ;;  %2674 = vst.msk [vmem:[%s4108_s6 + $0x24] sm:$0xf] %vm590_vm1, %v2526_v56  ;;  %v2262_v8 = vld [vmem:[#allocation2 + $0x60] sm:$0xff] }
 0x1bf   : > { %v2278_v7 = vadd.f32 %v2262_v8, %v2240_v62  ;;  %2041 = vst.msk [vmem:[#allocation2 + $0x68] sm:$0xff] %vm670_vm4, %v2025_v6  ;;  %v2242_v27 = vpop.f32.mrf.mxu3  ;;  %v1991_v29 = vpop.f32.mrf.mxu2 }
 0x1c0   : > { %v2564_v30 = vsel %vm2534_vm11, %v2544_v1, 0.0  ;;  %v2464_v12 = vld [vmem:[#allocation2 + $0x58] sm:$0xff] }
 0x1c1   : > { %v2588_v13 = vsel %vm670_vm4, %v2564_v30, 0.0  ;;  %v2617_v14 = vmul.f32 %v2564_v30, %v2564_v30  ;;  %2294 = vst.msk [vmem:[#allocation2 + $0x60] sm:$0xff] %vm670_vm4, %v2278_v7  ;;  %v2480_v10 = vadd.f32 %v2464_v12, %v2440_v50 }
 0x1c2   : > { %v2589_v16 = vadd.f32 %v2588_v13, %v2587_v9  ;;  %v2511_v17 = vld [vmem:[#allocation2 + $0x50] sm:$0xff]  ;;  %v1811_v19 = vpop.f32.mrf.mxu1 }
 0x1c3   : > { %v2641_v23 = vsel %vm670_vm4, %v2617_v14, 0.0  ;;  %v2527_v26 = vpack.c.bf16 %v2511_v17, %v2511_v17  ;;  %2496 = vst.msk [vmem:[#allocation2 + $0x58] sm:$0xff] %vm670_vm4, %v2480_v10  ;;  %v1845_v31 = vadd.f32 %v1829_v21, %v1811_v19  ;;  %v2445_v28 = vpop.f32.mrf.mxu0 }
 0x1c4   : > { %v2642_v32 = vadd.f32 %v2641_v23, %v2640_v15  ;;  %v2010_v34 = vld [vmem:[#allocation2 + $0x70] sm:$0xff] }
 0x1c5   : > { %2675 = vst.msk [vmem:[%s4108_s6 + $0x28] sm:$0xf] %vm590_vm1, %v2527_v26  ;;  %v2026_v35 = vadd.f32 %v2010_v34, %v1991_v29  ;;  %v2545_v37 = vunpack.c.l.bf16 %v2527_v26 }
 0x1c6   : > { %v2263_v33 = vld [vmem:[#allocation2 + $0x68] sm:$0xff]  ;;  %1861 = vst.msk [vmem:[#allocation2 + $0x78] sm:$0xff] %vm670_vm4, %v1845_v31 }
 0x1c7   : > { %v2279_v38 = vadd.f32 %v2263_v33, %v2242_v27  ;;  %2042 = vst.msk [vmem:[#allocation2 + $0x70] sm:$0xff] %vm670_vm4, %v2026_v35  ;;  %v2618_v36 = vmul.f32 %v2545_v37, %v2545_v37  ;;  %v2590_v44 = vsel %vm670_vm4, %v2545_v37, 0.0  ;;  %v2245_v40 = vpop.f32.mrf.mxu3  ;;  %v1993_v47 = vpop.f32.mrf.mxu2 }
 0x1c8   : > { %v2465_v39 = vld [vmem:[#allocation2 + $0x60] sm:$0xff]  ;;  %v2591_v58 = vadd.f32 %v2590_v44, %v2589_v16 }
 0x1c9   : > { %2295 = vst.msk [vmem:[#allocation2 + $0x68] sm:$0xff] %vm670_vm4, %v2279_v38  ;;  %v2481_v22 = vadd.f32 %v2465_v39, %v2443_v18  ;;  %v2643_v51 = vsel %vm670_vm4, %v2618_v36, 0.0 }
 0x1ca   : > { %v2512_v41 = vld [vmem:[#allocation2 + $0x58] sm:$0xff]  ;;  %v2644_v42 = vadd.f32 %v2643_v51, %v2642_v32 }
 0x1cb   : > { %v2528_v43 = vpack.c.bf16 %v2512_v41, %v2512_v41  ;;  %2497 = vst.msk [vmem:[#allocation2 + $0x60] sm:$0xff] %vm670_vm4, %v2481_v22  ;;  %v2448_v20 = vpop.f32.mrf.mxu0 }
 0x1cd   : > { %v2546_v46 = vunpack.c.l.bf16 %v2528_v43  ;;  %2676 = vst.msk [vmem:[%s4108_s6 + $0x2c] sm:$0xf] %vm590_vm1, %v2528_v43  ;;  %v2011_v49 = vld [vmem:[#allocation2 + $0x78] sm:$0xff] }
 0x1ce   : > { %v2264_v53 = vld [vmem:[#allocation2 + $0x70] sm:$0xff]  ;;  %v2027_v55 = vadd.f32 %v2011_v49, %v1993_v47 }
 0x1cf   : > { %v2566_v59 = vsel %vm2534_vm11, %v2546_v46, 0.0  ;;  %v2280_v60 = vadd.f32 %v2264_v53, %v2245_v40  ;;  %v2247_v54 = vpop.f32.mrf.mxu3 }
 0x1d0   : > { %v2592_v52 = vsel %vm670_vm4, %v2566_v59, 0.0  ;;  %v2619_v48 = vmul.f32 %v2566_v59, %v2566_v59  ;;  %2043 = vst.msk [vmem:[#allocation2 + $0x78] sm:$0xff] %vm670_vm4, %v2027_v55  ;;  %v2466_v61 = vld [vmem:[#allocation2 + $0x68] sm:$0xff] }
 0x1d1   : > { %v2593_v57 = vadd.f32 %v2592_v52, %v2591_v58  ;;  %2296 = vst.msk [vmem:[#allocation2 + $0x70] sm:$0xff] %vm670_vm4, %v2280_v60  ;;  %v2482_v25 = vadd.f32 %v2466_v61, %v2445_v28 }
 0x1d2   : > { %v2645_v50 = vsel %vm670_vm4, %v2619_v48, 0.0  ;;  %v2513_v3 = vld [vmem:[#allocation2 + $0x60] sm:$0xff] }
 0x1d3   : > { %v2646_v62 = vadd.f32 %v2645_v50, %v2644_v42  ;;  %v2529_v63 = vpack.c.bf16 %v2513_v3, %v2513_v3  ;;  %2498 = vst.msk [vmem:[#allocation2 + $0x68] sm:$0xff] %vm670_vm4, %v2482_v25  ;;  %v2450_v15 = vpop.f32.mrf.mxu0 }
 0x1d5   : > { %2677 = vst.msk [vmem:[%s4108_s6 + $0x30] sm:$0xf] %vm590_vm1, %v2529_v63  ;;  %v2547_v45 = vunpack.c.l.bf16 %v2529_v63 }
 0x1d7   : > { %v2265_v0 = vld [vmem:[#allocation2 + $0x78] sm:$0xff]  ;;  %v2620_v5 = vmul.f32 %v2547_v45, %v2547_v45  ;;  %v2594_v8 = vsel %vm670_vm4, %v2547_v45, 0.0 }
 0x1d8   : > { %v2281_v2 = vadd.f32 %v2265_v0, %v2247_v54  ;;  %v2467_v56 = vld [vmem:[#allocation2 + $0x70] sm:$0xff]  ;;  %v2595_v9 = vadd.f32 %v2594_v8, %v2593_v57 }
 0x1d9   : > { %v2483_v4 = vadd.f32 %v2467_v56, %v2448_v20  ;;  %v2647_v7 = vsel %vm670_vm4, %v2620_v5, 0.0 }
 0x1da   : > { %v2514_v6 = vld [vmem:[#allocation2 + $0x68] sm:$0xff]  ;;  %2297 = vst.msk [vmem:[#allocation2 + $0x78] sm:$0xff] %vm670_vm4, %v2281_v2  ;;  %v2648_v14 = vadd.f32 %v2647_v7, %v2646_v62 }
 0x1db   : > { %v2530_v1 = vpack.c.bf16 %v2514_v6, %v2514_v6  ;;  %2499 = vst.msk [vmem:[#allocation2 + $0x70] sm:$0xff] %vm670_vm4, %v2483_v4 }
 0x1dd   : > { %v2548_v11 = vunpack.c.l.bf16 %v2530_v1  ;;  %2678 = vst.msk [vmem:[%s4108_s6 + $0x34] sm:$0xf] %vm590_vm1, %v2530_v1 }
 0x1df   : > { %v2568_v30 = vsel %vm2534_vm11, %v2548_v11, 0.0 }
 0x1e0   : > { %v2596_v12 = vsel %vm670_vm4, %v2568_v30, 0.0  ;;  %v2621_v13 = vmul.f32 %v2568_v30, %v2568_v30 }
 0x1e1   : > { %v2597_v10 = vadd.f32 %v2596_v12, %v2595_v9  ;;  %v2468_v16 = vld [vmem:[#allocation2 + $0x78] sm:$0xff] }
 0x1e2   : > { %v2649_v17 = vsel %vm670_vm4, %v2621_v13, 0.0  ;;  %v2515_v18 = vld [vmem:[#allocation2 + $0x70] sm:$0xff]  ;;  %v2484_v19 = vadd.f32 %v2468_v16, %v2450_v15 }
 0x1e3   : > { %v2650_v21 = vadd.f32 %v2649_v17, %v2648_v14  ;;  %v2531_v23 = vpack.c.bf16 %v2515_v18, %v2515_v18 }
 0x1e4   : > { %2500 = vst.msk [vmem:[#allocation2 + $0x78] sm:$0xff] %vm670_vm4, %v2484_v19 }
 0x1e5   : > { %2679 = vst.msk [vmem:[%s4108_s6 + $0x38] sm:$0xf] %vm590_vm1, %v2531_v23  ;;  %v2549_v26 = vunpack.c.l.bf16 %v2531_v23 }
 0x1e7   : > { %v2622_v27 = vmul.f32 %v2549_v26, %v2549_v26  ;;  %v2598_v32 = vsel %vm670_vm4, %v2549_v26, 0.0 }
 0x1e8   : > { %v2599_v37 = vadd.f32 %v2598_v32, %v2597_v10 }
 0x1e9   : > { %v2651_v35 = vsel %vm670_vm4, %v2622_v27, 0.0 }
 0x1ea   : > { %v2652_v22 = vadd.f32 %v2651_v35, %v2650_v21 }
 0x1eb   : > { %v2516_v29 = vld [vmem:[#allocation2 + $0x78] sm:$0xff] }
 0x1ec   : > { %v2532_v31 = vpack.c.bf16 %v2516_v29, %v2516_v29 }
 0x1ee   : > { %v2550_v34 = vunpack.c.l.bf16 %v2532_v31  ;;  %2680 = vst.msk [vmem:[%s4108_s6 + $0x3c] sm:$0xf] %vm590_vm1, %v2532_v31  ;;  %vm2661_vm1 = vcmask 1040384  }
 0x1f0   : > { %v2570_v33 = vsel %vm2534_vm11, %v2550_v34, 0.0 }
 0x1f1   : > { %v2600_v38 = vsel %vm670_vm4, %v2570_v33, 0.0  ;;  %v2623_v39 = vmul.f32 %v2570_v33, %v2570_v33 }
 0x1f2   : > { %v2601_v36 = vadd.f32 %v2600_v38, %v2599_v37 }
 0x1f3   : > { %v2653_v41 = vsel %vm670_vm4, %v2623_v39, 0.0  ;;  %vm2663_vm4 = vcmask 58368  }
 0x1f4   : > { %v2602_v43 = vrot.slane %v2601_v36, 4  ;;  %v2654_v44 = vadd.f32 %v2653_v41, %v2652_v22 }
 0x1f6   : > { %v2603_v28 = vadd.f32 %v2602_v43, %v2601_v36  ;;  %v2655_v46 = vrot.slane %v2654_v44, 4 }
 0x1f8   : > { %v2604_v40 = vrot.slane %v2603_v28, 2  ;;  %v2656_v47 = vadd.f32 %v2655_v46, %v2654_v44 }
 0x1fa   : > { %v2605_v49 = vadd.f32 %v2604_v40, %v2603_v28  ;;  %v2657_v51 = vrot.slane %v2656_v47, 2 }
 0x1fc   : > { %v2606_v53 = vrot.slane %v2605_v49, 1  ;;  %v2658_v24 = vadd.f32 %v2657_v51, %v2656_v47 }
 0x1fe   : > { %v2659_v55 = vrot.slane %v2658_v24, 1  ;;  %v2607_v58 = vadd.f32 %v2606_v53, %v2605_v49 }
 0x200   : > { %v2660_v59 = vadd.f32 %v2659_v55, %v2658_v24 }
 0x202   : > { %v2662_v60 = vsel %vm2661_vm1, %v2607_v58, %v2660_v59 }
 0x203   : > { %2664 = vst.msk [vmem:[%s281_s12] sm:$0x3] %vm2663_vm4, %v2662_v60 }
 0x204 PF: > { %s16_s22 = sadd.s32 1, %s3415_s22   ;;  %s4292_s18 = smov %s3407_s20 }
 0x205   : > { %p13_p7 = scmp.ge.s32.totalorder %s16_s22, 6   ;;  %s4293_s19 = smov %s3411_s21 }
 0x206   : > { %s4294_s20 = smov %s4297_s23  ;;  %s4295_s21 = smov %s4301_s24 }
 0x207   :  { %15 = sbr.rel (!%p13_p7) target bundleno = 3 (0x3), region = 86 }

</bundles_post_ra>
